<compile_context>
chip_gen: v6e
topology: v6e:2x2x1
jax: 0.10.0
libtpu: 0.0.40
codegen_flags: <defaults>
</compile_context>

<pallas_src>
import functools
import math

import jax
import jax.numpy as jnp
import numpy as np
from jax.experimental import pallas as pl
from jax.experimental.pallas import tpu as pltpu

# ---- config (from NeRFNGPNet.__init__ encoding / network configs) ----
N_LEVELS = 16
N_FEATS = 2
LOG2_T = 19
TABLE_SIZE = 1 << LOG2_T          # 524288 entries per level
BASE_RES = 16
PER_LEVEL_SCALE = 1.5
ENC_DIM = N_LEVELS * N_FEATS      # 32
MLP_WIDTH = 64
DENSITY_OUT = 16                  # sigma = out[:, 0], color input = out[:, 1:16]
COLOR_IN = 15
COLOR_OUT = 3
N_CORNERS = 8
LANES = N_CORNERS * N_LEVELS      # 128 (one full vreg lane width)

# per-level grid scales / resolutions (instant-ngp convention)
_LEVEL_SCALES = [BASE_RES * (PER_LEVEL_SCALE ** l) - 1.0 for l in range(N_LEVELS)]
_LEVEL_RES = [int(math.ceil(s)) + 1 for s in _LEVEL_SCALES]
_LEVEL_DENSE = [(r ** 3) <= TABLE_SIZE for r in _LEVEL_RES]

# hash constants as PYTHON ints (module-level jnp scalars would be captured
# constants inside the kernel trace -> pallas error).  int32 two's-complement
# arithmetic == uint32 wraparound bits.
_HASH_C1 = 2654435761 - (1 << 32)   # -1640531535
_HASH_C2 = 805459861
_HASH_MASK = TABLE_SIZE - 1


def _make_lane_consts():
    """(8, 128) f32 per-lane constants; lane = corner*16 + level.

    rows: [level_scale, ox, oy, oz, dense_res, dense_res^2, is_dense,
           level_offset (= level * 2^19, exact in f32)]
    Passed to both kernels as a regular VMEM input (never closed over).
    Dense-level res <= 77, so res and res^2 are exact in f32.
    """
    lane = np.arange(LANES)
    corner = lane // N_LEVELS
    level = lane % N_LEVELS
    scale = np.array(_LEVEL_SCALES, np.float64)[level]
    ox = (corner & 1).astype(np.float64)
    oy = ((corner >> 1) & 1).astype(np.float64)
    oz = ((corner >> 2) & 1).astype(np.float64)
    dense = np.array(_LEVEL_DENSE)[level]
    res = np.where(dense, np.array(_LEVEL_RES, np.float64)[level], 0.0)
    res2 = res * res
    lvl_off = (level * TABLE_SIZE).astype(np.float64)   # multiples of 2^19 -> exact f32
    rows = np.stack([scale, ox, oy, oz, res, res2,
                     dense.astype(np.float64), lvl_off], axis=0)
    return jnp.asarray(rows, dtype=jnp.float32)


def _normalize_dim(x, d, center, inv_scale):
    # (x - center) * (1/scale) + 0.5, clamped to [0, 1]   -> (tn, 1)
    return jnp.clip((x[:, d:d + 1] - center[d]) * inv_scale[d] + 0.5, 0.0, 1.0)


# --------------------------------------------------------------------------
# Kernel 1: normalization + hash-grid corner table indices
#           (single 128-lane pass over all corner x level combinations)
# --------------------------------------------------------------------------
def _hash_index_kernel(x_ref, fc_ref, idx_ref, *, center, inv_scale):
    x = x_ref[...].astype(jnp.float32)        # (tn, 3)
    fc = fc_ref[...]                          # (8, 128) per-lane constants
    scale_v = fc[0:1, :]                      # level scale per lane
    off = (fc[1:2, :], fc[2:3, :], fc[3:4, :])      # corner offsets (0/1)
    res_v = fc[4:5, :].astype(jnp.int32)
    res2_v = fc[5:6, :].astype(jnp.int32)
    dense_v = fc[6:7, :] > 0.5                # (1, 128) bool
    lvl_off = fc[7:8, :].astype(jnp.int32)    # level * 2^19

    g = []
    for d in range(3):
        xn = _normalize_dim(x, d, center, inv_scale)
        pos = xn * scale_v + 0.5              # (tn, 128)
        cell = jnp.floor(pos)
        g.append(cell.astype(jnp.int32) + off[d].astype(jnp.int32))

    gx, gy, gz = g
    # dense levels: linear index (res stored as 0 for hash levels -> harmless)
    dense_idx = jnp.minimum(gx + gy * res_v + gz * res2_v, _HASH_MASK)
    # hash levels: spatial hash with int32 wraparound
    hash_idx = (gx ^ (gy * _HASH_C1) ^ (gz * _HASH_C2)) & _HASH_MASK

    # flat index into the (16*2^19, 2) table (level offset folded in)
    idx_ref[...] = jnp.where(dense_v, dense_idx, hash_idx) + lvl_off


# --------------------------------------------------------------------------
# Kernel 2: trilinear weights (recomputed) + fused density MLP + color MLP
# --------------------------------------------------------------------------
def _interp_mlp_kernel(x_ref, fc_ref, cf0_ref, cf1_ref,
                       w1a_ref, w1b_ref, w2_ref, c1_ref, c2_ref, c3_ref,
                       out_ref, *, center, inv_scale):
    x = x_ref[...].astype(jnp.float32)        # (tn, 3)
    fc = fc_ref[...]                          # (8, 128)
    scale_v = fc[0:1, :]
    off = (fc[1:2, :], fc[2:3, :], fc[3:4, :])

    # recompute the trilinear corner weights from x (cheap VPU work; avoids
    # round-tripping a (tn, 128) f32 slab through HBM)
    w = None
    for d in range(3):
        xn = _normalize_dim(x, d, center, inv_scale)
        pos = xn * scale_v + 0.5
        frac = pos - jnp.floor(pos)
        ov = off[d]
        wd = ov * frac + (1.0 - ov) * (1.0 - frac)
        w = wd if w is None else w * wd

    # cf0/cf1: (tn, 128) corner feature 0 / 1, lane = corner*16 + level
    p0 = (cf0_ref[...] * w).astype(jnp.bfloat16)
    p1 = (cf1_ref[...] * w).astype(jnp.bfloat16)

    # density net layer 1 with the per-corner reduction folded in:
    # w1a/w1b are (128, 64) corner-replicated copies of W1[:16] / W1[16:32],
    # so p0 @ w1a + p1 @ w1b == corner_sum(enc) @ W1 (pure MXU, no lane slices)
    h = jnp.dot(p0, w1a_ref[...], preferred_element_type=jnp.float32)
    h = h + jnp.dot(p1, w1b_ref[...], preferred_element_type=jnp.float32)
    h = jnp.maximum(h, 0.0)                                            # (tn, 64)
    feat = jnp.dot(h.astype(jnp.bfloat16), w2_ref[...],
                   preferred_element_type=jnp.float32)                 # (tn, 16)
    sigma = feat[:, 0:1]

    # color net: 15 -> 64 (ReLU) -> 64 (ReLU) -> 3 (Sigmoid), no biases.
    # C1 is zero-padded to 16 rows (row 0 = sigma column contributes 0), so
    # feeding all 16 density features is identical to feeding feat[:, 1:16].
    h1 = jnp.maximum(jnp.dot(feat.astype(jnp.bfloat16), c1_ref[...],
                             preferred_element_type=jnp.float32), 0.0)
    h2 = jnp.maximum(jnp.dot(h1.astype(jnp.bfloat16), c2_ref[...],
                             preferred_element_type=jnp.float32), 0.0)
    logits = jnp.dot(h2.astype(jnp.bfloat16), c3_ref[...],
                     preferred_element_type=jnp.float32)               # (tn, 3)
    rgb = 1.0 / (1.0 + jnp.exp(-logits))

    out_ref[...] = jnp.concatenate([rgb, sigma], axis=-1)              # (tn, 4)


# --------------------------------------------------------------------------
# Wrapper (NeRFNGPNet.forward, batch=None path)
# --------------------------------------------------------------------------
def nerf_ngp_forward(params, x, d, batch=None, *, tile_n=512):
    del d, batch  # d is unused by the reference forward; batch=None path only
    N = x.shape[0]
    n_pad = (-N) % tile_n
    xp = jnp.pad(x.astype(jnp.float32), ((0, n_pad), (0, 0)))
    Np = N + n_pad
    grid = (Np // tile_n,)

    center = tuple(float(c) for c in params["center"])
    inv_scale = tuple(1.0 / float(s) for s in params["scale"])
    lane_consts = _make_lane_consts()                      # (8, 128) f32

    idx = pl.pallas_call(
        functools.partial(_hash_index_kernel, center=center, inv_scale=inv_scale),
        out_shape=jax.ShapeDtypeStruct((Np, LANES), jnp.int32),
        grid_spec=pltpu.PrefetchScalarGridSpec(
            num_scalar_prefetch=0,
            grid=grid,
            in_specs=[pl.BlockSpec((tile_n, 3), lambda i: (i, 0)),
                      pl.BlockSpec((8, LANES), lambda i: (0, 0))],
            out_specs=pl.BlockSpec((tile_n, LANES), lambda i: (i, 0))),
        compiler_params=pltpu.CompilerParams(dimension_semantics=("parallel",)),
    )(xp, lane_consts)

    # TODO(synk): data-dependent gather from the 2^23-entry flat hash table
    # stays in plain XLA (single 1-D gather; both feature channels fetched in
    # one pass into lane-dense (Np, 128) slabs, lane = corner*16 + level).
    flat_tables = params["tables"].reshape(N_LEVELS * TABLE_SIZE, N_FEATS)
    gathered = jnp.take(flat_tables, idx, axis=0)          # (Np, 128, 2)
    cf0 = gathered[..., 0]
    cf1 = gathered[..., 1]

    # MLP weights: bf16 for the MXU.  W1 split/replicated per corner so the
    # corner reduction happens inside the MXU; C1 zero-padded to 16 rows.
    w1 = params["W1"]
    w1a = jnp.tile(w1[:N_LEVELS], (N_CORNERS, 1)).astype(jnp.bfloat16)   # (128, 64)
    w1b = jnp.tile(w1[N_LEVELS:], (N_CORNERS, 1)).astype(jnp.bfloat16)   # (128, 64)
    w2 = params["W2"].astype(jnp.bfloat16)
    c1 = jnp.concatenate(
        [jnp.zeros((1, MLP_WIDTH), params["C1"].dtype), params["C1"]],
        axis=0).astype(jnp.bfloat16)                       # (16, 64)
    c2 = params["C2"].astype(jnp.bfloat16)
    c3 = params["C3"].astype(jnp.bfloat16)

    out = pl.pallas_call(
        functools.partial(_interp_mlp_kernel, center=center, inv_scale=inv_scale),
        out_shape=jax.ShapeDtypeStruct((Np, 4), jnp.float32),
        grid_spec=pltpu.PrefetchScalarGridSpec(
            num_scalar_prefetch=0,
            grid=grid,
            in_specs=[
                pl.BlockSpec((tile_n, 3), lambda i: (i, 0)),
                pl.BlockSpec((8, LANES), lambda i: (0, 0)),
                pl.BlockSpec((tile_n, LANES), lambda i: (i, 0)),
                pl.BlockSpec((tile_n, LANES), lambda i: (i, 0)),
                pl.BlockSpec((LANES, MLP_WIDTH), lambda i: (0, 0)),
                pl.BlockSpec((LANES, MLP_WIDTH), lambda i: (0, 0)),
                pl.BlockSpec((MLP_WIDTH, DENSITY_OUT), lambda i: (0, 0)),
                pl.BlockSpec((DENSITY_OUT, MLP_WIDTH), lambda i: (0, 0)),
                pl.BlockSpec((MLP_WIDTH, MLP_WIDTH), lambda i: (0, 0)),
                pl.BlockSpec((MLP_WIDTH, COLOR_OUT), lambda i: (0, 0)),
            ],
            out_specs=pl.BlockSpec((tile_n, 4), lambda i: (i, 0))),
        compiler_params=pltpu.CompilerParams(dimension_semantics=("parallel",)),
    )(xp, lane_consts, cf0, cf1, w1a, w1b, w2, c1, c2, c3)   # (Np, 4)

    color = out[:N, 0:COLOR_OUT]
    sigma = out[:N, COLOR_OUT]
    result = {"embed": 0, "res": 0, "mu": 0, "log_std": 0}
    return color, sigma, result


# --------------------------------------------------------------------------
# Deterministic synthetic parameters (shapes from the module __init__)
# --------------------------------------------------------------------------
def init_params(key):
    ks = jax.random.split(key, 6)

    def u(k, shape, lim):
        return jax.random.uniform(k, shape, jnp.float32, -lim, lim)

    def glorot(k, shape):
        return u(k, shape, math.sqrt(6.0 / (shape[0] + shape[1])))

    return {
        # hash-grid features (instant-ngp style small uniform init)
        "tables": u(ks[0], (N_LEVELS, TABLE_SIZE, N_FEATS), 1e-4),
        # density MLP (FullyFusedMLP, 1 hidden layer, no bias): 32->64->16
        # (row order = feature-major hash-encoding columns, col = f*16 + l)
        "W1": glorot(ks[1], (ENC_DIM, MLP_WIDTH)),
        "W2": glorot(ks[2], (MLP_WIDTH, DENSITY_OUT)),
        # color MLP (FullyFusedMLP, 2 hidden layers, no bias): 15->64->64->3
        "C1": glorot(ks[3], (COLOR_IN, MLP_WIDTH)),
        "C2": glorot(ks[4], (MLP_WIDTH, MLP_WIDTH)),
        "C3": glorot(ks[5], (MLP_WIDTH, COLOR_OUT)),
        # opt.center / opt.scale buffers (deterministic synthetic values)
        "center": (0.0, 0.0, 0.0),
        "scale": (2.0, 2.0, 2.0),
    }


if __name__ == "__main__":
    key = jax.random.PRNGKey(0)
    pkey, xkey, dkey = jax.random.split(key, 3)
    params = init_params(pkey)

    N = 1024
    x = jax.random.uniform(xkey, (N, 3), jnp.float32, minval=-1.0, maxval=1.0)
    d = jax.random.normal(dkey, (N, 3), jnp.float32)  # unused (matches reference)

    color, sigma, result = nerf_ngp_forward(params, x, d)
    jax.block_until_ready((color, sigma))

    assert color.shape == (N, 3) and color.dtype == jnp.float32
    assert sigma.shape == (N,) and sigma.dtype == jnp.float32
    assert bool(jnp.all(jnp.isfinite(color))) and bool(jnp.all(jnp.isfinite(sigma)))
    assert bool(jnp.all((color >= 0.0) & (color <= 1.0)))
    print("KERNEL_OK")
</pallas_src>

<mosaic_0001>
module attributes {stable_mosaic.version = 11 : i64} {
  func.func @_hash_index_kernel(%arg0: i32, %arg1: memref<512x3xf32, #tpu.memory_space<vmem>>, %arg2: memref<8x128xf32, #tpu.memory_space<vmem>>, %arg3: memref<512x128xi32, #tpu.memory_space<vmem>>) attributes {dimension_semantics = [#tpu.dimension_semantics<parallel>], iteration_bounds = array<i64: 2>, scalar_prefetch = 0 : i64, scratch_operands = 0 : i64, tpu.core_type = #tpu.core_type<tc>, window_params = [{transform_indices = @transform_0, window_bounds = array<i64: 512, 3>}, {pipeline_mode = #tpu.pipeline_mode<synchronous>, transform_indices = @transform_1, window_bounds = array<i64: 8, 128>}, {transform_indices = @transform_2, window_bounds = array<i64: 512, 128>}]} {
    %c0 = arith.constant 0 : index
    %c0_0 = arith.constant 0 : index
    %0 = vector.load %arg1[%c0, %c0_0] : memref<512x3xf32, #tpu.memory_space<vmem>>, vector<512x3xf32>
    %c0_1 = arith.constant 0 : index
    %c0_2 = arith.constant 0 : index
    %1 = vector.load %arg2[%c0_1, %c0_2] : memref<8x128xf32, #tpu.memory_space<vmem>>, vector<8x128xf32>
    %2 = vector.extract_strided_slice %1 {offsets = [0, 0], sizes = [1, 128], strides = [1, 1]} : vector<8x128xf32> to vector<1x128xf32>
    %3 = vector.extract_strided_slice %1 {offsets = [1, 0], sizes = [1, 128], strides = [1, 1]} : vector<8x128xf32> to vector<1x128xf32>
    %4 = vector.extract_strided_slice %1 {offsets = [2, 0], sizes = [1, 128], strides = [1, 1]} : vector<8x128xf32> to vector<1x128xf32>
    %5 = vector.extract_strided_slice %1 {offsets = [3, 0], sizes = [1, 128], strides = [1, 1]} : vector<8x128xf32> to vector<1x128xf32>
    %6 = vector.extract_strided_slice %1 {offsets = [4, 0], sizes = [1, 128], strides = [1, 1]} : vector<8x128xf32> to vector<1x128xf32>
    %7 = arith.fptosi %6 : vector<1x128xf32> to vector<1x128xi32>
    %8 = vector.extract_strided_slice %1 {offsets = [5, 0], sizes = [1, 128], strides = [1, 1]} : vector<8x128xf32> to vector<1x128xf32>
    %9 = arith.fptosi %8 : vector<1x128xf32> to vector<1x128xi32>
    %10 = vector.extract_strided_slice %1 {offsets = [6, 0], sizes = [1, 128], strides = [1, 1]} : vector<8x128xf32> to vector<1x128xf32>
    %cst = arith.constant 5.000000e-01 : f32
    %11 = vector.broadcast %cst : f32 to vector<1x128xf32>
    %12 = arith.cmpf ogt, %10, %11 : vector<1x128xf32>
    %13 = vector.extract_strided_slice %1 {offsets = [7, 0], sizes = [1, 128], strides = [1, 1]} : vector<8x128xf32> to vector<1x128xf32>
    %14 = arith.fptosi %13 : vector<1x128xf32> to vector<1x128xi32>
    %15 = vector.extract_strided_slice %0 {offsets = [0, 0], sizes = [512, 1], strides = [1, 1]} : vector<512x3xf32> to vector<512x1xf32>
    %cst_3 = arith.constant 0.000000e+00 : f32
    %16 = vector.broadcast %cst_3 : f32 to vector<512x1xf32>
    %17 = arith.subf %15, %16 : vector<512x1xf32>
    %cst_4 = arith.constant 5.000000e-01 : f32
    %18 = vector.broadcast %cst_4 : f32 to vector<512x1xf32>
    %19 = arith.mulf %17, %18 : vector<512x1xf32>
    %cst_5 = arith.constant 5.000000e-01 : f32
    %20 = vector.broadcast %cst_5 : f32 to vector<512x1xf32>
    %21 = arith.addf %19, %20 : vector<512x1xf32>
    %cst_6 = arith.constant 0.000000e+00 : f32
    %cst_7 = arith.constant 1.000000e+00 : f32
    %22 = vector.broadcast %cst_6 : f32 to vector<512x1xf32>
    %23 = arith.maximumf %22, %21 : vector<512x1xf32>
    %24 = vector.broadcast %cst_7 : f32 to vector<512x1xf32>
    %25 = arith.minimumf %24, %23 : vector<512x1xf32>
    %26 = vector.broadcast %25 : vector<512x1xf32> to vector<512x128xf32>
    %27 = vector.broadcast %2 : vector<1x128xf32> to vector<512x128xf32>
    %28 = arith.mulf %26, %27 : vector<512x128xf32>
    %cst_8 = arith.constant 5.000000e-01 : f32
    %29 = vector.broadcast %cst_8 : f32 to vector<512x128xf32>
    %30 = arith.addf %28, %29 : vector<512x128xf32>
    %31 = math.floor %30 : vector<512x128xf32>
    %32 = arith.fptosi %31 : vector<512x128xf32> to vector<512x128xi32>
    %33 = arith.fptosi %3 : vector<1x128xf32> to vector<1x128xi32>
    %34 = vector.broadcast %33 : vector<1x128xi32> to vector<512x128xi32>
    %35 = arith.addi %32, %34 : vector<512x128xi32>
    %36 = vector.extract_strided_slice %0 {offsets = [0, 1], sizes = [512, 1], strides = [1, 1]} : vector<512x3xf32> to vector<512x1xf32>
    %cst_9 = arith.constant 0.000000e+00 : f32
    %37 = vector.broadcast %cst_9 : f32 to vector<512x1xf32>
    %38 = arith.subf %36, %37 : vector<512x1xf32>
    %cst_10 = arith.constant 5.000000e-01 : f32
    %39 = vector.broadcast %cst_10 : f32 to vector<512x1xf32>
    %40 = arith.mulf %38, %39 : vector<512x1xf32>
    %cst_11 = arith.constant 5.000000e-01 : f32
    %41 = vector.broadcast %cst_11 : f32 to vector<512x1xf32>
    %42 = arith.addf %40, %41 : vector<512x1xf32>
    %cst_12 = arith.constant 0.000000e+00 : f32
    %cst_13 = arith.constant 1.000000e+00 : f32
    %43 = vector.broadcast %cst_12 : f32 to vector<512x1xf32>
    %44 = arith.maximumf %43, %42 : vector<512x1xf32>
    %45 = vector.broadcast %cst_13 : f32 to vector<512x1xf32>
    %46 = arith.minimumf %45, %44 : vector<512x1xf32>
    %47 = vector.broadcast %46 : vector<512x1xf32> to vector<512x128xf32>
    %48 = vector.broadcast %2 : vector<1x128xf32> to vector<512x128xf32>
    %49 = arith.mulf %47, %48 : vector<512x128xf32>
    %cst_14 = arith.constant 5.000000e-01 : f32
    %50 = vector.broadcast %cst_14 : f32 to vector<512x128xf32>
    %51 = arith.addf %49, %50 : vector<512x128xf32>
    %52 = math.floor %51 : vector<512x128xf32>
    %53 = arith.fptosi %52 : vector<512x128xf32> to vector<512x128xi32>
    %54 = arith.fptosi %4 : vector<1x128xf32> to vector<1x128xi32>
    %55 = vector.broadcast %54 : vector<1x128xi32> to vector<512x128xi32>
    %56 = arith.addi %53, %55 : vector<512x128xi32>
    %57 = vector.extract_strided_slice %0 {offsets = [0, 2], sizes = [512, 1], strides = [1, 1]} : vector<512x3xf32> to vector<512x1xf32>
    %cst_15 = arith.constant 0.000000e+00 : f32
    %58 = vector.broadcast %cst_15 : f32 to vector<512x1xf32>
    %59 = arith.subf %57, %58 : vector<512x1xf32>
    %cst_16 = arith.constant 5.000000e-01 : f32
    %60 = vector.broadcast %cst_16 : f32 to vector<512x1xf32>
    %61 = arith.mulf %59, %60 : vector<512x1xf32>
    %cst_17 = arith.constant 5.000000e-01 : f32
    %62 = vector.broadcast %cst_17 : f32 to vector<512x1xf32>
    %63 = arith.addf %61, %62 : vector<512x1xf32>
    %cst_18 = arith.constant 0.000000e+00 : f32
    %cst_19 = arith.constant 1.000000e+00 : f32
    %64 = vector.broadcast %cst_18 : f32 to vector<512x1xf32>
    %65 = arith.maximumf %64, %63 : vector<512x1xf32>
    %66 = vector.broadcast %cst_19 : f32 to vector<512x1xf32>
    %67 = arith.minimumf %66, %65 : vector<512x1xf32>
    %68 = vector.broadcast %67 : vector<512x1xf32> to vector<512x128xf32>
    %69 = vector.broadcast %2 : vector<1x128xf32> to vector<512x128xf32>
    %70 = arith.mulf %68, %69 : vector<512x128xf32>
    %cst_20 = arith.constant 5.000000e-01 : f32
    %71 = vector.broadcast %cst_20 : f32 to vector<512x128xf32>
    %72 = arith.addf %70, %71 : vector<512x128xf32>
    %73 = math.floor %72 : vector<512x128xf32>
    %74 = arith.fptosi %73 : vector<512x128xf32> to vector<512x128xi32>
    %75 = arith.fptosi %5 : vector<1x128xf32> to vector<1x128xi32>
    %76 = vector.broadcast %75 : vector<1x128xi32> to vector<512x128xi32>
    %77 = arith.addi %74, %76 : vector<512x128xi32>
    %78 = vector.broadcast %7 : vector<1x128xi32> to vector<512x128xi32>
    %79 = arith.muli %56, %78 : vector<512x128xi32>
    %80 = arith.addi %35, %79 : vector<512x128xi32>
    %81 = vector.broadcast %9 : vector<1x128xi32> to vector<512x128xi32>
    %82 = arith.muli %77, %81 : vector<512x128xi32>
    %83 = arith.addi %80, %82 : vector<512x128xi32>
    %c524287_i32 = arith.constant 524287 : i32
    %84 = vector.broadcast %c524287_i32 : i32 to vector<512x128xi32>
    %85 = arith.minsi %83, %84 : vector<512x128xi32>
    %c-1640531535_i32 = arith.constant -1640531535 : i32
    %86 = vector.broadcast %c-1640531535_i32 : i32 to vector<512x128xi32>
    %87 = arith.muli %56, %86 : vector<512x128xi32>
    %88 = arith.xori %35, %87 : vector<512x128xi32>
    %c805459861_i32 = arith.constant 805459861 : i32
    %89 = vector.broadcast %c805459861_i32 : i32 to vector<512x128xi32>
    %90 = arith.muli %77, %89 : vector<512x128xi32>
    %91 = arith.xori %88, %90 : vector<512x128xi32>
    %c524287_i32_21 = arith.constant 524287 : i32
    %92 = vector.broadcast %c524287_i32_21 : i32 to vector<512x128xi32>
    %93 = arith.andi %91, %92 : vector<512x128xi32>
    %94 = vector.shape_cast %12 : vector<1x128xi1> to vector<1x128xi1>
    %95 = vector.broadcast %94 : vector<1x128xi1> to vector<512x128xi1>
    %96 = arith.select %95, %85, %93 : vector<512x128xi1>, vector<512x128xi32>
    %97 = vector.broadcast %14 : vector<1x128xi32> to vector<512x128xi32>
    %98 = arith.addi %96, %97 : vector<512x128xi32>
    %c0_22 = arith.constant 0 : index
    %c0_23 = arith.constant 0 : index
    %99 = vector.load %arg3[%c0_22, %c0_23] : memref<512x128xi32, #tpu.memory_space<vmem>>, vector<512x128xi32>
    tpu.vector_store %arg3[%c0_22, %c0_23], %98 {strides = array<i32>} : memref<512x128xi32, #tpu.memory_space<vmem>>, vector<512x128xi32>,
    return
  }
  func.func @transform_0(%arg0: i32) -> (i32, i32) {
    %c0_i32 = arith.constant 0 : i32
    %c0_i32_0 = arith.constant 0 : i32
    return %arg0, %c0_i32 : i32, i32
  }
  func.func @transform_1(%arg0: i32) -> (i32, i32) {
    %c0_i32 = arith.constant 0 : i32
    %c0_i32_0 = arith.constant 0 : i32
    %c0_i32_1 = arith.constant 0 : i32
    return %c0_i32, %c0_i32_0 : i32, i32
  }
  func.func @transform_2(%arg0: i32) -> (i32, i32) {
    %c0_i32 = arith.constant 0 : i32
    %c0_i32_0 = arith.constant 0 : i32
    return %arg0, %c0_i32 : i32, i32
  }
}

</mosaic_0001>

<bundles_post_ra>
// kernel: tpu_custom_call.1
= control target key start
LH: loop header
LB: loop body
LE: loop exit
PB: predicated region body
PF: predicated region fallthrough
CT: control target
= control target key end

     0   :  { %7 = vsyncpa [#allocation3], 0  ;;  %s5936_s0 = inlined_call_operand.vmem [shape: f32[1024,3], index: 0, kind: input, shape index: {}]   ;;  %s5937_s1 = inlined_call_operand.vmem [shape: f32[8,128], index: 1, kind: input, shape index: {}]   ;;  %s5938_s2 = inlined_call_operand.hbm [shape: s32[1024,128], index: 2, kind: output, shape index: {}]  }
   0x1   :  { %9 = vsyncpa [#allocation3 + $0x1], 0  ;;  %s3798_s9 = smov 0   ;;  %s3800_s10 = smov 0  }
   0x2   :  { %s3802_s11 = smov 0   ;;  %s3804_s12 = smov 0  }
   0x3 LB: > { %s3819_s13 = sadd.s32 4294967295, %s3775_s12   ;;  %s3266_s14 = sadd.s32 4294967294, %s3775_s12   ;;  %s3775_s12 = sphi %s3804_s12, %s6502_s12   ;;  %s3771_s11 = sphi %s3802_s11, %s6501_s11   ;;  %s3767_s10 = sphi %s3800_s10, %s6500_s10   ;;  %s3763_s9 = sphi %s3798_s9, %s6499_s9  }
   0x4   : > { %s3823_s15 = sadd.s32 1, %s3775_s12   ;;  %s69_s16 = sadd.s32 1, %s3771_s11 }
   0x5   : > { %s66_s17 = ssub.s32 %s3775_s12, %s3823_s15  ;;  %p79_p0 = scmp.ne.s32.totalorder %s3771_s11, %s3767_s10 }
   0x6   : > { %p67_p1 = scmp.eq.s32.totalorder %s66_s17, 0  ;;  %p80_p2 = scmp.eq.s32.totalorder %s3819_s13, 1 }
   0x7   : > { %p85_p3 = scmp.ne.s32.totalorder %s3767_s10, %s3763_s9  ;;  %p86_p4 = scmp.eq.s32.totalorder %s3266_s14, 1 }
   0x8   : > { %s3834_s18 = scalar_select %p67_p1, %s3771_s11, %s69_s16  }
   0x9   : > { %p3836_p5 = por %p80_p2, %p79_p0  ;;  %p3840_p6 = por %p86_p4, %p85_p3 }
   0xa   : > { %p3269_p7 = scmp.ge.s32.totalorder %s3775_s12, 1  ;;  %p116_p8 = scmp.lt.s32.totalorder %s3775_s12, 3 }
   0xc   : > { %p117_p9 = pnand %p3269_p7, %p116_p8 }
   0xe   : > { %120 = sbr.rel (%p117_p9) target bundleno = 716 (0x2cc), region = 28 }
  0x13   : > { %s3271_s21 = sshll.u32 %s3819_s13, 6  ;;  %v5939_v0 = vmov 0   ;;  %s135_s28 = sand.u32 1, %s3767_s10  }
  0x14   : > { %3710 = vset.pattern.permute.xlu1 %v5939_v0  ;;  %3709 = vset.pattern.permute.xlu0 %v5939_v0  ;;  %p139_p10 = scmp.lt.s32.totalorder %s3271_s21, 127  ;;  %s3270_s29 = sshll.u32 %s135_s28, 9 }
  0x15   : > { %s5324_s30 = scalar_lea.vmem [#allocation2], %s3270_s29  ;;  %s3278_s3 = sshll.u32 %s3819_s13, 13 }
  0x16   : > { %s6504_s21 = smov (!%p139_p10, %s3271_s21), 127  ;;  %s3204_s4 = sshll.u32 %s5324_s30, 4  ;;  %s5889_s4 = int_to_ptr.vmem [resolvable:$true] %s3204_s4 }
  0x17   : > { %s3272_s22 = sshll.u32 %s6504_s21, 3  ;;  %s5887_s7 = scalar_lea.hbm %s5938_s2, %s3278_s3 }
  0x18   : > { %s3852_s25 = scalar_lea.vmem %s5936_s0, %s3272_s22  ;;  %s5896_s8 = scalar_lea.sflag [#allocation3], %s135_s28 }
  0x19   : > { %v147_v1 = vld [vmem:[%s3852_s25 + $0x10] sm:$0xff]  ;;  %v145_v2 = vld [vmem:[%s3852_s25] sm:$0xff]  ;;  %v148_v3 = vld [vmem:[%s3852_s25 + $0x18] sm:$0xff]  ;;  %s3715_s13 = scalar_lea.vmem %s5889_s4, 8192  ;;  %s3780_s14 = smov [#allocation2]  }
  0x1a   : > { %v214_v4 = vmul.f32 0.5, %v147_v1  ;;  %v212_v5 = vmul.f32 0.5, %v145_v2  ;;  %v215_v6 = vmul.f32 0.5, %v148_v3  ;;  %v146_v7 = vld [vmem:[%s3852_s25 + $0x8] sm:$0xff]  ;;  %v149_v9 = vld [vmem:[%s3852_s25 + $0x20] sm:$0xff]  ;;  %v152_v13 = vld [vmem:[%s3852_s25 + $0x38] sm:$0xff]  ;;  %p3716_p11 = scmp.ne.s32.totalorder %s5889_s4, %s3715_s13 }
  0x1b   : > { %v150_v8 = vld [vmem:[%s3852_s25 + $0x28] sm:$0xff]  ;;  %v213_v10 = vmul.f32 0.5, %v146_v7  ;;  %v216_v12 = vmul.f32 0.5, %v149_v9  ;;  %v151_v14 = vld [vmem:[%s3852_s25 + $0x30] sm:$0xff]  ;;  %v219_v18 = vmul.f32 0.5, %v152_v13  ;;  %v153_v28 = vld [vmem:[%s3852_s25 + $0x40] sm:$0xff] }
  0x1c   : > { %v217_v11 = vmul.f32 0.5, %v150_v8  ;;  %v278_v15 = vadd.f32 0.5, %v214_v4  ;;  %v276_v16 = vadd.f32 0.5, %v212_v5  ;;  %v279_v17 = vadd.f32 0.5, %v215_v6  ;;  %v154_v27 = vld [vmem:[%s3852_s25 + $0x48] sm:$0xff]  ;;  %v156_v39 = vld [vmem:[%s3852_s25 + $0x58] sm:$0xff]  ;;  %p3717_p12 = pnand %p3716_p11, %p3836_p5 }
  0x1d   : > { %v277_v19 = vadd.f32 0.5, %v213_v10  ;;  %v280_v21 = vadd.f32 0.5, %v216_v12  ;;  %v218_v22 = vmul.f32 0.5, %v151_v14  ;;  %v283_v33 = vadd.f32 0.5, %v219_v18  ;;  %v155_v40 = vld [vmem:[%s3852_s25 + $0x50] sm:$0xff]  ;;  %v158_v49 = vld [vmem:[%s3852_s25 + $0x68] sm:$0xff] }
  0x1e   : > { %v281_v20 = vadd.f32 0.5, %v217_v11  ;;  %v342_v23 = vmax.f32 %v278_v15, 0.0  ;;  %v340_v24 = vmax.f32 %v276_v16, 0.0  ;;  %v343_v25 = vmax.f32 %v279_v17, 0.0  ;;  %v157_v50 = vld [vmem:[%s3852_s25 + $0x60] sm:$0xff]  ;;  %v160_v59 = vld [vmem:[%s3852_s25 + $0x78] sm:$0xff]  ;;  %p3718_p13 = pneg %p3717_p12 }
  0x1f   : > { %v341_v26 = vmax.f32 %v277_v19, 0.0  ;;  %v344_v32 = vmax.f32 %v280_v21, 0.0  ;;  %v282_v34 = vadd.f32 0.5, %v218_v22  ;;  %v221_v37 = vmul.f32 0.5, %v154_v27  ;;  %v159_v60 = vld [vmem:[%s3852_s25 + $0x70] sm:$0xff]  ;;  %v162_v6 = vld [vmem:[%s3852_s25 + $0x88] sm:$0xff] }
  0x20   : > { %v3864_v29 = vmin.f32 %v342_v23, 1.0  ;;  %v3866_v30 = vmin.f32 %v340_v24, 1.0  ;;  %v345_v31 = vmax.f32 %v281_v20, 0.0  ;;  %v3870_v35 = vmin.f32 %v343_v25, 1.0  ;;  %v161_v7 = vld [vmem:[%s3852_s25 + $0x80] sm:$0xff]  ;;  %v164_v16 = vld [vmem:[%s3852_s25 + $0x98] sm:$0xff] }
  0x21   : > { %v3872_v36 = vmin.f32 %v341_v26, 1.0  ;;  %v220_v38 = vmul.f32 0.5, %v153_v28  ;;  %v3878_v42 = vmin.f32 %v344_v32, 1.0  ;;  %v347_v43 = vmax.f32 %v283_v33, 0.0  ;;  %v163_v17 = vld [vmem:[%s3852_s25 + $0x90] sm:$0xff]  ;;  %v166_v26 = vld [vmem:[%s3852_s25 + $0xa8] sm:$0xff] }
  0x22   : > { %6078 = vst [vmem:[#allocation5_spill] sm:$0xff] %v3864_v29  ;;  %6079 = vst [vmem:[#allocation6_spill] sm:$0xff] %v3866_v30  ;;  %480 = vperm.xlu1 %3710, %v3864_v29   ;;  %470 = vperm.xlu0 %3709, %v3866_v30   ;;  %v3876_v41 = vmin.f32 %v345_v31, 1.0  ;;  %v346_v44 = vmax.f32 %v282_v34, 0.0  ;;  %v285_v45 = vadd.f32 0.5, %v221_v37  ;;  %v223_v47 = vmul.f32 0.5, %v156_v39 }
  0x23   : > { %6080 = vst [vmem:[#allocation7_spill] sm:$0xff] %v3870_v35  ;;  %6081 = vst [vmem:[#allocation8_spill] sm:$0xff] %v3872_v36  ;;  %v284_v46 = vadd.f32 0.5, %v220_v38  ;;  %v222_v48 = vmul.f32 0.5, %v155_v40  ;;  %v3884_v51 = vmin.f32 %v347_v43, 1.0  ;;  %v225_v53 = vmul.f32 0.5, %v158_v49 }
  0x24   : > { %6082 = vst [vmem:[#allocation9_spill] sm:$0xff] %v3876_v41  ;;  %6083 = vst [vmem:[#allocation10_spill] sm:$0xff] %v3878_v42  ;;  %v3886_v52 = vmin.f32 %v346_v44, 1.0  ;;  %v224_v54 = vmul.f32 0.5, %v157_v50  ;;  %v349_v55 = vmax.f32 %v285_v45, 0.0  ;;  %v287_v57 = vadd.f32 0.5, %v223_v47 }
  0x25   : > { %6084 = vst [vmem:[#allocation11_spill] sm:$0xff] %v3884_v51  ;;  %v348_v56 = vmax.f32 %v284_v46, 0.0  ;;  %v286_v58 = vadd.f32 0.5, %v222_v48  ;;  %v289_v61 = vadd.f32 0.5, %v225_v53  ;;  %v227_v63 = vmul.f32 0.5, %v160_v59  ;;  %v165_v27 = vld [vmem:[%s3852_s25 + $0xa0] sm:$0xff] }
  0x26   : > { %485 = vperm.xlu1 %3710, %v3870_v35   ;;  %475 = vperm.xlu0 %3709, %v3872_v36   ;;  %6085 = vst [vmem:[#allocation12_spill] sm:$0xff] %v3886_v52  ;;  %v288_v62 = vadd.f32 0.5, %v224_v54  ;;  %v226_v1 = vmul.f32 0.5, %v159_v60  ;;  %v3894_v2 = vmin.f32 %v349_v55, 1.0  ;;  %v351_v4 = vmax.f32 %v287_v57, 0.0  ;;  %v168_v40 = vld [vmem:[%s3852_s25 + $0xb8] sm:$0xff] }
  0x27   : > { %v3896_v3 = vmin.f32 %v348_v56, 1.0  ;;  %v350_v5 = vmax.f32 %v286_v58, 0.0  ;;  %v353_v8 = vmax.f32 %v289_v61, 0.0  ;;  %v291_v10 = vadd.f32 0.5, %v227_v63  ;;  %v167_v43 = vld [vmem:[%s3852_s25 + $0xb0] sm:$0xff]  ;;  %v170_v54 = vld [vmem:[%s3852_s25 + $0xc8] sm:$0xff] }
  0x28   : > { %6086 = vst [vmem:[#allocation13_spill] sm:$0xff] %v3894_v2  ;;  %v352_v9 = vmax.f32 %v288_v62, 0.0  ;;  %v290_v11 = vadd.f32 0.5, %v226_v1  ;;  %v3902_v12 = vmin.f32 %v351_v4, 1.0  ;;  %v229_v14 = vmul.f32 0.5, %v162_v6  ;;  %v169_v55 = vld [vmem:[%s3852_s25 + $0xc0] sm:$0xff] }
  0x29   : > { %6087 = vst [vmem:[#allocation14_spill] sm:$0xff] %v3896_v3  ;;  %v3904_v13 = vmin.f32 %v350_v5, 1.0  ;;  %v228_v15 = vmul.f32 0.5, %v161_v7  ;;  %v3908_v18 = vmin.f32 %v353_v8, 1.0  ;;  %v355_v20 = vmax.f32 %v291_v10, 0.0  ;;  %v172_v1 = vld [vmem:[%s3852_s25 + $0xd8] sm:$0xff] }
  0x2a   : > { %495 = vperm.xlu1 %3710, %v3876_v41   ;;  %490 = vperm.xlu0 %3709, %v3878_v42   ;;  %6088 = vst [vmem:[#allocation15_spill] sm:$0xff] %v3902_v12  ;;  %v3910_v19 = vmin.f32 %v352_v9, 1.0  ;;  %v354_v21 = vmax.f32 %v290_v11, 0.0  ;;  %v293_v22 = vadd.f32 0.5, %v229_v14  ;;  %v231_v24 = vmul.f32 0.5, %v164_v16  ;;  %v171_v4 = vld [vmem:[%s3852_s25 + $0xd0] sm:$0xff] }
  0x2b   : > { %6089 = vst [vmem:[#allocation16_spill] sm:$0xff] %v3904_v13  ;;  %6090 = vst [vmem:[#allocation17_spill] sm:$0xff] %v3908_v18  ;;  %v292_v23 = vadd.f32 0.5, %v228_v15  ;;  %v230_v25 = vmul.f32 0.5, %v163_v17  ;;  %v3916_v28 = vmin.f32 %v355_v20, 1.0  ;;  %v233_v32 = vmul.f32 0.5, %v166_v26 }
  0x2c   : > { %6091 = vst [vmem:[#allocation18_spill] sm:$0xff] %v3910_v19  ;;  %v3918_v31 = vmin.f32 %v354_v21, 1.0  ;;  %v232_v33 = vmul.f32 0.5, %v165_v27  ;;  %v357_v34 = vmax.f32 %v293_v22, 0.0  ;;  %v295_v38 = vadd.f32 0.5, %v231_v24  ;;  %v174_v15 = vld [vmem:[%s3852_s25 + $0xe8] sm:$0xff] }
  0x2d   : > { %6092 = vst [vmem:[#allocation19_spill] sm:$0xff] %v3916_v28  ;;  %v356_v37 = vmax.f32 %v292_v23, 0.0  ;;  %v294_v39 = vadd.f32 0.5, %v230_v25  ;;  %v297_v44 = vadd.f32 0.5, %v233_v32  ;;  %v235_v46 = vmul.f32 0.5, %v168_v40  ;;  %v173_v16 = vld [vmem:[%s3852_s25 + $0xe0] sm:$0xff] }
  0x2e   : > { %505 = vperm.xlu1 %3710, %v3884_v51   ;;  %500 = vperm.xlu0 %3709, %v3886_v52   ;;  %6093 = vst [vmem:[#allocation20_spill] sm:$0xff] %v3918_v31  ;;  %v296_v45 = vadd.f32 0.5, %v232_v33  ;;  %v234_v47 = vmul.f32 0.5, %v167_v43  ;;  %v3926_v48 = vmin.f32 %v357_v34, 1.0  ;;  %v359_v50 = vmax.f32 %v295_v38, 0.0  ;;  %v176_v27 = vld [vmem:[%s3852_s25 + $0xf8] sm:$0xff] }
  0x2f   : > { %v3928_v49 = vmin.f32 %v356_v37, 1.0  ;;  %v358_v53 = vmax.f32 %v294_v39, 0.0  ;;  %v361_v56 = vmax.f32 %v297_v44, 0.0  ;;  %v299_v58 = vadd.f32 0.5, %v235_v46  ;;  %v175_v32 = vld [vmem:[%s3852_s25 + $0xf0] sm:$0xff]  ;;  %v177_v46 = vld [vmem:[%s3852_s25 + $0x100] sm:$0xff] }
  0x30   : > { %6094 = vst [vmem:[#allocation21_spill] sm:$0xff] %v3926_v48  ;;  %v360_v57 = vmax.f32 %v296_v45, 0.0  ;;  %v298_v59 = vadd.f32 0.5, %v234_v47  ;;  %v3934_v60 = vmin.f32 %v359_v50, 1.0  ;;  %v237_v62 = vmul.f32 0.5, %v170_v54  ;;  %v178_v45 = vld [vmem:[%s3852_s25 + $0x108] sm:$0xff] }
  0x31   : > { %6095 = vst [vmem:[#allocation22_spill] sm:$0xff] %v3928_v49  ;;  %v3936_v61 = vmin.f32 %v358_v53, 1.0  ;;  %v236_v63 = vmul.f32 0.5, %v169_v55  ;;  %v3940_v5 = vmin.f32 %v361_v56, 1.0  ;;  %v363_v7 = vmax.f32 %v299_v58, 0.0  ;;  %s3719_s16 = sshll.u32 %s3780_s14, 4  ;;  %s3720_s16 = int_to_ptr.vmem [resolvable:$false] %s3719_s16 }
  0x32   : > { %515 = vperm.xlu1 %3710, %v3894_v2   ;;  %510 = vperm.xlu0 %3709, %v3896_v3   ;;  %6096 = vst [vmem:[#allocation23_spill] sm:$0xff] %v3934_v60  ;;  %v3942_v6 = vmin.f32 %v360_v57, 1.0  ;;  %v362_v8 = vmax.f32 %v298_v59, 0.0  ;;  %v301_v9 = vadd.f32 0.5, %v237_v62  ;;  %v239_v11 = vmul.f32 0.5, %v172_v1  ;;  %v180_v59 = vld [vmem:[%s3852_s25 + $0x118] sm:$0xff]  ;;  %p3722_p0 = scmp.lt.s32.totalorder %s5889_s4, %s3720_s16 }
  0x33   : > { %6097 = vst [vmem:[#allocation24_spill] sm:$0xff] %v3936_v61  ;;  %6098 = vst [vmem:[#allocation25_spill] sm:$0xff] %v3940_v5  ;;  %v300_v10 = vadd.f32 0.5, %v236_v63  ;;  %v238_v14 = vmul.f32 0.5, %v171_v4  ;;  %v3948_v17 = vmin.f32 %v363_v7, 1.0  ;;  %v241_v21 = vmul.f32 0.5, %v174_v15 }
  0x34   : > { %v3950_v20 = vmin.f32 %v362_v8, 1.0  ;;  %v240_v22 = vmul.f32 0.5, %v173_v16  ;;  %v365_v23 = vmax.f32 %v301_v9, 0.0  ;;  %v303_v25 = vadd.f32 0.5, %v239_v11  ;;  %v179_v62 = vld [vmem:[%s3852_s25 + $0x110] sm:$0xff]  ;;  %v181_v15 = vld [vmem:[%s3852_s25 + $0x120] sm:$0xff] }
  0x35   : > { %v364_v24 = vmax.f32 %v300_v10, 0.0  ;;  %v302_v26 = vadd.f32 0.5, %v238_v14  ;;  %v305_v33 = vadd.f32 0.5, %v241_v21  ;;  %v243_v37 = vmul.f32 0.5, %v176_v27  ;;  %v182_v14 = vld [vmem:[%s3852_s25 + $0x128] sm:$0xff]  ;;  %s3721_s17 = scalar_lea.vmem %s3720_s16, 16384 }
  0x36   : > { %525 = vperm.xlu1 %3710, %v3902_v12   ;;  %520 = vperm.xlu0 %3709, %v3904_v13   ;;  %v304_v34 = vadd.f32 0.5, %v240_v22  ;;  %v242_v38 = vmul.f32 0.5, %v175_v32  ;;  %v3958_v39 = vmin.f32 %v365_v23, 1.0  ;;  %v367_v43 = vmax.f32 %v303_v25, 0.0  ;;  %v184_v32 = vld [vmem:[%s3852_s25 + $0x138] sm:$0xff]  ;;  %p3723_p1 = scmp.lt.s32.totalorder %s3721_s17, %s3715_s13 }
  0x37   : > { %v3960_v40 = vmin.f32 %v364_v24, 1.0  ;;  %v366_v44 = vmax.f32 %v302_v26, 0.0  ;;  %v369_v47 = vmax.f32 %v305_v33, 0.0  ;;  %v307_v53 = vadd.f32 0.5, %v243_v37  ;;  %v183_v33 = vld [vmem:[%s3852_s25 + $0x130] sm:$0xff] }
  0x38   : > { %v368_v50 = vmax.f32 %v304_v34, 0.0  ;;  %v306_v54 = vadd.f32 0.5, %v242_v38  ;;  %v3966_v55 = vmin.f32 %v367_v43, 1.0  ;;  %v245_v57 = vmul.f32 0.5, %v178_v45  ;;  %p3724_p2 = por %p3723_p1, %p3722_p0 }
  0x39   : > { %v3968_v56 = vmin.f32 %v366_v44, 1.0  ;;  %v244_v58 = vmul.f32 0.5, %v177_v46  ;;  %v3972_v63 = vmin.f32 %v369_v47, 1.0  ;;  %v371_v4 = vmax.f32 %v307_v53, 0.0  ;;  %v185_v53 = vld [vmem:[%s3852_s25 + $0x140] sm:$0xff] }
  0x3a   : > { %535 = vperm.xlu1 %3710, %v3908_v18   ;;  %530 = vperm.xlu0 %3709, %v3910_v19   ;;  %6099 = vst [vmem:[#allocation26_spill] sm:$0xff] %v3966_v55  ;;  %v3974_v1 = vmin.f32 %v368_v50, 1.0  ;;  %v370_v7 = vmax.f32 %v306_v54, 0.0  ;;  %v309_v8 = vadd.f32 0.5, %v245_v57  ;;  %v247_v10 = vmul.f32 0.5, %v180_v59  ;;  %v186_v50 = vld [vmem:[%s3852_s25 + $0x148] sm:$0xff]  ;;  %p3725_p3 = pnand %p3724_p2, %p3718_p13 }
  0x3b   : > { %6100 = vst [vmem:[#allocation27_spill] sm:$0xff] %v3972_v63  ;;  %v308_v9 = vadd.f32 0.5, %v244_v58  ;;  %v246_v11 = vmul.f32 0.5, %v179_v62  ;;  %v3980_v16 = vmin.f32 %v371_v4, 1.0  ;;  %v249_v22 = vmul.f32 0.5, %v182_v14 }
  0x3c   : > { %6101 = vst [vmem:[#allocation28_spill] sm:$0xff] %v3974_v1  ;;  %v3982_v21 = vmin.f32 %v370_v7, 1.0  ;;  %v248_v23 = vmul.f32 0.5, %v181_v15  ;;  %v373_v24 = vmax.f32 %v309_v8, 0.0  ;;  %v311_v26 = vadd.f32 0.5, %v247_v10  ;;  %v187_v10 = vld [vmem:[%s3852_s25 + $0x150] sm:$0xff] }
  0x3d   : > { %6102 = vst [vmem:[#allocation29_spill] sm:$0xff] %v3980_v16  ;;  %v372_v25 = vmax.f32 %v308_v9, 0.0  ;;  %v310_v27 = vadd.f32 0.5, %v246_v11  ;;  %v313_v34 = vadd.f32 0.5, %v249_v22  ;;  %v251_v38 = vmul.f32 0.5, %v184_v32  ;;  %v188_v9 = vld [vmem:[%s3852_s25 + $0x158] sm:$0xff] }
  0x3e   : > { %545 = vperm.xlu1 %3710, %v3916_v28   ;;  %540 = vperm.xlu0 %3709, %v3918_v31   ;;  %6103 = vst [vmem:[#allocation30_spill] sm:$0xff] %v3982_v21  ;;  %v312_v37 = vadd.f32 0.5, %v248_v23  ;;  %v250_v43 = vmul.f32 0.5, %v183_v33  ;;  %v3990_v44 = vmin.f32 %v373_v24, 1.0  ;;  %v375_v46 = vmax.f32 %v311_v26, 0.0  ;;  %v189_v32 = vld [vmem:[%s3852_s25 + $0x160] sm:$0xff] }
  0x3f   : > { %v3992_v45 = vmin.f32 %v372_v25, 1.0  ;;  %v374_v47 = vmax.f32 %v310_v27, 0.0  ;;  %v377_v54 = vmax.f32 %v313_v34, 0.0  ;;  %v315_v58 = vadd.f32 0.5, %v251_v38  ;;  %v190_v27 = vld [vmem:[%s3852_s25 + $0x168] sm:$0xff] }
  0x40   : > { %6104 = vst [vmem:[#allocation31_spill] sm:$0xff] %v3990_v44  ;;  %v376_v57 = vmax.f32 %v312_v37, 0.0  ;;  %v314_v59 = vadd.f32 0.5, %v250_v43  ;;  %v3998_v62 = vmin.f32 %v375_v46, 1.0  ;;  %v253_v7 = vmul.f32 0.5, %v186_v50 }
  0x41   : > { %6105 = vst [vmem:[#allocation32_spill] sm:$0xff] %v3992_v45  ;;  %v4000_v4 = vmin.f32 %v374_v47, 1.0  ;;  %v252_v8 = vmul.f32 0.5, %v185_v53  ;;  %v4004_v11 = vmin.f32 %v377_v54, 1.0  ;;  %v379_v15 = vmax.f32 %v315_v58, 0.0  ;;  %v192_v53 = vld [vmem:[%s3852_s25 + $0x178] sm:$0xff] }
  0x42   : > { %555 = vperm.xlu1 %3710, %v3926_v48   ;;  %550 = vperm.xlu0 %3709, %v3928_v49   ;;  %6106 = vst [vmem:[#allocation33_spill] sm:$0xff] %v3998_v62  ;;  %v4006_v14 = vmin.f32 %v376_v57, 1.0  ;;  %v378_v22 = vmax.f32 %v314_v59, 0.0  ;;  %v317_v23 = vadd.f32 0.5, %v253_v7  ;;  %v255_v25 = vmul.f32 0.5, %v188_v9  ;;  %v191_v54 = vld [vmem:[%s3852_s25 + $0x170] sm:$0xff] }
  0x43   : > { %6107 = vst [vmem:[#allocation34_spill] sm:$0xff] %v4000_v4  ;;  %6108 = vst [vmem:[#allocation35_spill] sm:$0xff] %v4004_v11  ;;  %v316_v24 = vadd.f32 0.5, %v252_v8  ;;  %v254_v26 = vmul.f32 0.5, %v187_v10  ;;  %v4012_v33 = vmin.f32 %v379_v15, 1.0  ;;  %v257_v37 = vmul.f32 0.5, %v190_v27 }
  0x44   : > { %6109 = vst [vmem:[#allocation36_spill] sm:$0xff] %v4006_v14  ;;  %v4014_v34 = vmin.f32 %v378_v22, 1.0  ;;  %v256_v38 = vmul.f32 0.5, %v189_v32  ;;  %v381_v43 = vmax.f32 %v317_v23, 0.0  ;;  %v319_v47 = vadd.f32 0.5, %v255_v25  ;;  %v194_v22 = vld [vmem:[%s3852_s25 + $0x188] sm:$0xff] }
  0x45   : > { %6110 = vst [vmem:[#allocation37_spill] sm:$0xff] %v4012_v33  ;;  %v380_v46 = vmax.f32 %v316_v24, 0.0  ;;  %v318_v50 = vadd.f32 0.5, %v254_v26  ;;  %v321_v57 = vadd.f32 0.5, %v257_v37  ;;  %v259_v59 = vmul.f32 0.5, %v192_v53  ;;  %v193_v23 = vld [vmem:[%s3852_s25 + $0x180] sm:$0xff] }
  0x46   : > { %565 = vperm.xlu1 %3710, %v3934_v60   ;;  %560 = vperm.xlu0 %3709, %v3936_v61   ;;  %6111 = vst [vmem:[#allocation38_spill] sm:$0xff] %v4014_v34  ;;  %v320_v58 = vadd.f32 0.5, %v256_v38  ;;  %v258_v7 = vmul.f32 0.5, %v191_v54  ;;  %v4022_v8 = vmin.f32 %v381_v43, 1.0  ;;  %v383_v10 = vmax.f32 %v319_v47, 0.0  ;;  %v195_v47 = vld [vmem:[%s3852_s25 + $0x190] sm:$0xff] }
  0x47   : > { %v4024_v9 = vmin.f32 %v380_v46, 1.0  ;;  %v382_v15 = vmax.f32 %v318_v50, 0.0  ;;  %v385_v24 = vmax.f32 %v321_v57, 0.0  ;;  %v323_v26 = vadd.f32 0.5, %v259_v59  ;;  %v196_v46 = vld [vmem:[%s3852_s25 + $0x198] sm:$0xff] }
  0x48   : > { %6112 = vst [vmem:[#allocation39_spill] sm:$0xff] %v4022_v8  ;;  %v384_v25 = vmax.f32 %v320_v58, 0.0  ;;  %v322_v27 = vadd.f32 0.5, %v258_v7  ;;  %v4030_v32 = vmin.f32 %v383_v10, 1.0  ;;  %v261_v38 = vmul.f32 0.5, %v194_v22  ;;  %v197_v22 = vld [vmem:[%s3852_s25 + $0x1a0] sm:$0xff] }
  0x49   : > { %6113 = vst [vmem:[#allocation40_spill] sm:$0xff] %v4024_v9  ;;  %v4032_v37 = vmin.f32 %v382_v15, 1.0  ;;  %v260_v43 = vmul.f32 0.5, %v193_v23  ;;  %v4036_v50 = vmin.f32 %v385_v24, 1.0  ;;  %v387_v54 = vmax.f32 %v323_v26, 0.0  ;;  %v198_v15 = vld [vmem:[%s3852_s25 + $0x1a8] sm:$0xff] }
  0x4a   : > { %575 = vperm.xlu1 %3710, %v3940_v5   ;;  %570 = vperm.xlu0 %3709, %v3942_v6   ;;  %6114 = vst [vmem:[#allocation41_spill] sm:$0xff] %v4030_v32  ;;  %v4038_v53 = vmin.f32 %v384_v25, 1.0  ;;  %v386_v57 = vmax.f32 %v322_v27, 0.0  ;;  %v325_v58 = vadd.f32 0.5, %v261_v38  ;;  %v263_v7 = vmul.f32 0.5, %v196_v46  ;;  %v200_v46 = vld [vmem:[%s3852_s25 + $0x1b8] sm:$0xff] }
  0x4b   : > { %6115 = vst [vmem:[#allocation42_spill] sm:$0xff] %v4032_v37  ;;  %6116 = vst [vmem:[#allocation43_spill] sm:$0xff] %v4036_v50  ;;  %v324_v59 = vadd.f32 0.5, %v260_v43  ;;  %v262_v10 = vmul.f32 0.5, %v195_v47  ;;  %v4044_v23 = vmin.f32 %v387_v54, 1.0  ;;  %v265_v25 = vmul.f32 0.5, %v198_v15 }
  0x4c   : > { %6117 = vst [vmem:[#allocation44_spill] sm:$0xff] %v4038_v53  ;;  %v4046_v24 = vmin.f32 %v386_v57, 1.0  ;;  %v264_v0 = vmul.f32 0.5, %v197_v22  ;;  %v389_v26 = vmax.f32 %v325_v58, 0.0  ;;  %v327_v38 = vadd.f32 0.5, %v263_v7  ;;  %v199_v47 = vld [vmem:[%s3852_s25 + $0x1b0] sm:$0xff] }
  0x4d   : > { %6118 = vst [vmem:[#allocation45_spill] sm:$0xff] %v4044_v23  ;;  %v388_v27 = vmax.f32 %v324_v59, 0.0  ;;  %v326_v43 = vadd.f32 0.5, %v262_v10  ;;  %v267_v54 = vmul.f32 0.5, %v200_v46  ;;  %v202_v7 = vld [vmem:[%s3852_s25 + $0x1c8] sm:$0xff]  ;;  %v201_v10 = vld [vmem:[%s3852_s25 + $0x1c0] sm:$0xff] }
  0x4e   : > { %585 = vperm.xlu1 %3710, %v3948_v17   ;;  %580 = vperm.xlu0 %3709, %v3950_v20   ;;  %6119 = vst [vmem:[#allocation46_spill] sm:$0xff] %v4046_v24  ;;  %v4054_v57 = vmin.f32 %v389_v26, 1.0  ;;  %v391_v58 = vmax.f32 %v327_v38, 0.0  ;;  %v204_v38 = vld [vmem:[%s3852_s25 + $0x1d8] sm:$0xff] }
  0x4f   : > { %v4056_v15 = vmin.f32 %v388_v27, 1.0  ;;  %v390_v59 = vmax.f32 %v326_v43, 0.0  ;;  %v269_v27 = vmul.f32 0.5, %v202_v7  ;;  %v203_v43 = vld [vmem:[%s3852_s25 + $0x1d0] sm:$0xff]  ;;  %v206_v7 = vld [vmem:[%s3852_s25 + $0x1e8] sm:$0xff] }
  0x50   : > { %6120 = vst [vmem:[#allocation47_spill] sm:$0xff] %v4054_v57  ;;  %v4062_v46 = vmin.f32 %v391_v58, 1.0 }
  0x51   : > { %6121 = vst [vmem:[#allocation48_spill] sm:$0xff] %v4056_v15  ;;  %v4064_v26 = vmin.f32 %v390_v59, 1.0  ;;  %v271_v59 = vmul.f32 0.5, %v204_v38 }
  0x52   : > { %595 = vperm.xlu1 %3710, %v3958_v39   ;;  %590 = vperm.xlu0 %3709, %v3960_v40   ;;  %6122 = vst [vmem:[#allocation49_spill] sm:$0xff] %v4062_v46 }
  0x53   : > { %6123 = vst [vmem:[#allocation50_spill] sm:$0xff] %v4064_v26 }
  0x56   : > { %605 = vperm.xlu1 %3710, %v3966_v55   ;;  %600 = vperm.xlu0 %3709, %v3968_v56  }
  0x5a   : > { %615 = vperm.xlu1 %3710, %v3972_v63   ;;  %610 = vperm.xlu0 %3709, %v3974_v1  }
  0x5e   : > { %625 = vperm.xlu1 %3710, %v3980_v16   ;;  %620 = vperm.xlu0 %3709, %v3982_v21  }
  0x62   : > { %635 = vperm.xlu1 %3710, %v3990_v44   ;;  %630 = vperm.xlu0 %3709, %v3992_v45  }
  0x66   : > { %645 = vperm.xlu1 %3710, %v3998_v62   ;;  %640 = vperm.xlu0 %3709, %v4000_v4  }
  0x6a   : > { %655 = vperm.xlu1 %3710, %v4004_v11   ;;  %650 = vperm.xlu0 %3709, %v4006_v14  }
  0x6e   : > { %665 = vperm.xlu1 %3710, %v4012_v33   ;;  %660 = vperm.xlu0 %3709, %v4014_v34  }
  0x72   : > { %675 = vperm.xlu1 %3710, %v4022_v8   ;;  %670 = vperm.xlu0 %3709, %v4024_v9   ;;  %v266_v8 = vmul.f32 0.5, %v199_v47  ;;  %v268_v47 = vmul.f32 0.5, %v201_v10  ;;  %v205_v10 = vld [vmem:[%s3852_s25 + $0x1e0] sm:$0xff] }
  0x74   : > { %v332_v58 = vadd.f32 0.5, %v268_v47  ;;  %v208_v47 = vld [vmem:[%s3852_s25 + $0x1f8] sm:$0xff] }
  0x76   : > { %685 = vperm.xlu1 %3710, %v4030_v32   ;;  %680 = vperm.xlu0 %3709, %v4032_v37   ;;  %v329_v32 = vadd.f32 0.5, %v265_v25  ;;  %v328_v37 = vadd.f32 0.5, %v264_v0  ;;  %v331_v25 = vadd.f32 0.5, %v267_v54  ;;  %v330_v0 = vadd.f32 0.5, %v266_v8 }
  0x77   : > { %v333_v54 = vadd.f32 0.5, %v269_v27  ;;  %v335_v27 = vadd.f32 0.5, %v271_v59 }
  0x78   : > { %v393_v22 = vmax.f32 %v329_v32, 0.0  ;;  %v394_v8 = vmax.f32 %v330_v0, 0.0  ;;  %v396_v0 = vmax.f32 %v332_v58, 0.0 }
  0x7a   : > { %695 = vperm.xlu1 %3710, %v4036_v50   ;;  %690 = vperm.xlu0 %3709, %v4038_v53   ;;  %v392_v50 = vmax.f32 %v328_v37, 0.0  ;;  %v395_v37 = vmax.f32 %v331_v25, 0.0  ;;  %v397_v25 = vmax.f32 %v333_v54, 0.0  ;;  %v275_v53 = vmul.f32 0.5, %v208_v47 }
  0x7c   : > { %v4070_v32 = vmin.f32 %v392_v50, 1.0  ;;  %v273_v50 = vmul.f32 0.5, %v206_v7  ;;  %v399_v7 = vmax.f32 %v335_v27, 0.0  ;;  %v339_v58 = vadd.f32 0.5, %v275_v53 }
  0x7e   : > { %705 = vperm.xlu1 %3710, %v4044_v23   ;;  %700 = vperm.xlu0 %3709, %v4046_v24   ;;  %v4068_v23 = vmin.f32 %v393_v22, 1.0  ;;  %6125 = vst [vmem:[#allocation52_spill] sm:$0xff] %v4070_v32  ;;  %v4078_v22 = vmin.f32 %v394_v8, 1.0  ;;  %v272_v24 = vmul.f32 0.5, %v205_v10  ;;  %v337_v38 = vadd.f32 0.5, %v273_v50 }
  0x7f   : > { %v4088_v8 = vmin.f32 %v396_v0, 1.0 }
  0x80   : > { %6124 = vst [vmem:[#allocation51_spill] sm:$0xff] %v4068_v23  ;;  %6127 = vst [vmem:[#allocation54_spill] sm:$0xff] %v4078_v22  ;;  %v401_v54 = vmax.f32 %v337_v38, 0.0 }
  0x81   : > { %6129 = vst [vmem:[#allocation56_spill] sm:$0xff] %v4088_v8 }
  0x82   : > { %715 = vperm.xlu1 %3710, %v4054_v57   ;;  %710 = vperm.xlu0 %3709, %v4056_v15   ;;  %v270_v57 = vmul.f32 0.5, %v203_v43  ;;  %v4076_v15 = vmin.f32 %v395_v37, 1.0  ;;  %v336_v43 = vadd.f32 0.5, %v272_v24  ;;  %v4086_v37 = vmin.f32 %v397_v25, 1.0 }
  0x83   : > { %v4098_v50 = vmin.f32 %v401_v54, 1.0 }
  0x84   : > { %6126 = vst [vmem:[#allocation53_spill] sm:$0xff] %v4076_v15  ;;  %6128 = vst [vmem:[#allocation55_spill] sm:$0xff] %v4086_v37 }
  0x85   : > { %6132 = vst [vmem:[#allocation59_spill] sm:$0xff] %v4098_v50 }
  0x86   : > { %725 = vperm.xlu1 %3710, %v4062_v46   ;;  %720 = vperm.xlu0 %3709, %v4064_v26   ;;  %v334_v46 = vadd.f32 0.5, %v270_v57  ;;  %v207_v26 = vld [vmem:[%s3852_s25 + $0x1f0] sm:$0xff]  ;;  %v4092_v57 = vmin.f32 %v399_v7, 1.0  ;;  %v3778_v7 = vmov 1  }
  0x87   : > { %v274_v9 = vmul.f32 0.5, %v207_v26  ;;  %v400_v26 = vmax.f32 %v336_v43, 0.0 }
  0x88   : > { %v398_v10 = vmax.f32 %v334_v46, 0.0  ;;  %6130 = vst [vmem:[#allocation57_spill] sm:$0xff] %v4092_v57  ;;  %v403_v46 = vmax.f32 %v339_v58, 0.0 }
  0x89   : > { %v338_v59 = vadd.f32 0.5, %v274_v9  ;;  %v4100_v25 = vmin.f32 %v400_v26, 1.0 }
  0x8a   : > { %735 = vperm.xlu1 %3710, %v4068_v23   ;;  %730 = vperm.xlu0 %3709, %v4070_v32   ;;  %v4094_v24 = vmin.f32 %v398_v10, 1.0  ;;  %v4104_v0 = vmin.f32 %v403_v46, 1.0 }
  0x8b   : > { %6133 = vst [vmem:[#allocation60_spill] sm:$0xff] %v4100_v25  ;;  %v402_v53 = vmax.f32 %v338_v59, 0.0  ;;  %v788_v59 = vlaneseq }
  0x8c   : > { %6131 = vst [vmem:[#allocation58_spill] sm:$0xff] %v4094_v24  ;;  %6134 = vst [vmem:[#allocation61_spill] sm:$0xff] %v4104_v0 }
  0x8d   : > { %v4106_v27 = vmin.f32 %v402_v53, 1.0 }
  0x8e   : > { %745 = vperm.xlu1 %3710, %v4076_v15   ;;  %740 = vperm.xlu0 %3709, %v4078_v22  }
  0x8f   : > { %6135 = vst [vmem:[#allocation62_spill] sm:$0xff] %v4106_v27 }
  0x92   : > { %755 = vperm.xlu1 %3710, %v4086_v37   ;;  %750 = vperm.xlu0 %3709, %v4088_v8   ;;  %v6136_v37 = vmov 0  }
  0x96   : > { %765 = vperm.xlu1 %3710, %v4092_v57   ;;  %760 = vperm.xlu0 %3709, %v4094_v24  }
  0x9a   : > { %775 = vperm.xlu1 %3710, %v4098_v50   ;;  %770 = vperm.xlu0 %3709, %v4100_v25  }
  0x9d   : > { %v481_v47 = vpop.permute.xlu1 %480  ;;  %v471_v9 = vpop.permute.xlu0 %470 }
  0x9e   : > { %785 = vperm.xlu1 %3710, %v4104_v0   ;;  %780 = vperm.xlu0 %3709, %v4106_v27  }
  0xa1   : > { %v486_v38 = vpop.permute.xlu1 %485  ;;  %v476_v43 = vpop.permute.xlu0 %475 }
  0xa2   : > { %3712 = vset.pattern.permute.xlu1 %v3778_v7  ;;  %3711 = vset.pattern.permute.xlu0 %v3778_v7  ;;  %v4118_v7 = vshrl.u32 %v788_v59, 7 }
  0xa3   : > { %1121 = vperm.xlu1 %3712, %v3872_v36   ;;  %1117 = vperm.xlu0 %3711, %v3866_v30  }
  0xa5   : > { %v496_v10 = vpop.permute.xlu1 %495  ;;  %v491_v54 = vpop.permute.xlu0 %490 }
  0xa7   : > { %1125 = vperm.xlu1 %3712, %v3864_v29   ;;  %1129 = vperm.xlu0 %3711, %v3870_v35   ;;  %v790_v35 = vsub.s32 0, %v4118_v7 }
  0xa9   : > { %v506_v58 = vpop.permute.xlu1 %505  ;;  %v501_v26 = vpop.permute.xlu0 %500 }
  0xab   : > { %1133 = vperm.xlu1 %3712, %v3878_v42   ;;  %1137 = vperm.xlu0 %3711, %v3876_v41   ;;  %v209_v41 = vld [vmem:[%s5937_s1] sm:$0xff] }
  0xac   : > { %vm211_vm0 = vcmp.gt.f32.partialorder %v209_v41, 0.5 }
  0xad   : > { %v516_v46 = vpop.permute.xlu1 %515  ;;  %v4116_v53 = vpop.permute.xlu0 %510 }
  0xaf   : > { %1141 = vperm.xlu1 %3712, %v3886_v52   ;;  %1145 = vperm.xlu0 %3711, %v3884_v51   ;;  %v4136_v52 = vrot.slane %v209_v41, %v790_v35 }
  0xb1   : > { %v4122_v36 = vpop.permute.xlu1 %525  ;;  %v4124_v29 = vpop.permute.xlu0 %520  ;;  %v792_v27 = vmul.f32 %v4136_v52, %v471_v9  ;;  %v797_v50 = vmul.f32 %v4136_v52, %v496_v10  ;;  %v2988_v10 = vsel %vm211_vm0, 1, %v6136_v37  ;;  %v800_v22 = vmul.f32 %v4136_v52, %v4116_v53 }
  0xb3   : > { %1149 = vperm.xlu1 %3712, %v3896_v3   ;;  %1153 = vperm.xlu0 %3711, %v3894_v2   ;;  %v794_v2 = vmul.f32 %v4136_v52, %v481_v47 }
  0xb5   : > { %v4132_v59 = vpop.permute.xlu1 %535  ;;  %v4134_v42 = vpop.permute.xlu0 %530  ;;  %v858_v35 = vadd.f32 0.5, %v794_v2  ;;  %v856_v2 = vadd.f32 0.5, %v792_v27  ;;  %v1050_v27 = vsub.s32 1, %v4118_v7 }
  0xb7   : > { %1157 = vperm.xlu1 %3712, %v3904_v13   ;;  %1161 = vperm.xlu0 %3711, %v3902_v12   ;;  %v795_v12 = vmul.f32 %v4136_v52, %v486_v38  ;;  %v793_v13 = vmul.f32 %v4136_v52, %v476_v43  ;;  %v922_v25 = vfloor.f32 %v858_v35  ;;  %v796_v38 = vmul.f32 %v4136_v52, %v491_v54 }
  0xb8   : > { %v799_v43 = vmul.f32 %v4136_v52, %v506_v58  ;;  %v1630_v35 = vsub.s32 2, %v4118_v7  ;;  %v798_v54 = vmul.f32 %v4136_v52, %v501_v26  ;;  %v3060_v26 = vsub.s32 7, %v4118_v7 }
  0xb9   : > { %v4140_v51 = vpop.permute.xlu1 %545  ;;  %v4142_v30 = vpop.permute.xlu0 %540  ;;  %v859_v9 = vadd.f32 0.5, %v795_v12  ;;  %v2210_v12 = vsub.s32 3, %v4118_v7  ;;  %v860_v58 = vadd.f32 0.5, %v796_v38 }
  0xba   : > { %v863_v8 = vadd.f32 0.5, %v799_v43  ;;  %v862_v43 = vadd.f32 0.5, %v798_v54 }
  0xbb   : > { %1165 = vperm.xlu1 %3712, %v3910_v19   ;;  %1169 = vperm.xlu0 %3711, %v3908_v18   ;;  %v3279_v18 = vtrunc.f32 %v209_v41  ;;  %v861_v41 = vadd.f32 0.5, %v797_v50  ;;  %v923_v37 = vfloor.f32 %v859_v9  ;;  %v924_v34 = vfloor.f32 %v860_v58 }
  0xbc   : > { %v927_v53 = vfloor.f32 %v863_v8  ;;  %v926_v8 = vfloor.f32 %v862_v43 }
  0xbd   : > { %v4147_v3 = vpop.permute.xlu1 %555  ;;  %v4149_v0 = vpop.permute.xlu0 %550  ;;  %v3280_v24 = vcvt.f32.s32 %v3279_v18  ;;  %v801_v18 = vmul.f32 %v4136_v52, %v516_v46 }
  0xbf   : > { %1173 = vperm.xlu1 %3712, %v3918_v31   ;;  %1177 = vperm.xlu0 %3711, %v3916_v28   ;;  %v857_v28 = vadd.f32 0.5, %v793_v13  ;;  %v2278_v13 = vsub.s32 4, %v4118_v7  ;;  %v4187_v23 = vrot.slane %v3280_v24, %v1050_v27  ;;  %v4191_v9 = vrot.slane %v3280_v24, %v1630_v35 }
  0xc0   : > { %v4193_v38 = vrot.slane %v3280_v24, %v2210_v12  ;;  %v865_v32 = vadd.f32 0.5, %v801_v18  ;;  %v4205_v12 = vrot.slane %v3280_v24, %v3060_v26 }
  0xc1   : > { %v4156_v47 = vpop.permute.xlu1 %565  ;;  %v4158_v19 = vpop.permute.xlu0 %560  ;;  %v921_v50 = vfloor.f32 %v857_v28  ;;  %6137 = vst [vmem:[#allocation63_spill] sm:$0xff] %v4187_v23  ;;  %6138 = vst [vmem:[#allocation64_spill] sm:$0xff] %v4191_v9 }
  0xc2   : > { %6139 = vst [vmem:[#allocation65_spill] sm:$0xff] %v4193_v38  ;;  %6143 = vst [vmem:[#allocation69_spill] sm:$0xff] %v4205_v12 }
  0xc3   : > { %1181 = vperm.xlu1 %3712, %v3928_v49   ;;  %1185 = vperm.xlu0 %3711, %v3926_v48   ;;  %v3285_v49 = vtrunc.f32 %v922_v25  ;;  %v920_v48 = vfloor.f32 %v856_v2  ;;  %v2410_v2 = vsub.s32 5, %v4118_v7  ;;  %v3283_v33 = vtrunc.f32 %v921_v50 }
  0xc5   : > { %v4165_v31 = vpop.permute.xlu1 %575  ;;  %v4167_v57 = vpop.permute.xlu0 %570  ;;  %v3286_v46 = vcvt.f32.s32 %v3285_v49  ;;  %v3281_v28 = vtrunc.f32 %v920_v48  ;;  %v4199_v49 = vrot.slane %v3280_v24, %v2278_v13  ;;  %v4201_v48 = vrot.slane %v3280_v24, %v2410_v2 }
  0xc6   : > { %v803_v13 = vmul.f32 %v4136_v52, %v4122_v36  ;;  %v3289_v24 = vtrunc.f32 %v924_v34 }
  0xc7   : > { %1189 = vperm.xlu1 %3712, %v3936_v61   ;;  %1193 = vperm.xlu0 %3711, %v3934_v60   ;;  %v2991_v60 = vsub.s32 6, %v4118_v7  ;;  %v925_v61 = vfloor.f32 %v861_v41  ;;  %v3287_v41 = vtrunc.f32 %v923_v37  ;;  %6140 = vst [vmem:[#allocation66_spill] sm:$0xff] %v4199_v49  ;;  %6141 = vst [vmem:[#allocation67_spill] sm:$0xff] %v4201_v48  ;;  %v4208_v54 = vadd.s32 %v3286_v46, %v4187_v23 }
  0xc8   : > { %v3282_v18 = vcvt.f32.s32 %v3281_v28  ;;  %v929_v37 = vfloor.f32 %v865_v32  ;;  %v805_v46 = vmul.f32 %v4136_v52, %v4132_v59  ;;  %v804_v32 = vmul.f32 %v4136_v52, %v4134_v42 }
  0xc9   : > { %v4178_v15 = vpop.permute.xlu1 %585  ;;  %v4180_v25 = vpop.permute.xlu0 %580  ;;  %v3291_v27 = vtrunc.f32 %v925_v61  ;;  %v4203_v35 = vrot.slane %v2988_v10, %v2991_v60  ;;  %v802_v61 = vmul.f32 %v4136_v52, %v4124_v29  ;;  %v3288_v60 = vcvt.f32.s32 %v3287_v41 }
  0xca   : > { %v3295_v10 = vtrunc.f32 %v927_v53  ;;  %v4225_v36 = vadd.s32 %v3282_v18, %v4187_v23  ;;  %v807_v29 = vmul.f32 %v4136_v52, %v4140_v51  ;;  %v3299_v34 = vtrunc.f32 %v929_v37 }
  0xcb   : > { %1197 = vperm.xlu1 %3712, %v3942_v6   ;;  %1201 = vperm.xlu0 %3711, %v3940_v5   ;;  %v864_v5 = vadd.f32 0.5, %v800_v22  ;;  %6142 = vst [vmem:[#allocation68_spill] sm:$0xff] %v4203_v35  ;;  %v3284_v22 = vcvt.f32.s32 %v3283_v33  ;;  %v3292_v2 = vcvt.f32.s32 %v3291_v27  ;;  %v806_v33 = vmul.f32 %v4136_v52, %v4142_v30 }
  0xcc   : > { %v867_v28 = vadd.f32 0.5, %v803_v13  ;;  %v866_v59 = vadd.f32 0.5, %v802_v61  ;;  %v4234_v43 = vadd.s32 %v3288_v60, %v4187_v23  ;;  %v3290_v41 = vcvt.f32.s32 %v3289_v24 }
  0xcd   : > { %v4195_v11 = vpop.permute.xlu1 %595  ;;  %v4197_v7 = vpop.permute.xlu0 %590  ;;  %v928_v26 = vfloor.f32 %v864_v5  ;;  %v3293_v5 = vtrunc.f32 %v926_v8  ;;  %v4237_v42 = vadd.s32 %v3284_v22, %v4187_v23  ;;  %v3296_v53 = vcvt.f32.s32 %v3295_v10 }
  0xce   : > { %v4244_v30 = vadd.s32 %v3292_v2, %v4187_v23  ;;  %v869_v8 = vadd.f32 0.5, %v805_v46  ;;  %v868_v37 = vadd.f32 0.5, %v804_v32  ;;  %v871_v13 = vadd.f32 0.5, %v807_v29 }
  0xcf   : > { %1205 = vperm.xlu1 %3712, %v3950_v20   ;;  %1209 = vperm.xlu0 %3711, %v3948_v17   ;;  %v3297_v18 = vtrunc.f32 %v928_v26  ;;  %v870_v61 = vadd.f32 0.5, %v806_v33  ;;  %v809_v60 = vmul.f32 %v4136_v52, %v4147_v3  ;;  %v808_v22 = vmul.f32 %v4136_v52, %v4149_v0 }
  0xd0   : > { %v3294_v24 = vcvt.f32.s32 %v3293_v5  ;;  %v3300_v10 = vcvt.f32.s32 %v3299_v34  ;;  %v931_v12 = vfloor.f32 %v867_v28  ;;  %v930_v2 = vfloor.f32 %v866_v59 }
  0xd1   : > { %v4216_v50 = vpop.permute.xlu1 %605  ;;  %v4218_v58 = vpop.permute.xlu0 %600  ;;  %v4253_v26 = vadd.s32 %v3290_v41, %v4187_v23  ;;  %v4256_v46 = vadd.s32 %v3296_v53, %v4187_v23  ;;  %v811_v3 = vmul.f32 %v4136_v52, %v4156_v47  ;;  %v810_v0 = vmul.f32 %v4136_v52, %v4158_v19 }
  0xd2   : > { %v3298_v33 = vcvt.f32.s32 %v3297_v18  ;;  %v933_v5 = vfloor.f32 %v869_v8  ;;  %v932_v34 = vfloor.f32 %v868_v37  ;;  %v813_v28 = vmul.f32 %v4136_v52, %v4165_v31 }
  0xd3   : > { %1213 = vperm.xlu1 %3712, %v3960_v40   ;;  %1217 = vperm.xlu0 %3711, %v3958_v39   ;;  %v935_v59 = vfloor.f32 %v871_v13  ;;  %v934_v41 = vfloor.f32 %v870_v61  ;;  %v873_v53 = vadd.f32 0.5, %v809_v60  ;;  %v872_v48 = vadd.f32 0.5, %v808_v22 }
  0xd4   : > { %v4271_v19 = vadd.s32 %v3294_v24, %v4187_v23  ;;  %v4274_v47 = vadd.s32 %v3300_v10, %v4187_v23  ;;  %v3303_v18 = vtrunc.f32 %v931_v12  ;;  %v3301_v8 = vtrunc.f32 %v930_v2 }
  0xd5   : > { %v4239_v51 = vpop.permute.xlu1 %615  ;;  %v4241_v27 = vpop.permute.xlu0 %610  ;;  %v875_v37 = vadd.f32 0.5, %v811_v3  ;;  %v874_v38 = vadd.f32 0.5, %v810_v0  ;;  %v812_v31 = vmul.f32 %v4136_v52, %v4167_v57  ;;  %v815_v13 = vmul.f32 %v4136_v52, %v4178_v15 }
  0xd6   : > { %v4285_v22 = vadd.s32 %v3298_v33, %v4187_v23  ;;  %v3307_v24 = vtrunc.f32 %v933_v5  ;;  %v3305_v10 = vtrunc.f32 %v932_v34  ;;  %v877_v35 = vadd.f32 0.5, %v813_v28 }
  0xd7   : > { %1221 = vperm.xlu1 %3712, %v3968_v56   ;;  %1225 = vperm.xlu0 %3711, %v3966_v55   ;;  %v3311_v12 = vtrunc.f32 %v935_v59  ;;  %v3309_v2 = vtrunc.f32 %v934_v41  ;;  %v937_v3 = vfloor.f32 %v873_v53  ;;  %v936_v0 = vfloor.f32 %v872_v48 }
  0xd8   : > { %v3304_v57 = vcvt.f32.s32 %v3303_v18  ;;  %v3302_v15 = vcvt.f32.s32 %v3301_v8  ;;  %v817_v33 = vmul.f32 %v4136_v52, %v4195_v11  ;;  %v939_v55 = vfloor.f32 %v875_v37 }
  0xd9   : > { %v4262_v32 = vpop.permute.xlu1 %625  ;;  %v4264_v29 = vpop.permute.xlu0 %620  ;;  %v938_v5 = vfloor.f32 %v874_v38  ;;  %v876_v34 = vadd.f32 0.5, %v812_v31  ;;  %v879_v28 = vadd.f32 0.5, %v815_v13  ;;  %v3308_v48 = vcvt.f32.s32 %v3307_v24 }
  0xda   : > { %v3306_v53 = vcvt.f32.s32 %v3305_v10  ;;  %v816_v18 = vmul.f32 %v4136_v52, %v4197_v7  ;;  %v3312_v8 = vcvt.f32.s32 %v3311_v12  ;;  %v4302_v11 = vadd.s32 %v3304_v57, %v4187_v23 }
  0xdb   : > { %1229 = vperm.xlu1 %3712, %v3974_v1   ;;  %1233 = vperm.xlu0 %3711, %v3972_v63   ;;  %v814_v63 = vmul.f32 %v4136_v52, %v4180_v25  ;;  %v3315_v25 = vtrunc.f32 %v937_v3  ;;  %v3313_v1 = vtrunc.f32 %v936_v0  ;;  %v4305_v38 = vadd.s32 %v3302_v15, %v4187_v23 }
  0xdc   : > { %v881_v31 = vadd.f32 0.5, %v817_v33  ;;  %v3317_v13 = vtrunc.f32 %v938_v5  ;;  %v940_v24 = vfloor.f32 %v876_v34  ;;  %v943_v7 = vfloor.f32 %v879_v28 }
  0xdd   : > { %v4280_v61 = vpop.permute.xlu1 %635  ;;  %v4282_v60 = vpop.permute.xlu0 %630  ;;  %v878_v37 = vadd.f32 0.5, %v814_v63  ;;  %v4315_v3 = vadd.s32 %v3306_v53, %v4187_v23  ;;  %v880_v57 = vadd.f32 0.5, %v816_v18  ;;  %v4318_v15 = vadd.s32 %v3312_v8, %v4187_v23 }
  0xde   : > { %v3316_v63 = vcvt.f32.s32 %v3315_v25  ;;  %v3314_v33 = vcvt.f32.s32 %v3313_v1  ;;  %v945_v34 = vfloor.f32 %v881_v31  ;;  %v819_v28 = vmul.f32 %v4136_v52, %v4216_v50 }
  0xdf   : > { %1237 = vperm.xlu1 %3712, %v3982_v21   ;;  %1241 = vperm.xlu0 %3711, %v3980_v16   ;;  %v941_v21 = vfloor.f32 %v877_v35  ;;  %v3310_v16 = vcvt.f32.s32 %v3309_v2  ;;  %v3319_v35 = vtrunc.f32 %v939_v55  ;;  %v4312_v2 = vadd.s32 %v3308_v48, %v4187_v23 }
  0xe0   : > { %v942_v5 = vfloor.f32 %v878_v37  ;;  %v3318_v53 = vcvt.f32.s32 %v3317_v13  ;;  %v3321_v18 = vtrunc.f32 %v940_v24  ;;  %v3327_v8 = vtrunc.f32 %v943_v7 }
  0xe1   : > { %v4293_v59 = vpop.permute.xlu1 %645  ;;  %v4295_v41 = vpop.permute.xlu0 %640  ;;  %v3323_v0 = vtrunc.f32 %v941_v21  ;;  %v4321_v55 = vadd.s32 %v3310_v16, %v4187_v23  ;;  %v818_v21 = vmul.f32 %v4136_v52, %v4218_v58  ;;  %v3320_v48 = vcvt.f32.s32 %v3319_v35  ;;  %v6144_v35 = vld [vmem:[#allocation35_spill] sm:$0xff] }
  0xe2   : > { %v944_v25 = vfloor.f32 %v880_v57  ;;  %v820_v37 = vmul.f32 %v4136_v52, %v4241_v27  ;;  %v4336_v50 = vadd.s32 %v3316_v63, %v4187_v23  ;;  %v4339_v58 = vadd.s32 %v3314_v33, %v4187_v23 }
  0xe3   : > { %1245 = vperm.xlu1 %3712, %v3992_v45   ;;  %1249 = vperm.xlu0 %3711, %v3990_v44   ;;  %v3324_v1 = vcvt.f32.s32 %v3323_v0  ;;  %v823_v31 = vmul.f32 %v4136_v52, %v4262_v32  ;;  %v3325_v13 = vtrunc.f32 %v942_v5  ;;  %v3331_v24 = vtrunc.f32 %v945_v34 }
  0xe4   : > { %v883_v7 = vadd.f32 0.5, %v819_v28  ;;  %v4346_v0 = vadd.s32 %v3320_v48, %v4187_v23  ;;  %v4349_v27 = vadd.s32 %v3318_v53, %v4187_v23  ;;  %v3322_v57 = vcvt.f32.s32 %v3321_v18  ;;  %v6148_v53 = vld [vmem:[#allocation38_spill] sm:$0xff]  ;;  %v6149_v18 = vld [vmem:[#allocation37_spill] sm:$0xff] }
  0xe5   : > { %v4307_v10 = vpop.permute.xlu1 %655  ;;  %v4309_v12 = vpop.permute.xlu0 %650  ;;  %v3328_v63 = vcvt.f32.s32 %v3327_v8  ;;  %v4354_v32 = vadd.s32 %v3324_v1, %v4187_v23  ;;  %v884_v5 = vadd.f32 0.5, %v820_v37  ;;  %v887_v34 = vadd.f32 0.5, %v823_v31 }
  0xe6   : > { %6145 = vst [vmem:[#allocation70_spill] sm:$0xff] %v4346_v0  ;;  %6146 = vst [vmem:[#allocation71_spill] sm:$0xff] %v4349_v27  ;;  %v822_v28 = vmul.f32 %v4136_v52, %v4264_v29  ;;  %v824_v48 = vmul.f32 %v4136_v52, %v4282_v60  ;;  %v3326_v8 = vcvt.f32.s32 %v3325_v13  ;;  %v3332_v1 = vcvt.f32.s32 %v3331_v24  ;;  %v6159_v27 = vld [vmem:[#allocation44_spill] sm:$0xff] }
  0xe7   : > { %1253 = vperm.xlu1 %3712, %v4000_v4   ;;  %1257 = vperm.xlu0 %3711, %v3998_v62   ;;  %v821_v62 = vmul.f32 %v4136_v52, %v4239_v51  ;;  %v882_v51 = vadd.f32 0.5, %v818_v21  ;;  %6147 = vst [vmem:[#allocation72_spill] sm:$0xff] %v4354_v32  ;;  %v825_v21 = vmul.f32 %v4136_v52, %v4280_v61  ;;  %v947_v32 = vfloor.f32 %v883_v7 }
  0xe8   : > { %v4368_v37 = vadd.s32 %v3328_v63, %v4187_v23  ;;  %v827_v29 = vmul.f32 %v4136_v52, %v4293_v59  ;;  %v826_v61 = vmul.f32 %v4136_v52, %v4295_v41  ;;  %v948_v7 = vfloor.f32 %v884_v5  ;;  %v6153_v59 = vld [vmem:[#allocation39_spill] sm:$0xff] }
  0xe9   : > { %v666_v16 = vpop.permute.xlu1 %665  ;;  %v4329_v44 = vpop.permute.xlu0 %660  ;;  %v889_v63 = vadd.f32 0.5, %v825_v21  ;;  %v4383_v41 = vadd.s32 %v3326_v8, %v4187_v23 }
  0xea   : > { %6151 = vst [vmem:[#allocation74_spill] sm:$0xff] %v4368_v37  ;;  %v6152_v37 = vld [vmem:[#allocation40_spill] sm:$0xff]  ;;  %v891_v5 = vadd.f32 0.5, %v827_v29  ;;  %v890_v45 = vadd.f32 0.5, %v826_v61  ;;  %v6157_v61 = vld [vmem:[#allocation42_spill] sm:$0xff] }
  0xeb   : > { %1261 = vperm.xlu1 %3712, %v4006_v14   ;;  %1265 = vperm.xlu0 %3711, %v6144_v35   ;;  %v3329_v14 = vtrunc.f32 %v944_v25  ;;  %v885_v35 = vadd.f32 0.5, %v821_v62  ;;  %v946_v25 = vfloor.f32 %v882_v51  ;;  %v4365_v62 = vadd.s32 %v3322_v57, %v4187_v23  ;;  %6154 = vst [vmem:[#allocation75_spill] sm:$0xff] %v4383_v41 }
  0xec   : > { %v829_v51 = vmul.f32 %v4136_v52, %v4307_v10  ;;  %v951_v57 = vfloor.f32 %v887_v34  ;;  %v828_v10 = vmul.f32 %v4136_v52, %v4309_v12  ;;  %v831_v34 = vmul.f32 %v4136_v52, %v666_v16 }
  0xed   : > { %v676_v33 = vpop.permute.xlu1 %675  ;;  %v4351_v4 = vpop.permute.xlu0 %670  ;;  %6150 = vst [vmem:[#allocation73_spill] sm:$0xff] %v4365_v62  ;;  %v3330_v13 = vcvt.f32.s32 %v3329_v14  ;;  %v949_v24 = vfloor.f32 %v885_v35  ;;  %v4386_v62 = vadd.s32 %v3332_v1, %v4187_v23  ;;  %v3335_v14 = vtrunc.f32 %v947_v32 }
  0xee   : > { %v3333_v35 = vtrunc.f32 %v946_v25  ;;  %v893_v1 = vadd.f32 0.5, %v829_v51  ;;  %v953_v25 = vfloor.f32 %v889_v63  ;;  %v830_v41 = vmul.f32 %v4136_v52, %v4329_v44 }
  0xef   : > { %1269 = vperm.xlu1 %3712, %v6148_v53   ;;  %1273 = vperm.xlu0 %3711, %v6149_v18   ;;  %v886_v18 = vadd.f32 0.5, %v822_v28  ;;  %v888_v53 = vadd.f32 0.5, %v824_v48  ;;  %6155 = vst [vmem:[#allocation76_spill] sm:$0xff] %v4386_v62  ;;  %v4396_v48 = vadd.s32 %v3330_v13, %v4187_v23  ;;  %v3339_v8 = vtrunc.f32 %v949_v24  ;;  %v6158_v62 = vld [vmem:[#allocation41_spill] sm:$0xff] }
  0xf0   : > { %v3336_v12 = vcvt.f32.s32 %v3335_v14  ;;  %v3334_v16 = vcvt.f32.s32 %v3333_v35  ;;  %v833_v0 = vmul.f32 %v4136_v52, %v676_v33  ;;  %v955_v13 = vfloor.f32 %v891_v5  ;;  %v6160_v33 = vld [vmem:[#allocation43_spill] sm:$0xff] }
  0xf1   : > { %v4374_v60 = vpop.permute.xlu1 %685  ;;  %v4376_v31 = vpop.permute.xlu0 %680  ;;  %6156 = vst [vmem:[#allocation77_spill] sm:$0xff] %v4396_v48  ;;  %v950_v32 = vfloor.f32 %v886_v18  ;;  %v952_v29 = vfloor.f32 %v888_v53  ;;  %v954_v48 = vfloor.f32 %v890_v45  ;;  %v892_v24 = vadd.f32 0.5, %v828_v10 }
  0xf2   : > { %v3340_v53 = vcvt.f32.s32 %v3339_v8  ;;  %v957_v63 = vfloor.f32 %v893_v1  ;;  %v832_v14 = vmul.f32 %v4136_v52, %v4351_v4  ;;  %v4412_v45 = vadd.s32 %v3336_v12, %v4187_v23 }
  0xf3   : > { %1277 = vperm.xlu1 %3712, %v6152_v37   ;;  %1281 = vperm.xlu0 %3711, %v6153_v59   ;;  %v3337_v59 = vtrunc.f32 %v948_v7  ;;  %v3343_v37 = vtrunc.f32 %v951_v57  ;;  %v895_v7 = vadd.f32 0.5, %v831_v34  ;;  %v3345_v44 = vtrunc.f32 %v952_v29 }
  0xf4   : > { %v4415_v5 = vadd.s32 %v3334_v16, %v4187_v23  ;;  %v894_v10 = vadd.f32 0.5, %v830_v41  ;;  %v3351_v34 = vtrunc.f32 %v955_v13  ;;  %v3349_v8 = vtrunc.f32 %v954_v48  ;;  %v6163_v13 = vld [vmem:[#allocation46_spill] sm:$0xff]  ;;  %v6164_v48 = vld [vmem:[#allocation45_spill] sm:$0xff] }
  0xf5   : > { %v4391_v28 = vpop.permute.xlu1 %695  ;;  %v4393_v21 = vpop.permute.xlu0 %690  ;;  %v3338_v57 = vcvt.f32.s32 %v3337_v59  ;;  %v3344_v35 = vcvt.f32.s32 %v3343_v37  ;;  %v897_v59 = vadd.f32 0.5, %v833_v0  ;;  %v956_v1 = vfloor.f32 %v892_v24 }
  0xf6   : > { %v959_v4 = vfloor.f32 %v895_v7  ;;  %v896_v12 = vadd.f32 0.5, %v832_v14  ;;  %v3346_v0 = vcvt.f32.s32 %v3345_v44  ;;  %v958_v24 = vfloor.f32 %v894_v10 }
  0xf7   : > { %1285 = vperm.xlu1 %3712, %v6157_v61   ;;  %1289 = vperm.xlu0 %3711, %v6158_v62   ;;  %v3341_v62 = vtrunc.f32 %v950_v32  ;;  %v3347_v61 = vtrunc.f32 %v953_v25  ;;  %v4418_v25 = vadd.s32 %v3340_v53, %v4187_v23  ;;  %v4421_v29 = vadd.s32 %v3338_v57, %v4187_v23 }
  0xf8   : > { %v961_v7 = vfloor.f32 %v897_v59  ;;  %v835_v53 = vmul.f32 %v4136_v52, %v4374_v60  ;;  %v834_v57 = vmul.f32 %v4136_v52, %v4376_v31  ;;  %v3350_v14 = vcvt.f32.s32 %v3349_v8  ;;  %v6169_v8 = vld [vmem:[#allocation47_spill] sm:$0xff] }
  0xf9   : > { %v4403_v51 = vpop.permute.xlu1 %705  ;;  %v4405_v18 = vpop.permute.xlu0 %700  ;;  %6161 = vst [vmem:[#allocation78_spill] sm:$0xff] %v4418_v25  ;;  %v3342_v16 = vcvt.f32.s32 %v3341_v62  ;;  %v3348_v41 = vcvt.f32.s32 %v3347_v61  ;;  %v3353_v25 = vtrunc.f32 %v956_v1  ;;  %v960_v44 = vfloor.f32 %v896_v12 }
  0xfa   : > { %v836_v10 = vmul.f32 %v4136_v52, %v4393_v21  ;;  %v4443_v31 = vadd.s32 %v3346_v0, %v4187_v23  ;;  %v3363_v1 = vtrunc.f32 %v961_v7  ;;  %v4451_v21 = vadd.s32 %v3350_v14, %v4187_v23 }
  0xfb   : > { %1293 = vperm.xlu1 %3712, %v6159_v27   ;;  %1297 = vperm.xlu0 %3711, %v6160_v33   ;;  %v3355_v33 = vtrunc.f32 %v957_v63  ;;  %v4424_v27 = vadd.s32 %v3344_v35, %v4187_v23  ;;  %v3352_v63 = vcvt.f32.s32 %v3351_v34  ;;  %v3359_v35 = vtrunc.f32 %v959_v4  ;;  %v6168_v34 = vld [vmem:[#allocation48_spill] sm:$0xff] }
  0xfc   : > { %v4437_v59 = vadd.s32 %v3342_v16, %v4187_v23  ;;  %v4440_v60 = vadd.s32 %v3348_v41, %v4187_v23  ;;  %6167 = vst [vmem:[#allocation82_spill] sm:$0xff] %v4443_v31  ;;  %v899_v4 = vadd.f32 0.5, %v835_v53  ;;  %6171 = vst [vmem:[#allocation84_spill] sm:$0xff] %v4451_v21  ;;  %v3354_v16 = vcvt.f32.s32 %v3353_v25  ;;  %v6174_v25 = vld [vmem:[#allocation49_spill] sm:$0xff] }
  0xfd   : > { %v716_v37 = vpop.permute.xlu1 %715  ;;  %v711_v32 = vpop.permute.xlu0 %710  ;;  %6162 = vst [vmem:[#allocation79_spill] sm:$0xff] %v4424_v27  ;;  %v3356_v61 = vcvt.f32.s32 %v3355_v33  ;;  %v3357_v33 = vtrunc.f32 %v958_v24  ;;  %v4448_v12 = vadd.s32 %v3352_v63, %v4187_v23  ;;  %v3360_v41 = vcvt.f32.s32 %v3359_v35 }
  0xfe   : > { %6165 = vst [vmem:[#allocation80_spill] sm:$0xff] %v4437_v59  ;;  %6166 = vst [vmem:[#allocation81_spill] sm:$0xff] %v4440_v60  ;;  %v839_v24 = vmul.f32 %v4136_v52, %v4403_v51  ;;  %v838_v7 = vmul.f32 %v4136_v52, %v4405_v18  ;;  %v841_v53 = vmul.f32 %v4136_v52, %v716_v37  ;;  %v3364_v14 = vcvt.f32.s32 %v3363_v1 }
  0xff   : > { %1301 = vperm.xlu1 %3712, %v6163_v13   ;;  %1305 = vperm.xlu0 %3711, %v6164_v48   ;;  %v837_v13 = vmul.f32 %v4136_v52, %v4391_v28  ;;  %v898_v28 = vadd.f32 0.5, %v834_v57  ;;  %6170 = vst [vmem:[#allocation83_spill] sm:$0xff] %v4448_v12  ;;  %v4454_v0 = vadd.s32 %v3356_v61, %v4187_v23  ;;  %v6173_v57 = vld [vmem:[#allocation50_spill] sm:$0xff]  ;;  %v3358_v63 = vcvt.f32.s32 %v3357_v33 }
 0x100   : > { %v963_v35 = vfloor.f32 %v899_v4  ;;  %v840_v51 = vmul.f32 %v4136_v52, %v711_v32  ;;  %v903_v1 = vadd.f32 0.5, %v839_v24  ;;  %v902_v4 = vadd.f32 0.5, %v838_v7 }
 0x101   : > { %v726_v27 = vpop.permute.xlu1 %725  ;;  %v721_v62 = vpop.permute.xlu0 %720  ;;  %6172 = vst [vmem:[#allocation85_spill] sm:$0xff] %v4454_v0  ;;  %v901_v31 = vadd.f32 0.5, %v837_v13  ;;  %v962_v61 = vfloor.f32 %v898_v28  ;;  %v4467_v13 = vadd.s32 %v3360_v41, %v4187_v23  ;;  %v905_v28 = vadd.f32 0.5, %v841_v53  ;;  %v6178_v41 = vld [vmem:[#allocation51_spill] sm:$0xff] }
 0x102   : > { %v843_v18 = vmul.f32 %v4136_v52, %v726_v27  ;;  %v842_v33 = vmul.f32 %v4136_v52, %v721_v62  ;;  %v4476_v32 = vadd.s32 %v3358_v63, %v4187_v23  ;;  %v4479_v27 = vadd.s32 %v3364_v14, %v4187_v23 }
 0x103   : > { %1309 = vperm.xlu1 %3712, %v6168_v34   ;;  %1313 = vperm.xlu0 %3711, %v6169_v8   ;;  %v3361_v34 = vtrunc.f32 %v960_v44  ;;  %v900_v8 = vadd.f32 0.5, %v836_v10  ;;  %v4464_v44 = vadd.s32 %v3354_v16, %v4187_v23  ;;  %6176 = vst [vmem:[#allocation87_spill] sm:$0xff] %v4467_v13  ;;  %v965_v12 = vfloor.f32 %v901_v31 }
 0x104   : > { %6179 = vst [vmem:[#allocation88_spill] sm:$0xff] %v4476_v32  ;;  %6180 = vst [vmem:[#allocation89_spill] sm:$0xff] %v4479_v27  ;;  %v3365_v31 = vtrunc.f32 %v962_v61  ;;  %v907_v13 = vadd.f32 0.5, %v843_v18  ;;  %v906_v63 = vadd.f32 0.5, %v842_v33  ;;  %v967_v32 = vfloor.f32 %v903_v1  ;;  %v6183_v61 = vld [vmem:[#allocation53_spill] sm:$0xff] }
 0x105   : > { %v736_v48 = vpop.permute.xlu1 %735  ;;  %v731_v60 = vpop.permute.xlu0 %730  ;;  %6175 = vst [vmem:[#allocation86_spill] sm:$0xff] %v4464_v44  ;;  %v3362_v0 = vcvt.f32.s32 %v3361_v34  ;;  %v964_v21 = vfloor.f32 %v900_v8  ;;  %v6177_v44 = vld [vmem:[#allocation52_spill] sm:$0xff]  ;;  %v3367_v34 = vtrunc.f32 %v963_v35  ;;  %v904_v8 = vadd.f32 0.5, %v840_v51  ;;  %v6182_v35 = vld [vmem:[#allocation54_spill] sm:$0xff] }
 0x106   : > { %v845_v16 = vmul.f32 %v4136_v52, %v736_v48  ;;  %v844_v62 = vmul.f32 %v4136_v52, %v731_v60  ;;  %v969_v14 = vfloor.f32 %v905_v28  ;;  %v3366_v60 = vcvt.f32.s32 %v3365_v31  ;;  %v6184_v31 = vld [vmem:[#allocation56_spill] sm:$0xff] }
 0x107   : > { %1317 = vperm.xlu1 %3712, %v6173_v57   ;;  %1321 = vperm.xlu0 %3711, %v6174_v25   ;;  %v4484_v53 = vadd.s32 %v3362_v0, %v4187_v23  ;;  %v3369_v25 = vtrunc.f32 %v964_v21  ;;  %v3368_v51 = vcvt.f32.s32 %v3367_v34  ;;  %v968_v57 = vfloor.f32 %v904_v8 }
 0x108   : > { %v909_v27 = vadd.f32 0.5, %v845_v16  ;;  %v971_v0 = vfloor.f32 %v907_v13  ;;  %v970_v28 = vfloor.f32 %v906_v63  ;;  %v4497_v13 = vadd.s32 %v3366_v60, %v4187_v23 }
 0x109   : > { %v746_v10 = vpop.permute.xlu1 %745  ;;  %v741_v37 = vpop.permute.xlu0 %740  ;;  %6181 = vst [vmem:[#allocation90_spill] sm:$0xff] %v4484_v53  ;;  %v908_v53 = vadd.f32 0.5, %v844_v62  ;;  %v4494_v8 = vadd.s32 %v3368_v51, %v4187_v23 }
 0x10a   : > { %v847_v24 = vmul.f32 %v4136_v52, %v746_v10  ;;  %v846_v18 = vmul.f32 %v4136_v52, %v741_v37  ;;  %v973_v34 = vfloor.f32 %v909_v27  ;;  %v6185_v37 = vld [vmem:[#allocation55_spill] sm:$0xff]  ;;  %6187 = vst [vmem:[#allocation91_spill] sm:$0xff] %v4497_v13 }
 0x10b   : > { %1325 = vperm.xlu1 %3712, %v6177_v44   ;;  %1329 = vperm.xlu0 %3711, %v6178_v41   ;;  %v3371_v41 = vtrunc.f32 %v965_v12  ;;  %v966_v44 = vfloor.f32 %v902_v4  ;;  %v3370_v4 = vcvt.f32.s32 %v3369_v25  ;;  %6186 = vst [vmem:[#allocation56_spill] sm:$0xff] %v4494_v8  ;;  %v3377_v25 = vtrunc.f32 %v968_v57  ;;  %v6191_v57 = vld [vmem:[#allocation57_spill] sm:$0xff] }
 0x10c   : > { %v911_v12 = vadd.f32 0.5, %v847_v24  ;;  %v910_v62 = vadd.f32 0.5, %v846_v18  ;;  %v3383_v24 = vtrunc.f32 %v971_v0  ;;  %v3387_v13 = vtrunc.f32 %v973_v34  ;;  %v6190_v18 = vld [vmem:[#allocation58_spill] sm:$0xff] }
 0x10d   : > { %v756_v7 = vpop.permute.xlu1 %755  ;;  %v751_v48 = vpop.permute.xlu0 %750  ;;  %v3372_v1 = vcvt.f32.s32 %v3371_v41  ;;  %v3373_v59 = vtrunc.f32 %v966_v44  ;;  %v4503_v63 = vadd.s32 %v3370_v4, %v4187_v23 }
 0x10e   : > { %v849_v10 = vmul.f32 %v4136_v52, %v756_v7  ;;  %v848_v16 = vmul.f32 %v4136_v52, %v751_v48  ;;  %v972_v7 = vfloor.f32 %v908_v53  ;;  %v975_v48 = vfloor.f32 %v911_v12 }
 0x10f   : > { %1333 = vperm.xlu1 %3712, %v6182_v35   ;;  %1337 = vperm.xlu0 %3711, %v6183_v61   ;;  %v3375_v35 = vtrunc.f32 %v967_v32  ;;  %v3379_v61 = vtrunc.f32 %v969_v14  ;;  %v4500_v27 = vadd.s32 %v3372_v1, %v4187_v23  ;;  %6189 = vst [vmem:[#allocation93_spill] sm:$0xff] %v4503_v63  ;;  %v3381_v14 = vtrunc.f32 %v970_v28 }
 0x110   : > { %v913_v41 = vadd.f32 0.5, %v849_v10  ;;  %v912_v51 = vadd.f32 0.5, %v848_v16  ;;  %v974_v53 = vfloor.f32 %v910_v62  ;;  %v3378_v1 = vcvt.f32.s32 %v3377_v25  ;;  %v6195_v25 = vld [vmem:[#allocation60_spill] sm:$0xff] }
 0x111   : > { %v766_v21 = vpop.permute.xlu1 %765  ;;  %v761_v33 = vpop.permute.xlu0 %760  ;;  %6188 = vst [vmem:[#allocation92_spill] sm:$0xff] %v4500_v27  ;;  %v3376_v8 = vcvt.f32.s32 %v3375_v35  ;;  %v3380_v60 = vcvt.f32.s32 %v3379_v61  ;;  %v3384_v27 = vcvt.f32.s32 %v3383_v24  ;;  %v3385_v4 = vtrunc.f32 %v972_v7  ;;  %v6196_v24 = vld [vmem:[#allocation59_spill] sm:$0xff] }
 0x112   : > { %v977_v10 = vfloor.f32 %v913_v41  ;;  %v851_v0 = vmul.f32 %v4136_v52, %v766_v21  ;;  %v850_v12 = vmul.f32 %v4136_v52, %v761_v33  ;;  %v3391_v63 = vtrunc.f32 %v975_v48 }
 0x113   : > { %1341 = vperm.xlu1 %3712, %v6184_v31   ;;  %1345 = vperm.xlu0 %3711, %v6185_v37   ;;  %v3374_v37 = vcvt.f32.s32 %v3373_v59  ;;  %v3382_v59 = vcvt.f32.s32 %v3381_v14  ;;  %v976_v61 = vfloor.f32 %v912_v51  ;;  %v4514_v62 = vadd.s32 %v3376_v8, %v4187_v23 }
 0x114   : > { %v4520_v33 = vadd.s32 %v3380_v60, %v4187_v23  ;;  %v3388_v41 = vcvt.f32.s32 %v3387_v13  ;;  %v3389_v7 = vtrunc.f32 %v974_v53  ;;  %v3395_v48 = vtrunc.f32 %v977_v10 }
 0x115   : > { %v776_v32 = vpop.permute.xlu1 %775  ;;  %v771_v44 = vpop.permute.xlu0 %770  ;;  %6192 = vst [vmem:[#allocation58_spill] sm:$0xff] %v4514_v62  ;;  %v4517_v21 = vadd.s32 %v3374_v37, %v4187_v23  ;;  %v915_v14 = vadd.f32 0.5, %v851_v0  ;;  %v4525_v51 = vadd.s32 %v3378_v1, %v4187_v23  ;;  %v4528_v8 = vadd.s32 %v3384_v27, %v4187_v23  ;;  %v6202_v27 = vld [vmem:[#allocation61_spill] sm:$0xff] }
 0x116   : > { %v852_v16 = vmul.f32 %v4136_v52, %v771_v44  ;;  %6194 = vst [vmem:[#allocation94_spill] sm:$0xff] %v4520_v33  ;;  %v914_v44 = vadd.f32 0.5, %v850_v12  ;;  %v3386_v37 = vcvt.f32.s32 %v3385_v4  ;;  %v4531_v60 = vadd.s32 %v3382_v59, %v4187_v23  ;;  %v6201_v12 = vld [vmem:[#allocation62_spill] sm:$0xff] }
 0x117   : > { %1349 = vperm.xlu1 %3712, %v6190_v18   ;;  %1353 = vperm.xlu0 %3711, %v6191_v57   ;;  %6193 = vst [vmem:[#allocation57_spill] sm:$0xff] %v4517_v21  ;;  %6197 = vst [vmem:[#allocation60_spill] sm:$0xff] %v4525_v51  ;;  %v3393_v13 = vtrunc.f32 %v976_v61  ;;  %v4534_v53 = vadd.s32 %v3388_v41, %v4187_v23  ;;  %v3396_v1 = vcvt.f32.s32 %v3395_v48  ;;  %v979_v4 = vfloor.f32 %v915_v14 }
 0x118   : > { %6198 = vst [vmem:[#allocation95_spill] sm:$0xff] %v4528_v8  ;;  %6199 = vst [vmem:[#allocation96_spill] sm:$0xff] %v4531_v60  ;;  %v916_v33 = vadd.f32 0.5, %v852_v16  ;;  %v978_v59 = vfloor.f32 %v914_v44  ;;  %v4541_v61 = vadd.s32 %v3386_v37, %v4187_v23  ;;  %v3779_v44 = vmov 2  }
 0x119   : > { %v4509_v28 = vpop.permute.xlu1 %785  ;;  %v781_v35 = vpop.permute.xlu0 %780  ;;  %6200 = vst [vmem:[#allocation97_spill] sm:$0xff] %v4534_v53  ;;  %v3394_v53 = vcvt.f32.s32 %v3393_v13  ;;  %v6208_v13 = vld [vmem:[#allocation8_spill] sm:$0xff] }
 0x11a   : > { %v854_v34 = vmul.f32 %v4136_v52, %v781_v35  ;;  %v3392_v35 = vcvt.f32.s32 %v3391_v63  ;;  %v3390_v63 = vcvt.f32.s32 %v3389_v7  ;;  %6203 = vst [vmem:[#allocation98_spill] sm:$0xff] %v4541_v61 }
 0x11b   : > { %1357 = vperm.xlu1 %3712, %v6195_v25   ;;  %1361 = vperm.xlu0 %3711, %v6196_v24  }
 0x11c   : > { %v918_v62 = vadd.f32 0.5, %v854_v34  ;;  %v4544_v16 = vadd.s32 %v3392_v35, %v4187_v23  ;;  %v4550_v37 = vadd.s32 %v3390_v63, %v4187_v23  ;;  %v4553_v35 = vadd.s32 %v3396_v1, %v4187_v23 }
 0x11e   : > { %v1122_v21 = vpop.permute.xlu1 %1121  ;;  %v1118_v24 = vpop.permute.xlu0 %1117  ;;  %6204 = vst [vmem:[#allocation99_spill] sm:$0xff] %v4544_v16  ;;  %v982_v8 = vfloor.f32 %v918_v62  ;;  %6205 = vst [vmem:[#allocation100_spill] sm:$0xff] %v4550_v37  ;;  %v6207_v62 = vld [vmem:[#allocation6_spill] sm:$0xff] }
 0x11f   : > { %v1373_v10 = vmul.f32 %v1122_v21, %v4136_v52  ;;  %v1372_v0 = vmul.f32 %v1118_v24, %v4136_v52  ;;  %1365 = vperm.xlu1 %3712, %v6201_v12   ;;  %1369 = vperm.xlu0 %3711, %v6202_v27   ;;  %v853_v21 = vmul.f32 %v4136_v52, %v776_v32  ;;  %v980_v24 = vfloor.f32 %v916_v33 }
 0x120   : > { %6206 = vst [vmem:[#allocation101_spill] sm:$0xff] %v4553_v35  ;;  %v3399_v32 = vtrunc.f32 %v979_v4  ;;  %v3397_v33 = vtrunc.f32 %v978_v59 }
 0x121   : > { %v1437_v34 = vadd.f32 0.5, %v1373_v10  ;;  %v1436_v41 = vadd.f32 0.5, %v1372_v0  ;;  %v3401_v63 = vtrunc.f32 %v980_v24 }
 0x122   : > { %v1126_v60 = vpop.permute.xlu1 %1125  ;;  %v1130_v51 = vpop.permute.xlu0 %1129  ;;  %v3398_v61 = vcvt.f32.s32 %v3397_v33 }
 0x123   : > { %v1501_v27 = vfloor.f32 %v1437_v34  ;;  %v1500_v7 = vfloor.f32 %v1436_v41  ;;  %v1374_v48 = vmul.f32 %v1126_v60, %v4136_v52  ;;  %v1375_v14 = vmul.f32 %v1130_v51, %v4136_v52  ;;  %3713 = vset.pattern.permute.xlu1 %v3779_v44  ;;  %3714 = vset.pattern.permute.xlu0 %v3779_v44 }
 0x124   : > { %1697 = vperm.xlu1 %3713, %v6207_v62   ;;  %1701 = vperm.xlu0 %3714, %v6208_v13   ;;  %v4558_v51 = vadd.s32 %v3394_v53, %v4187_v23  ;;  %v4560_v41 = vadd.f32 0.5, %v853_v21  ;;  %v3405_v44 = vtrunc.f32 %v982_v8  ;;  %v3400_v62 = vcvt.f32.s32 %v3399_v32  ;;  %v6211_v53 = vld [vmem:[#allocation10_spill] sm:$0xff] }
 0x125   : > { %v3411_v10 = vtrunc.f32 %v1501_v27  ;;  %v3409_v0 = vtrunc.f32 %v1500_v7  ;;  %v1438_v60 = vadd.f32 0.5, %v1374_v48  ;;  %v1439_v34 = vadd.f32 0.5, %v1375_v14  ;;  %v6210_v48 = vld [vmem:[#allocation5_spill] sm:$0xff] }
 0x126   : > { %6209 = vst [vmem:[#allocation6_spill] sm:$0xff] %v4558_v51  ;;  %v1134_v16 = vpop.permute.xlu1 %1133  ;;  %v1138_v1 = vpop.permute.xlu0 %1137  ;;  %v981_v13 = vfloor.f32 %v4560_v41  ;;  %v4574_v41 = vadd.s32 %v3400_v62, %v4187_v23 }
 0x127   : > { %v3412_v35 = vcvt.f32.s32 %v3411_v10  ;;  %v3410_v4 = vcvt.f32.s32 %v3409_v0  ;;  %v1502_v59 = vfloor.f32 %v1438_v60  ;;  %v1503_v37 = vfloor.f32 %v1439_v34 }
 0x128   : > { %v1376_v27 = vmul.f32 %v1134_v16, %v4136_v52  ;;  %v1377_v7 = vmul.f32 %v1138_v1, %v4136_v52  ;;  %1705 = vperm.xlu1 %3713, %v6210_v48   ;;  %1713 = vperm.xlu0 %3714, %v6211_v53   ;;  %v3402_v10 = vcvt.f32.s32 %v3401_v63  ;;  %v3406_v16 = vcvt.f32.s32 %v3405_v44 }
 0x129   : > { %v1633_v21 = vadd.s32 %v3412_v35, %v4191_v9  ;;  %v1632_v8 = vadd.s32 %v3410_v4, %v4191_v9  ;;  %v3413_v24 = vtrunc.f32 %v1502_v59  ;;  %v3415_v14 = vtrunc.f32 %v1503_v37  ;;  %v6212_v4 = vld [vmem:[#allocation7_spill] sm:$0xff]  ;;  %v6213_v37 = vld [vmem:[#allocation12_spill] sm:$0xff] }
 0x12a   : > { %v1440_v0 = vadd.f32 0.5, %v1376_v27  ;;  %v1441_v32 = vadd.f32 0.5, %v1377_v7  ;;  %v1142_v33 = vpop.permute.xlu1 %1141  ;;  %v1146_v60 = vpop.permute.xlu0 %1145  ;;  %v4577_v63 = vadd.s32 %v3398_v61, %v4187_v23  ;;  %v4581_v44 = vmul.f32 %v4136_v52, %v4509_v28 }
 0x12b   : > { %v2281_v34 = vmul.u32 %v4199_v49, %v1633_v21  ;;  %v3414_v1 = vcvt.f32.s32 %v3413_v24  ;;  %v3416_v48 = vcvt.f32.s32 %v3415_v14  ;;  %v2669_v51 = vmul.u32 2654435761, %v1633_v21 }
 0x12c   : > { %v2280_v53 = vmul.u32 %v4199_v49, %v1632_v8  ;;  %v1504_v35 = vfloor.f32 %v1440_v0  ;;  %v1505_v12 = vfloor.f32 %v1441_v32  ;;  %1709 = vperm.xlu1 %3713, %v6212_v4   ;;  %1721 = vperm.xlu0 %3714, %v6213_v37   ;;  %v4585_v27 = vadd.s32 %v3402_v10, %v4187_v23 }
 0x12d   : > { %v1634_v59 = vadd.s32 %v3414_v1, %v4191_v9  ;;  %v1635_v7 = vadd.s32 %v3416_v48, %v4191_v9  ;;  %v4589_v62 = vadd.s32 %v3406_v16, %v4187_v23  ;;  %v2668_v61 = vmul.u32 2654435761, %v1632_v8  ;;  %v6217_v48 = vld [vmem:[#allocation9_spill] sm:$0xff] }
 0x12e   : > { %v3417_v21 = vtrunc.f32 %v1504_v35  ;;  %v3419_v24 = vtrunc.f32 %v1505_v12  ;;  %v1150_v14 = vpop.permute.xlu1 %1149  ;;  %v1154_v0 = vpop.permute.xlu0 %1153  ;;  %v1378_v32 = vmul.f32 %v1142_v33, %v4136_v52  ;;  %v1379_v28 = vmul.f32 %v1146_v60, %v4136_v52  ;;  %v6218_v35 = vld [vmem:[#allocation14_spill] sm:$0xff] }
 0x12f   : > { %6214 = vst [vmem:[#allocation8_spill] sm:$0xff] %v4589_v62  ;;  %v4594_v4 = vadd.s32 %v2281_v34, %v4237_v42  ;;  %v4597_v10 = vxor.u32 %v2669_v51, %v4237_v42  ;;  %v4600_v1 = vadd.s32 %v2280_v53, %v4225_v36  ;;  %v2282_v8 = vmul.u32 %v4199_v49, %v1634_v59 }
 0x130   : > { %v3418_v12 = vcvt.f32.s32 %v3417_v21  ;;  %1717 = vperm.xlu1 %3713, %v6217_v48   ;;  %1729 = vperm.xlu0 %3714, %v6218_v35   ;;  %v2670_v16 = vmul.u32 2654435761, %v1634_v59  ;;  %v1442_v33 = vadd.f32 0.5, %v1378_v32  ;;  %v1443_v37 = vadd.f32 0.5, %v1379_v28  ;;  %v6221_v28 = vld [vmem:[#allocation11_spill] sm:$0xff] }
 0x131   : > { %6215 = vst [vmem:[#allocation5_spill] sm:$0xff] %v4594_v4  ;;  %6216 = vst [vmem:[#allocation10_spill] sm:$0xff] %v4597_v10  ;;  %v2283_v60 = vmul.u32 %v4199_v49, %v1635_v7  ;;  %v2671_v34 = vmul.u32 2654435761, %v1635_v7  ;;  %v3420_v42 = vcvt.f32.s32 %v3419_v24  ;;  %v1380_v48 = vmul.f32 %v1150_v14, %v4136_v52  ;;  %v6222_v24 = vld [vmem:[#allocation16_spill] sm:$0xff]  ;;  %v6230_v4 = vld [vmem:[#allocation15_spill] sm:$0xff] }
 0x132   : > { %v4607_v23 = vadd.s32 %v3418_v12, %v4191_v9  ;;  %v1158_v51 = vpop.permute.xlu1 %1157  ;;  %v1162_v53 = vpop.permute.xlu0 %1161  ;;  %v1506_v62 = vfloor.f32 %v1442_v33  ;;  %v1507_v21 = vfloor.f32 %v1443_v37  ;;  %v1381_v35 = vmul.f32 %v1154_v0, %v4136_v52 }
 0x133   : > { %v4611_v10 = vtrunc.f32 %v981_v13  ;;  %v4614_v59 = vxor.u32 %v2668_v61, %v4225_v36  ;;  %v1382_v32 = vmul.f32 %v1158_v51, %v4136_v52  ;;  %v1383_v7 = vmul.f32 %v1162_v53, %v4136_v52 }
 0x134   : > { %1725 = vperm.xlu1 %3713, %v6221_v28   ;;  %1737 = vperm.xlu0 %3714, %v6222_v24   ;;  %v4621_v12 = vadd.s32 %v2282_v8, %v4208_v54  ;;  %v4624_v14 = vxor.u32 %v2670_v16, %v4208_v54  ;;  %v3421_v0 = vtrunc.f32 %v1506_v62  ;;  %v3423_v13 = vtrunc.f32 %v1507_v21 }
 0x135   : > { %6219 = vst [vmem:[#allocation7_spill] sm:$0xff] %v4611_v10  ;;  %6220 = vst [vmem:[#allocation12_spill] sm:$0xff] %v4614_v59  ;;  %v4627_v33 = vadd.s32 %v2283_v60, %v4234_v43  ;;  %v4630_v36 = vxor.u32 %v2671_v34, %v4234_v43  ;;  %v1444_v61 = vadd.f32 0.5, %v1380_v48  ;;  %v1445_v37 = vadd.f32 0.5, %v1381_v35  ;;  %v6227_v60 = vld [vmem:[#allocation13_spill] sm:$0xff] }
 0x136   : > { %6223 = vst [vmem:[#allocation9_spill] sm:$0xff] %v4621_v12  ;;  %6224 = vst [vmem:[#allocation14_spill] sm:$0xff] %v4624_v14  ;;  %v1166_v51 = vpop.permute.xlu1 %1165  ;;  %v1170_v53 = vpop.permute.xlu0 %1169  ;;  %v2284_v28 = vmul.u32 %v4199_v49, %v4607_v23  ;;  %v1637_v8 = vadd.s32 %v3420_v42, %v4191_v9  ;;  %v3422_v24 = vcvt.f32.s32 %v3421_v0  ;;  %v3424_v54 = vcvt.f32.s32 %v3423_v13 }
 0x137   : > { %6225 = vst [vmem:[#allocation11_spill] sm:$0xff] %v4627_v33  ;;  %6226 = vst [vmem:[#allocation16_spill] sm:$0xff] %v4630_v36  ;;  %v1508_v16 = vfloor.f32 %v1444_v61  ;;  %v1509_v62 = vfloor.f32 %v1445_v37  ;;  %v1446_v21 = vadd.f32 0.5, %v1382_v32  ;;  %v1447_v14 = vadd.f32 0.5, %v1383_v7  ;;  %v6228_v33 = vld [vmem:[#allocation18_spill] sm:$0xff] }
 0x138   : > { %1733 = vperm.xlu1 %3713, %v6227_v60   ;;  %1745 = vperm.xlu0 %3714, %v6228_v33   ;;  %v1638_v43 = vadd.s32 %v3422_v24, %v4191_v9  ;;  %v1639_v34 = vadd.s32 %v3424_v54, %v4191_v9  ;;  %v1384_v48 = vmul.f32 %v1166_v51, %v4136_v52  ;;  %v2672_v32 = vmul.u32 2654435761, %v4607_v23 }
 0x139   : > { %v1385_v35 = vmul.f32 %v1170_v53, %v4136_v52  ;;  %v3425_v36 = vtrunc.f32 %v1508_v16  ;;  %v3427_v42 = vtrunc.f32 %v1509_v62  ;;  %v1510_v0 = vfloor.f32 %v1446_v21  ;;  %v6231_v53 = vld [vmem:[#allocation20_spill] sm:$0xff] }
 0x13a   : > { %v1511_v13 = vfloor.f32 %v1447_v14  ;;  %v1174_v61 = vpop.permute.xlu1 %1173  ;;  %v1178_v37 = vpop.permute.xlu0 %1177  ;;  %v2285_v7 = vmul.u32 %v4199_v49, %v1637_v8  ;;  %v1448_v60 = vadd.f32 0.5, %v1384_v48  ;;  %v4644_v24 = vadd.s32 %v2284_v28, %v4253_v26 }
 0x13b   : > { %v1449_v33 = vadd.f32 0.5, %v1385_v35  ;;  %v2673_v54 = vmul.u32 2654435761, %v1637_v8  ;;  %v3426_v12 = vcvt.f32.s32 %v3425_v36  ;;  %v3428_v51 = vcvt.f32.s32 %v3427_v42 }
 0x13c   : > { %6229 = vst [vmem:[#allocation13_spill] sm:$0xff] %v4644_v24  ;;  %1741 = vperm.xlu1 %3713, %v6230_v4   ;;  %1753 = vperm.xlu0 %3714, %v6231_v53   ;;  %v2286_v14 = vmul.u32 %v4199_v49, %v1638_v43  ;;  %v2674_v16 = vmul.u32 2654435761, %v1638_v43  ;;  %v3429_v62 = vtrunc.f32 %v1510_v0  ;;  %v3431_v21 = vtrunc.f32 %v1511_v13 }
 0x13d   : > { %v2287_v23 = vmul.u32 %v4199_v49, %v1639_v34  ;;  %v2675_v59 = vmul.u32 2654435761, %v1639_v34  ;;  %v1640_v48 = vadd.s32 %v3426_v12, %v4191_v9  ;;  %v1641_v28 = vadd.s32 %v3428_v51, %v4191_v9  ;;  %v6233_v34 = vld [vmem:[#allocation17_spill] sm:$0xff]  ;;  %v6234_v12 = vld [vmem:[#allocation22_spill] sm:$0xff] }
 0x13e   : > { %v1182_v35 = vpop.permute.xlu1 %1181  ;;  %v1186_v8 = vpop.permute.xlu0 %1185  ;;  %v3430_v36 = vcvt.f32.s32 %v3429_v62  ;;  %v3432_v42 = vcvt.f32.s32 %v3431_v21  ;;  %v1512_v24 = vfloor.f32 %v1448_v60  ;;  %v1513_v4 = vfloor.f32 %v1449_v33 }
 0x13f   : > { %v4653_v53 = vxor.u32 %v2672_v32, %v4253_v26  ;;  %v4656_v43 = vadd.s32 %v2285_v7, %v4244_v30  ;;  %v2288_v0 = vmul.u32 %v4199_v49, %v1640_v48  ;;  %v2676_v13 = vmul.u32 2654435761, %v1640_v48 }
 0x140   : > { %1749 = vperm.xlu1 %3713, %v6233_v34   ;;  %1761 = vperm.xlu0 %3714, %v6234_v12   ;;  %v2289_v51 = vmul.u32 %v4199_v49, %v1641_v28  ;;  %v1642_v62 = vadd.s32 %v3430_v36, %v4191_v9  ;;  %v1386_v60 = vmul.f32 %v1174_v61, %v4136_v52  ;;  %v3433_v7 = vtrunc.f32 %v1512_v24 }
 0x141   : > { %6232 = vst [vmem:[#allocation18_spill] sm:$0xff] %v4656_v43  ;;  %v1387_v33 = vmul.f32 %v1178_v37, %v4136_v52  ;;  %v4666_v26 = vxor.u32 %v2673_v54, %v4244_v30  ;;  %v1643_v32 = vadd.s32 %v3432_v42, %v4191_v9  ;;  %v3435_v21 = vtrunc.f32 %v1513_v4 }
 0x142   : > { %v1190_v48 = vpop.permute.xlu1 %1189  ;;  %v1194_v43 = vpop.permute.xlu0 %1193  ;;  %v4670_v34 = vadd.s32 %v2286_v14, %v4271_v19  ;;  %v4673_v12 = vxor.u32 %v2674_v16, %v4271_v19  ;;  %v4676_v36 = vadd.s32 %v2287_v23, %v4256_v46  ;;  %v4679_v61 = vxor.u32 %v2675_v59, %v4256_v46  ;;  %v6238_v14 = vld [vmem:[#allocation19_spill] sm:$0xff]  ;;  %v6239_v19 = vld [vmem:[#allocation24_spill] sm:$0xff] }
 0x143   : > { %v4682_v30 = vadd.s32 %v2288_v0, %v4285_v22  ;;  %v4685_v37 = vxor.u32 %v2676_v13, %v4285_v22  ;;  %v4688_v24 = vadd.s32 %v2289_v51, %v4274_v47  ;;  %v2677_v54 = vmul.u32 2654435761, %v1641_v28 }
 0x144   : > { %6235 = vst [vmem:[#allocation15_spill] sm:$0xff] %v4676_v36  ;;  %6236 = vst [vmem:[#allocation20_spill] sm:$0xff] %v4679_v61  ;;  %1757 = vperm.xlu1 %3713, %v6238_v14   ;;  %1769 = vperm.xlu0 %3714, %v6239_v19   ;;  %v2290_v16 = vmul.u32 %v4199_v49, %v1642_v62  ;;  %v2678_v23 = vmul.u32 2654435761, %v1642_v62  ;;  %v1450_v42 = vadd.f32 0.5, %v1386_v60  ;;  %v1451_v46 = vadd.f32 0.5, %v1387_v33 }
 0x145   : > { %6237 = vst [vmem:[#allocation17_spill] sm:$0xff] %v4688_v24  ;;  %v2291_v59 = vmul.u32 %v4199_v49, %v1643_v32  ;;  %v2679_v4 = vmul.u32 2654435761, %v1643_v32  ;;  %v3434_v0 = vcvt.f32.s32 %v3433_v7  ;;  %v3436_v61 = vcvt.f32.s32 %v3435_v21  ;;  %v6241_v32 = vld [vmem:[#allocation21_spill] sm:$0xff] }
 0x146   : > { %v1198_v22 = vpop.permute.xlu1 %1197  ;;  %v1202_v13 = vpop.permute.xlu0 %1201  ;;  %v1514_v36 = vfloor.f32 %v1450_v42  ;;  %v1515_v51 = vfloor.f32 %v1451_v46  ;;  %v1388_v28 = vmul.f32 %v1182_v35, %v4136_v52  ;;  %v1389_v14 = vmul.f32 %v1186_v8, %v4136_v52 }
 0x147   : > { %v4697_v19 = vadd.f32 0.5, %v4581_v44  ;;  %v4700_v62 = vxor.u32 %v2677_v54, %v4274_v47  ;;  %v1390_v60 = vmul.f32 %v1190_v48, %v4136_v52  ;;  %v1391_v33 = vmul.f32 %v1194_v43, %v4136_v52 }
 0x148   : > { %1765 = vperm.xlu1 %3713, %v6241_v32   ;;  %1777 = vperm.xlu0 %3714, %v3942_v6   ;;  %v4707_v7 = vadd.s32 %v2290_v16, %v4305_v38  ;;  %v4710_v35 = vxor.u32 %v2678_v23, %v4305_v38  ;;  %v3437_v8 = vtrunc.f32 %v1514_v36  ;;  %v3439_v44 = vtrunc.f32 %v1515_v51 }
 0x149   : > { %6240 = vst [vmem:[#allocation22_spill] sm:$0xff] %v4700_v62  ;;  %v4713_v21 = vadd.s32 %v2291_v59, %v4302_v11  ;;  %v4716_v47 = vxor.u32 %v2679_v4, %v4302_v11  ;;  %v1452_v48 = vadd.f32 0.5, %v1388_v28  ;;  %v1453_v43 = vadd.f32 0.5, %v1389_v14  ;;  %v6244_v62 = vld [vmem:[#allocation23_spill] sm:$0xff] }
 0x14a   : > { %v1206_v54 = vpop.permute.xlu1 %1205  ;;  %v1210_v42 = vpop.permute.xlu0 %1209  ;;  %v1644_v6 = vadd.s32 %v3434_v0, %v4191_v9  ;;  %v1645_v16 = vadd.s32 %v3436_v61, %v4191_v9  ;;  %v3438_v46 = vcvt.f32.s32 %v3437_v8  ;;  %v3440_v32 = vcvt.f32.s32 %v3439_v44 }
 0x14b   : > { %6242 = vst [vmem:[#allocation19_spill] sm:$0xff] %v4713_v21  ;;  %6243 = vst [vmem:[#allocation24_spill] sm:$0xff] %v4716_v47  ;;  %v1516_v38 = vfloor.f32 %v1452_v48  ;;  %v1517_v23 = vfloor.f32 %v1453_v43  ;;  %v1454_v36 = vadd.f32 0.5, %v1390_v60  ;;  %v1455_v51 = vadd.f32 0.5, %v1391_v33  ;;  %v6245_v47 = vld [vmem:[#allocation25_spill] sm:$0xff] }
 0x14c   : > { %1773 = vperm.xlu1 %3713, %v6244_v62   ;;  %1785 = vperm.xlu0 %3714, %v3950_v20   ;;  %v1646_v11 = vadd.s32 %v3438_v46, %v4191_v9  ;;  %v1647_v59 = vadd.s32 %v3440_v32, %v4191_v9  ;;  %v1392_v4 = vmul.f32 %v1198_v22, %v4136_v52  ;;  %v2680_v33 = vmul.u32 2654435761, %v1644_v6 }
 0x14d   : > { %v1393_v0 = vmul.f32 %v1202_v13, %v4136_v52  ;;  %v3441_v28 = vtrunc.f32 %v1516_v38  ;;  %v3443_v61 = vtrunc.f32 %v1517_v23  ;;  %v1518_v14 = vfloor.f32 %v1454_v36 }
 0x14e   : > { %v1519_v8 = vfloor.f32 %v1455_v51  ;;  %v4726_v44 = vpop.permute.xlu1 %1213  ;;  %v4728_v60 = vpop.permute.xlu0 %1217  ;;  %v2292_v62 = vmul.u32 %v4199_v49, %v1644_v6  ;;  %v1456_v20 = vadd.f32 0.5, %v1392_v4  ;;  %v2293_v43 = vmul.u32 %v4199_v49, %v1645_v16 }
 0x14f   : > { %v1457_v48 = vadd.f32 0.5, %v1393_v0  ;;  %v2681_v46 = vmul.u32 2654435761, %v1645_v16  ;;  %v3442_v32 = vcvt.f32.s32 %v3441_v28  ;;  %v3444_v22 = vcvt.f32.s32 %v3443_v61 }
 0x150   : > { %1781 = vperm.xlu1 %3713, %v6245_v47   ;;  %1793 = vperm.xlu0 %3714, %v3960_v40   ;;  %v2294_v13 = vmul.u32 %v4199_v49, %v1646_v11  ;;  %v2682_v38 = vmul.u32 2654435761, %v1646_v11  ;;  %v3445_v23 = vtrunc.f32 %v1518_v14  ;;  %v3447_v36 = vtrunc.f32 %v1519_v8 }
 0x151   : > { %v2295_v51 = vmul.u32 %v4199_v49, %v1647_v59  ;;  %v2683_v21 = vmul.u32 2654435761, %v1647_v59  ;;  %v1648_v6 = vadd.s32 %v3442_v32, %v4191_v9  ;;  %v1649_v4 = vadd.s32 %v3444_v22, %v4191_v9 }
 0x152   : > { %v1222_v0 = vpop.permute.xlu1 %1221  ;;  %v1226_v16 = vpop.permute.xlu0 %1225  ;;  %v3446_v28 = vcvt.f32.s32 %v3445_v23  ;;  %v3448_v61 = vcvt.f32.s32 %v3447_v36  ;;  %v1520_v24 = vfloor.f32 %v1456_v20  ;;  %v1521_v47 = vfloor.f32 %v1457_v48 }
 0x153   : > { %v4739_v40 = vadd.s32 %v2292_v62, %v4315_v3  ;;  %v4742_v11 = vxor.u32 %v2680_v33, %v4315_v3  ;;  %v2296_v14 = vmul.u32 %v4199_v49, %v1648_v6  ;;  %v2684_v8 = vmul.u32 2654435761, %v1648_v6 }
 0x154   : > { %1789 = vperm.xlu1 %3713, %v3948_v17   ;;  %1801 = vperm.xlu0 %3714, %v3968_v56   ;;  %v4748_v59 = vadd.s32 %v2293_v43, %v4312_v2  ;;  %v1650_v32 = vadd.s32 %v3446_v28, %v4191_v9  ;;  %v1394_v20 = vmul.f32 %v1206_v54, %v4136_v52  ;;  %v3449_v33 = vtrunc.f32 %v1520_v24 }
 0x155   : > { %v1395_v62 = vmul.f32 %v1210_v42, %v4136_v52  ;;  %v2297_v48 = vmul.u32 %v4199_v49, %v1649_v4  ;;  %v4755_v3 = vadd.s32 %v3448_v61, %v4191_v9  ;;  %v3451_v22 = vtrunc.f32 %v1521_v47 }
 0x156   : > { %v1230_v23 = vpop.permute.xlu1 %1229  ;;  %v1234_v17 = vpop.permute.xlu0 %1233  ;;  %v4758_v56 = vxor.u32 %v2681_v46, %v4312_v2  ;;  %v4761_v43 = vadd.s32 %v2294_v13, %v4321_v55  ;;  %v4764_v36 = vxor.u32 %v2682_v38, %v4321_v55  ;;  %v4767_v54 = vadd.s32 %v2295_v51, %v4318_v15  ;;  %v6250_v46 = vld [vmem:[#allocation28_spill] sm:$0xff] }
 0x157   : > { %v4770_v42 = vxor.u32 %v2683_v21, %v4318_v15  ;;  %v4773_v24 = vadd.s32 %v2296_v14, %v4339_v58  ;;  %v4776_v6 = vxor.u32 %v2684_v8, %v4339_v58  ;;  %v2685_v2 = vmul.u32 2654435761, %v1649_v4 }
 0x158   : > { %6246 = vst [vmem:[#allocation21_spill] sm:$0xff] %v4767_v54  ;;  %1797 = vperm.xlu1 %3713, %v3958_v39   ;;  %1809 = vperm.xlu0 %3714, %v6250_v46   ;;  %v2298_v55 = vmul.u32 %v4199_v49, %v1650_v32  ;;  %v3450_v13 = vcvt.f32.s32 %v3449_v33  ;;  %v1458_v38 = vadd.f32 0.5, %v1394_v20  ;;  %v1459_v51 = vadd.f32 0.5, %v1395_v62  ;;  %v6253_v33 = vld [vmem:[#allocation26_spill] sm:$0xff] }
 0x159   : > { %6247 = vst [vmem:[#allocation23_spill] sm:$0xff] %v4770_v42  ;;  %6248 = vst [vmem:[#allocation25_spill] sm:$0xff] %v4773_v24  ;;  %v4782_v28 = vadd.s32 %v2297_v48, %v4336_v50  ;;  %v2686_v15 = vmul.u32 2654435761, %v1650_v32  ;;  %v2299_v21 = vmul.u32 %v4199_v49, %v4755_v3  ;;  %v3452_v61 = vcvt.f32.s32 %v3451_v22  ;;  %v6254_v22 = vld [vmem:[#allocation30_spill] sm:$0xff] }
 0x15a   : > { %6249 = vst [vmem:[#allocation102_spill] sm:$0xff] %v4776_v6  ;;  %v4786_v58 = vpop.permute.xlu1 %1237  ;;  %v4788_v4 = vpop.permute.xlu0 %1241  ;;  %v1522_v39 = vfloor.f32 %v1458_v38  ;;  %v1523_v47 = vfloor.f32 %v1459_v51  ;;  %v1396_v14 = vmul.f32 %v4726_v44, %v4136_v52  ;;  %v1397_v8 = vmul.f32 %v4728_v60, %v4136_v52  ;;  %v6255_v60 = vld [vmem:[#allocation71_spill] sm:$0xff] }
 0x15b   : > { %6251 = vst [vmem:[#allocation28_spill] sm:$0xff] %v4782_v28  ;;  %v4796_v32 = vxor.u32 %v2685_v2, %v4336_v50  ;;  %v1398_v62 = vmul.f32 %v1222_v0, %v4136_v52  ;;  %v1399_v48 = vmul.f32 %v1226_v16, %v4136_v52  ;;  %v2687_v46 = vmul.u32 2654435761, %v4755_v3 }
 0x15c   : > { %1805 = vperm.xlu1 %3713, %v6253_v33   ;;  %1817 = vperm.xlu0 %3714, %v6254_v22   ;;  %v1652_v44 = vadd.s32 %v3450_v13, %v4191_v9  ;;  %v3453_v38 = vtrunc.f32 %v1522_v39  ;;  %v3455_v51 = vtrunc.f32 %v1523_v47  ;;  %v4805_v28 = vadd.s32 %v2298_v55, %v6255_v60  ;;  %v6258_v33 = vld [vmem:[#allocation70_spill] sm:$0xff] }
 0x15d   : > { %6252 = vst [vmem:[#allocation103_spill] sm:$0xff] %v4796_v32  ;;  %v4808_v50 = vxor.u32 %v2686_v15, %v6255_v60  ;;  %v1460_v2 = vadd.f32 0.5, %v1396_v14  ;;  %v1461_v0 = vadd.f32 0.5, %v1397_v8  ;;  %v4815_v22 = vadd.s32 %v2299_v21, %v6258_v33  ;;  %v6261_v15 = vld [vmem:[#allocation32_spill] sm:$0xff] }
 0x15e   : > { %6256 = vst [vmem:[#allocation26_spill] sm:$0xff] %v4805_v28  ;;  %v4810_v20 = vpop.permute.xlu1 %1245  ;;  %v4812_v16 = vpop.permute.xlu0 %1249  ;;  %v1653_v3 = vadd.s32 %v3452_v61, %v4191_v9  ;;  %v3454_v13 = vcvt.f32.s32 %v3453_v38  ;;  %v3456_v39 = vcvt.f32.s32 %v3455_v51  ;;  %v1462_v55 = vadd.f32 0.5, %v1398_v62  ;;  %v6260_v28 = vld [vmem:[#allocation27_spill] sm:$0xff] }
 0x15f   : > { %6257 = vst [vmem:[#allocation30_spill] sm:$0xff] %v4808_v50  ;;  %6259 = vst [vmem:[#allocation71_spill] sm:$0xff] %v4815_v22  ;;  %v1524_v47 = vfloor.f32 %v1460_v2  ;;  %v1525_v10 = vfloor.f32 %v1461_v0  ;;  %v1463_v32 = vadd.f32 0.5, %v1399_v48  ;;  %v2300_v14 = vmul.u32 %v4199_v49, %v1652_v44 }
 0x160   : > { %1813 = vperm.xlu1 %3713, %v6260_v28   ;;  %1825 = vperm.xlu0 %3714, %v6261_v15   ;;  %v1654_v8 = vadd.s32 %v3454_v13, %v4191_v9  ;;  %v1400_v60 = vmul.f32 %v1230_v23, %v4136_v52  ;;  %v1401_v21 = vmul.f32 %v1234_v17, %v4136_v52  ;;  %v1526_v38 = vfloor.f32 %v1462_v55 }
 0x161   : > { %v3457_v22 = vtrunc.f32 %v1524_v47  ;;  %v3459_v61 = vtrunc.f32 %v1525_v10  ;;  %v1527_v51 = vfloor.f32 %v1463_v32  ;;  %v4829_v28 = vxor.u32 %v2687_v46, %v6258_v33  ;;  %v6263_v47 = vld [vmem:[#allocation29_spill] sm:$0xff]  ;;  %v6264_v10 = vld [vmem:[#allocation34_spill] sm:$0xff] }
 0x162   : > { %v4824_v2 = vpop.permute.xlu1 %1253  ;;  %v4826_v62 = vpop.permute.xlu0 %1257  ;;  %v1655_v48 = vadd.s32 %v3456_v39, %v4191_v9  ;;  %v1464_v0 = vadd.f32 0.5, %v1400_v60  ;;  %v1465_v15 = vadd.f32 0.5, %v1401_v21  ;;  %v2688_v13 = vmul.u32 2654435761, %v1652_v44  ;;  %v6265_v32 = vld [vmem:[#allocation73_spill] sm:$0xff] }
 0x163   : > { %6262 = vst [vmem:[#allocation70_spill] sm:$0xff] %v4829_v28  ;;  %v2301_v23 = vmul.u32 %v4199_v49, %v1653_v3  ;;  %v3458_v50 = vcvt.f32.s32 %v3457_v22  ;;  %v3460_v17 = vcvt.f32.s32 %v3459_v61  ;;  %v4836_v55 = vadd.s32 %v2300_v14, %v6265_v32  ;;  %v6268_v28 = vld [vmem:[#allocation31_spill] sm:$0xff] }
 0x164   : > { %1821 = vperm.xlu1 %3713, %v6263_v47   ;;  %1833 = vperm.xlu0 %3714, %v6264_v10   ;;  %v2689_v42 = vmul.u32 2654435761, %v1653_v3  ;;  %v3461_v54 = vtrunc.f32 %v1526_v38  ;;  %v3463_v46 = vtrunc.f32 %v1527_v51  ;;  %v2302_v33 = vmul.u32 %v4199_v49, %v1654_v8 }
 0x165   : > { %6266 = vst [vmem:[#allocation27_spill] sm:$0xff] %v4836_v55  ;;  %v2690_v39 = vmul.u32 2654435761, %v1654_v8  ;;  %v1656_v60 = vadd.s32 %v3458_v50, %v4191_v9  ;;  %v1657_v44 = vadd.s32 %v3460_v17, %v4191_v9  ;;  %v2303_v61 = vmul.u32 %v4199_v49, %v1655_v48  ;;  %v6269_v50 = vld [vmem:[#allocation36_spill] sm:$0xff] }
 0x166   : > { %v4841_v21 = vpop.permute.xlu1 %1261  ;;  %v4843_v22 = vpop.permute.xlu0 %1265  ;;  %v3462_v47 = vcvt.f32.s32 %v3461_v54  ;;  %v1528_v10 = vfloor.f32 %v1464_v0  ;;  %v1529_v14 = vfloor.f32 %v1465_v15  ;;  %v4847_v3 = vxor.u32 %v2688_v13, %v6265_v32  ;;  %v6270_v17 = vld [vmem:[#allocation72_spill] sm:$0xff] }
 0x167   : > { %v2691_v38 = vmul.u32 2654435761, %v1655_v48  ;;  %v2304_v51 = vmul.u32 %v4199_v49, %v1656_v60  ;;  %v3464_v8 = vcvt.f32.s32 %v3463_v46  ;;  %v4853_v55 = vadd.s32 %v2301_v23, %v6270_v17 }
 0x168   : > { %6267 = vst [vmem:[#allocation32_spill] sm:$0xff] %v4847_v3  ;;  %1829 = vperm.xlu1 %3713, %v6268_v28   ;;  %1841 = vperm.xlu0 %3714, %v6269_v50   ;;  %v2692_v6 = vmul.u32 2654435761, %v1656_v60  ;;  %v1402_v54 = vmul.f32 %v4786_v58, %v4136_v52  ;;  %v1403_v0 = vmul.f32 %v4788_v4, %v4136_v52  ;;  %v3465_v13 = vtrunc.f32 %v1528_v10  ;;  %v6273_v60 = vld [vmem:[#allocation75_spill] sm:$0xff]  ;;  %v6274_v4 = vld [vmem:[#allocation74_spill] sm:$0xff]  ;;  %v6277_v10 = vld [vmem:[#allocation77_spill] sm:$0xff] }
 0x169   : > { %6271 = vst [vmem:[#allocation29_spill] sm:$0xff] %v4853_v55  ;;  %v2305_v15 = vmul.u32 %v4199_v49, %v1657_v44  ;;  %v1658_v48 = vadd.s32 %v3462_v47, %v4191_v9  ;;  %v3467_v32 = vtrunc.f32 %v1529_v14  ;;  %v4866_v23 = vxor.u32 %v2689_v42, %v6270_v17  ;;  %v6279_v42 = vld [vmem:[#allocation33_spill] sm:$0xff]  ;;  %v6280_v17 = vld [vmem:[#allocation38_spill] sm:$0xff] }
 0x16a   : > { %v4861_v46 = vpop.permute.xlu1 %1269  ;;  %v4863_v28 = vpop.permute.xlu0 %1273  ;;  %v4869_v50 = vadd.s32 %v2302_v33, %v6273_v60  ;;  %v4872_v58 = vxor.u32 %v2690_v39, %v6273_v60  ;;  %v4875_v55 = vadd.s32 %v2303_v61, %v6274_v4  ;;  %v4878_v47 = vxor.u32 %v2691_v38, %v6274_v4 }
 0x16b   : > { %6272 = vst [vmem:[#allocation34_spill] sm:$0xff] %v4866_v23  ;;  %v4881_v14 = vadd.s32 %v2304_v51, %v6277_v10  ;;  %v2693_v3 = vmul.u32 2654435761, %v1657_v44  ;;  %v1659_v24 = vadd.s32 %v3464_v8, %v4191_v9  ;;  %v4887_v33 = vxor.u32 %v2692_v6, %v6277_v10  ;;  %v6286_v10 = vld [vmem:[#allocation40_spill] sm:$0xff] }
 0x16c   : > { %6275 = vst [vmem:[#allocation73_spill] sm:$0xff] %v4875_v55  ;;  %6276 = vst [vmem:[#allocation31_spill] sm:$0xff] %v4878_v47  ;;  %1837 = vperm.xlu1 %3713, %v6279_v42   ;;  %1849 = vperm.xlu0 %3714, %v6280_v17   ;;  %v3466_v39 = vcvt.f32.s32 %v3465_v13  ;;  %v1466_v60 = vadd.f32 0.5, %v1402_v54  ;;  %v1467_v61 = vadd.f32 0.5, %v1403_v0  ;;  %v6282_v55 = vld [vmem:[#allocation76_spill] sm:$0xff]  ;;  %v2306_v38 = vmul.u32 %v4199_v49, %v1658_v48 }
 0x16d   : > { %6278 = vst [vmem:[#allocation36_spill] sm:$0xff] %v4881_v14  ;;  %6281 = vst [vmem:[#allocation72_spill] sm:$0xff] %v4887_v33  ;;  %v4890_v23 = vadd.s32 %v2305_v15, %v6282_v55  ;;  %v2694_v51 = vmul.u32 2654435761, %v1658_v48  ;;  %v3468_v4 = vcvt.f32.s32 %v3467_v32  ;;  %v1404_v6 = vmul.f32 %v4810_v20, %v4136_v52  ;;  %v6285_v32 = vld [vmem:[#allocation35_spill] sm:$0xff] }
 0x16e   : > { %v4893_v44 = vpop.permute.xlu1 %1277  ;;  %v4895_v8 = vpop.permute.xlu0 %1281  ;;  %v1530_v42 = vfloor.f32 %v1466_v60  ;;  %v1531_v47 = vfloor.f32 %v1467_v61  ;;  %v1405_v54 = vmul.f32 %v4812_v16, %v4136_v52  ;;  %v4903_v15 = vxor.u32 %v2693_v3, %v6282_v55 }
 0x16f   : > { %6283 = vst [vmem:[#allocation75_spill] sm:$0xff] %v4890_v23  ;;  %v1406_v48 = vmul.f32 %v4824_v2, %v4136_v52  ;;  %v1407_v13 = vmul.f32 %v4826_v62, %v4136_v52  ;;  %v2307_v20 = vmul.u32 %v4199_v49, %v1659_v24  ;;  %v1660_v17 = vadd.s32 %v3466_v39, %v4191_v9 }
 0x170   : > { %6284 = vst [vmem:[#allocation74_spill] sm:$0xff] %v4903_v15  ;;  %1845 = vperm.xlu1 %3713, %v6285_v32   ;;  %1857 = vperm.xlu0 %3714, %v6286_v10   ;;  %v3469_v16 = vtrunc.f32 %v1530_v42  ;;  %v3471_v60 = vtrunc.f32 %v1531_v47  ;;  %v4914_v61 = vadd.s32 %v2306_v38, %v4415_v5  ;;  %v2695_v55 = vmul.u32 2654435761, %v1659_v24  ;;  %v6288_v38 = vld [vmem:[#allocation37_spill] sm:$0xff]  ;;  %v6289_v24 = vld [vmem:[#allocation42_spill] sm:$0xff] }
 0x171   : > { %v1468_v3 = vadd.f32 0.5, %v1404_v6  ;;  %v1469_v0 = vadd.f32 0.5, %v1405_v54  ;;  %v4917_v2 = vxor.u32 %v2694_v51, %v4415_v5  ;;  %v1661_v62 = vadd.s32 %v3468_v4, %v4191_v9 }
 0x172   : > { %v3470_v32 = vcvt.f32.s32 %v3469_v16  ;;  %v3472_v15 = vcvt.f32.s32 %v3471_v60  ;;  %v1470_v33 = vadd.f32 0.5, %v1406_v48  ;;  %v1471_v14 = vadd.f32 0.5, %v1407_v13  ;;  %v4920_v39 = vpop.permute.xlu1 %1285  ;;  %v4922_v47 = vpop.permute.xlu0 %1289 }
 0x173   : > { %6287 = vst [vmem:[#allocation77_spill] sm:$0xff] %v4917_v2  ;;  %v1532_v10 = vfloor.f32 %v1468_v3  ;;  %v1533_v23 = vfloor.f32 %v1469_v0  ;;  %v2308_v42 = vmul.u32 %v4199_v49, %v1660_v17  ;;  %v1408_v51 = vmul.f32 %v4841_v21, %v4136_v52  ;;  %v6292_v2 = vld [vmem:[#allocation39_spill] sm:$0xff] }
 0x174   : > { %1853 = vperm.xlu1 %3713, %v6288_v38   ;;  %1865 = vperm.xlu0 %3714, %v6289_v24   ;;  %v1662_v5 = vadd.s32 %v3470_v32, %v4191_v9  ;;  %v1409_v4 = vmul.f32 %v4843_v22, %v4136_v52  ;;  %v1534_v0 = vfloor.f32 %v1470_v33  ;;  %v1535_v48 = vfloor.f32 %v1471_v14  ;;  %v6293_v22 = vld [vmem:[#allocation44_spill] sm:$0xff] }
 0x175   : > { %v3473_v6 = vtrunc.f32 %v1532_v10  ;;  %v3475_v54 = vtrunc.f32 %v1533_v23  ;;  %v4933_v13 = vadd.s32 %v2307_v20, %v4412_v45  ;;  %v4936_v16 = vxor.u32 %v2695_v55, %v4412_v45 }
 0x176   : > { %v1663_v60 = vadd.s32 %v3472_v15, %v4191_v9  ;;  %v1472_v3 = vadd.f32 0.5, %v1408_v51  ;;  %v2696_v32 = vmul.u32 2654435761, %v1660_v17  ;;  %v2309_v38 = vmul.u32 %v4199_v49, %v1661_v62  ;;  %v4948_v55 = vpop.permute.xlu1 %1293  ;;  %v4950_v51 = vpop.permute.xlu0 %1297 }
 0x177   : > { %6290 = vst [vmem:[#allocation33_spill] sm:$0xff] %v4933_v13  ;;  %6291 = vst [vmem:[#allocation38_spill] sm:$0xff] %v4936_v16  ;;  %v3474_v21 = vcvt.f32.s32 %v3473_v6  ;;  %v3476_v24 = vcvt.f32.s32 %v3475_v54  ;;  %v2697_v23 = vmul.u32 2654435761, %v1661_v62  ;;  %v3477_v14 = vtrunc.f32 %v1534_v0 }
 0x178   : > { %1861 = vperm.xlu1 %3713, %v6292_v2   ;;  %1873 = vperm.xlu0 %3714, %v6293_v22   ;;  %v3479_v33 = vtrunc.f32 %v1535_v48  ;;  %v1473_v20 = vadd.f32 0.5, %v1409_v4  ;;  %v4943_v10 = vadd.s32 %v2308_v42, %v4421_v29  ;;  %v2310_v45 = vmul.u32 %v4199_v49, %v1662_v5  ;;  %v6294_v22 = vld [vmem:[#allocation41_spill] sm:$0xff] }
 0x179   : > { %v1664_v15 = vadd.s32 %v3474_v21, %v4191_v9  ;;  %v1665_v17 = vadd.s32 %v3476_v24, %v4191_v9  ;;  %v2698_v2 = vmul.u32 2654435761, %v1662_v5  ;;  %v2311_v6 = vmul.u32 %v4199_v49, %v1663_v60  ;;  %v6295_v21 = vld [vmem:[#allocation46_spill] sm:$0xff] }
 0x17a   : > { %v3478_v62 = vcvt.f32.s32 %v3477_v14  ;;  %v1536_v54 = vfloor.f32 %v1472_v3  ;;  %v4954_v4 = vxor.u32 %v2696_v32, %v4421_v29  ;;  %v2699_v42 = vmul.u32 2654435761, %v1663_v60  ;;  %v6296_v24 = vld [vmem:[#allocation78_spill] sm:$0xff] }
 0x17b   : > { %v2312_v0 = vmul.u32 %v4199_v49, %v1664_v15  ;;  %v3480_v48 = vcvt.f32.s32 %v3479_v33  ;;  %v4960_v16 = vadd.s32 %v2309_v38, %v6296_v24  ;;  %v1537_v13 = vfloor.f32 %v1473_v20  ;;  %v6301_v20 = vld [vmem:[#allocation79_spill] sm:$0xff] }
 0x17c   : > { %1869 = vperm.xlu1 %3713, %v6294_v22   ;;  %1881 = vperm.xlu0 %3714, %v6295_v21   ;;  %v1410_v5 = vmul.f32 %v4861_v46, %v4136_v52  ;;  %v1411_v3 = vmul.f32 %v4863_v28, %v4136_v52  ;;  %v2700_v29 = vmul.u32 2654435761, %v1664_v15  ;;  %v2313_v60 = vmul.u32 %v4199_v49, %v1665_v17  ;;  %v6299_v22 = vld [vmem:[#allocation80_spill] sm:$0xff]  ;;  %v6304_v15 = vld [vmem:[#allocation82_spill] sm:$0xff] }
 0x17d   : > { %6297 = vst [vmem:[#allocation76_spill] sm:$0xff] %v4960_v16  ;;  %v1666_v32 = vadd.s32 %v3478_v62, %v4191_v9  ;;  %v3481_v14 = vtrunc.f32 %v1536_v54  ;;  %v4969_v33 = vxor.u32 %v2697_v23, %v6296_v24  ;;  %v4972_v21 = vadd.s32 %v2310_v45, %v6299_v22  ;;  %v4987_v23 = vpop.permute.xlu1 %1301  ;;  %v4989_v24 = vpop.permute.xlu0 %1305  ;;  %v6306_v45 = vld [vmem:[#allocation43_spill] sm:$0xff] }
 0x17e   : > { %v4975_v38 = vxor.u32 %v2698_v2, %v6299_v22  ;;  %v4978_v46 = vadd.s32 %v2311_v6, %v6301_v20  ;;  %v4981_v28 = vxor.u32 %v2699_v42, %v6301_v20  ;;  %v4984_v16 = vadd.s32 %v2312_v0, %v6304_v15  ;;  %v6307_v2 = vld [vmem:[#allocation48_spill] sm:$0xff]  ;;  %v6309_v0 = vld [vmem:[#allocation81_spill] sm:$0xff] }
 0x17f   : > { %6298 = vst [vmem:[#allocation35_spill] sm:$0xff] %v4969_v33  ;;  %v2701_v62 = vmul.u32 2654435761, %v1665_v17  ;;  %v1667_v54 = vadd.s32 %v3480_v48, %v4191_v9  ;;  %v3482_v22 = vcvt.f32.s32 %v3481_v14  ;;  %v3483_v6 = vtrunc.f32 %v1537_v13 }
 0x180   : > { %6300 = vst [vmem:[#allocation40_spill] sm:$0xff] %v4975_v38  ;;  %6302 = vst [vmem:[#allocation37_spill] sm:$0xff] %v4978_v46  ;;  %1877 = vperm.xlu1 %3713, %v6306_v45   ;;  %1889 = vperm.xlu0 %3714, %v6307_v2   ;;  %v1474_v46 = vadd.f32 0.5, %v1410_v5  ;;  %v1475_v33 = vadd.f32 0.5, %v1411_v3  ;;  %v4994_v42 = vxor.u32 %v2700_v29, %v6304_v15  ;;  %v2702_v48 = vmul.u32 2654435761, %v1666_v32 }
 0x181   : > { %6303 = vst [vmem:[#allocation42_spill] sm:$0xff] %v4981_v28  ;;  %6305 = vst [vmem:[#allocation39_spill] sm:$0xff] %v4984_v16  ;;  %v4997_v20 = vadd.s32 %v2313_v60, %v6309_v0  ;;  %v2314_v17 = vmul.u32 %v4199_v49, %v1666_v32  ;;  %v1412_v45 = vmul.f32 %v4893_v44, %v4136_v52  ;;  %v6311_v13 = vfloor.f32 %v4697_v19  ;;  %v6314_v32 = vld [vmem:[#allocation45_spill] sm:$0xff] }
 0x182   : > { %6308 = vst [vmem:[#allocation44_spill] sm:$0xff] %v4994_v42  ;;  %v1538_v28 = vfloor.f32 %v1474_v46  ;;  %v1539_v16 = vfloor.f32 %v1475_v33  ;;  %v1413_v14 = vmul.f32 %v4895_v8, %v4136_v52  ;;  %v5009_v3 = vxor.u32 %v2701_v62, %v6309_v0  ;;  %v6315_v33 = vld [vmem:[#allocation50_spill] sm:$0xff]  ;;  %v6319_v42 = vld [vmem:[#allocation47_spill] sm:$0xff] }
 0x183   : > { %6310 = vst [vmem:[#allocation41_spill] sm:$0xff] %v4997_v20  ;;  %v5006_v5 = vtrunc.f32 %v6311_v13  ;;  %v1414_v29 = vmul.f32 %v4920_v39, %v4136_v52  ;;  %v1415_v60 = vmul.f32 %v4922_v47, %v4136_v52  ;;  %v1668_v44 = vadd.s32 %v3482_v22, %v4191_v9  ;;  %v5019_v13 = vpop.permute.xlu1 %1309  ;;  %v5021_v39 = vpop.permute.xlu0 %1313 }
 0x184   : > { %6313 = vst [vmem:[#allocation78_spill] sm:$0xff] %v5009_v3  ;;  %1885 = vperm.xlu1 %3713, %v6314_v32   ;;  %1897 = vperm.xlu0 %3714, %v6315_v33   ;;  %v3484_v8 = vcvt.f32.s32 %v3483_v6  ;;  %v3485_v46 = vtrunc.f32 %v1538_v28  ;;  %v3487_v19 = vtrunc.f32 %v1539_v16  ;;  %v2315_v15 = vmul.u32 %v4199_v49, %v1667_v54  ;;  %v6316_v3 = vld [vmem:[#allocation84_spill] sm:$0xff] }
 0x185   : > { %6312 = vst [vmem:[#allocation46_spill] sm:$0xff] %v5006_v5  ;;  %v2703_v2 = vmul.u32 2654435761, %v1667_v54  ;;  %v1476_v62 = vadd.f32 0.5, %v1412_v45  ;;  %v1477_v0 = vadd.f32 0.5, %v1413_v14  ;;  %v5024_v47 = vadd.s32 %v2314_v17, %v6316_v3  ;;  %v6320_v54 = vld [vmem:[#allocation52_spill] sm:$0xff] }
 0x186   : > { %v5027_v32 = vxor.u32 %v2702_v48, %v6316_v3  ;;  %v3486_v33 = vcvt.f32.s32 %v3485_v46  ;;  %v3488_v22 = vcvt.f32.s32 %v3487_v19  ;;  %v1478_v16 = vadd.f32 0.5, %v1414_v29  ;;  %v6321_v29 = vld [vmem:[#allocation83_spill] sm:$0xff] }
 0x187   : > { %6317 = vst [vmem:[#allocation80_spill] sm:$0xff] %v5024_v47  ;;  %v1540_v6 = vfloor.f32 %v1476_v62  ;;  %v1541_v28 = vfloor.f32 %v1477_v0  ;;  %v1479_v20 = vadd.f32 0.5, %v1415_v60  ;;  %v2316_v45 = vmul.u32 %v4199_v49, %v1668_v44  ;;  %v1318_v38 = vpop.permute.xlu1 %1317 }
 0x188   : > { %6318 = vst [vmem:[#allocation79_spill] sm:$0xff] %v5027_v32  ;;  %1893 = vperm.xlu1 %3713, %v6319_v42   ;;  %1905 = vperm.xlu0 %3714, %v6320_v54   ;;  %v1669_v14 = vadd.s32 %v3484_v8, %v4191_v9  ;;  %v1416_v17 = vmul.f32 %v4948_v55, %v4136_v52  ;;  %v1542_v19 = vfloor.f32 %v1478_v16  ;;  %v2704_v8 = vmul.u32 2654435761, %v1668_v44 }
 0x189   : > { %v1417_v48 = vmul.f32 %v4950_v51, %v4136_v52  ;;  %v3489_v3 = vtrunc.f32 %v1540_v6  ;;  %v3491_v46 = vtrunc.f32 %v1541_v28  ;;  %v1543_v62 = vfloor.f32 %v1479_v20  ;;  %v1322_v51 = vpop.permute.xlu0 %1321  ;;  %v6324_v6 = vld [vmem:[#allocation49_spill] sm:$0xff]  ;;  %v6325_v28 = vld [vmem:[#allocation54_spill] sm:$0xff] }
 0x18a   : > { %v5038_v60 = vadd.s32 %v2315_v15, %v6321_v29  ;;  %v5041_v42 = vxor.u32 %v2703_v2, %v6321_v29  ;;  %v1670_v0 = vadd.s32 %v3486_v33, %v4191_v9  ;;  %v1480_v54 = vadd.f32 0.5, %v1416_v17  ;;  %v6326_v29 = vld [vmem:[#allocation86_spill] sm:$0xff] }
 0x18b   : > { %v1671_v32 = vadd.s32 %v3488_v22, %v4191_v9  ;;  %v3490_v55 = vcvt.f32.s32 %v3489_v3  ;;  %v3492_v47 = vcvt.f32.s32 %v3491_v46  ;;  %v2317_v20 = vmul.u32 %v4199_v49, %v1669_v14 }
 0x18c   : > { %6322 = vst [vmem:[#allocation82_spill] sm:$0xff] %v5038_v60  ;;  %6323 = vst [vmem:[#allocation43_spill] sm:$0xff] %v5041_v42  ;;  %1901 = vperm.xlu1 %3713, %v6324_v6   ;;  %1913 = vperm.xlu0 %3714, %v6325_v28   ;;  %v3493_v15 = vtrunc.f32 %v1542_v19  ;;  %v3495_v16 = vtrunc.f32 %v1543_v62  ;;  %v1481_v2 = vadd.f32 0.5, %v1417_v48  ;;  %v5049_v42 = vadd.s32 %v2316_v45, %v6326_v29  ;;  %v6329_v60 = vld [vmem:[#allocation51_spill] sm:$0xff] }
 0x18d   : > { %v2705_v33 = vmul.u32 2654435761, %v1669_v14  ;;  %v1672_v44 = vadd.s32 %v3490_v55, %v4191_v9  ;;  %v1673_v22 = vadd.s32 %v3492_v47, %v4191_v9  ;;  %v2318_v17 = vmul.u32 %v4199_v49, %v1670_v0 }
 0x18e   : > { %6327 = vst [vmem:[#allocation48_spill] sm:$0xff] %v5049_v42  ;;  %v2706_v3 = vmul.u32 2654435761, %v1670_v0  ;;  %v3494_v46 = vcvt.f32.s32 %v3493_v15  ;;  %v1544_v6 = vfloor.f32 %v1480_v54  ;;  %v5055_v28 = vxor.u32 %v2704_v8, %v6326_v29  ;;  %v1326_v15 = vpop.permute.xlu1 %1325  ;;  %v6333_v29 = vld [vmem:[#allocation88_spill] sm:$0xff] }
 0x18f   : > { %v2319_v19 = vmul.u32 %v4199_v49, %v1671_v32  ;;  %v2707_v62 = vmul.u32 2654435761, %v1671_v32  ;;  %v3496_v48 = vcvt.f32.s32 %v3495_v16  ;;  %v1545_v14 = vfloor.f32 %v1481_v2  ;;  %v6330_v16 = vld [vmem:[#allocation85_spill] sm:$0xff] }
 0x190   : > { %6328 = vst [vmem:[#allocation81_spill] sm:$0xff] %v5055_v28  ;;  %1909 = vperm.xlu1 %3713, %v6329_v60   ;;  %1921 = vperm.xlu0 %3714, %v6184_v31   ;;  %v2320_v45 = vmul.u32 %v4199_v49, %v1672_v44  ;;  %v1418_v47 = vmul.f32 %v4987_v23, %v4136_v52  ;;  %v2708_v54 = vmul.u32 2654435761, %v1672_v44  ;;  %v3497_v32 = vtrunc.f32 %v1544_v6  ;;  %v1330_v60 = vpop.permute.xlu0 %1329  ;;  %v6334_v44 = vld [vmem:[#allocation87_spill] sm:$0xff] }
 0x191   : > { %v1419_v0 = vmul.f32 %v4989_v24, %v4136_v52  ;;  %v2321_v8 = vmul.u32 %v4199_v49, %v1673_v22  ;;  %v5067_v55 = vadd.s32 %v3494_v46, %v4191_v9  ;;  %v5070_v31 = vadd.s32 %v2317_v20, %v6330_v16  ;;  %v6337_v20 = vld [vmem:[#allocation53_spill] sm:$0xff] }
 0x192   : > { %v5073_v2 = vxor.u32 %v2705_v33, %v6330_v16  ;;  %v5076_v23 = vadd.s32 %v2318_v17, %v6333_v29  ;;  %v5079_v24 = vxor.u32 %v2706_v3, %v6333_v29  ;;  %v5082_v28 = vadd.s32 %v2319_v19, %v6334_v44  ;;  %v6339_v29 = vld [vmem:[#allocation89_spill] sm:$0xff] }
 0x193   : > { %6331 = vst [vmem:[#allocation45_spill] sm:$0xff] %v5070_v31  ;;  %v5085_v46 = vxor.u32 %v2707_v62, %v6334_v44  ;;  %v2709_v6 = vmul.u32 2654435761, %v1673_v22  ;;  %v1675_v42 = vadd.s32 %v3496_v48, %v4191_v9  ;;  %v3498_v33 = vcvt.f32.s32 %v3497_v32  ;;  %v6338_v31 = vld [vmem:[#allocation90_spill] sm:$0xff] }
 0x194   : > { %6332 = vst [vmem:[#allocation50_spill] sm:$0xff] %v5073_v2  ;;  %6335 = vst [vmem:[#allocation84_spill] sm:$0xff] %v5082_v28  ;;  %1917 = vperm.xlu1 %3713, %v6337_v20   ;;  %1929 = vperm.xlu0 %3714, %v6190_v18   ;;  %v3499_v16 = vtrunc.f32 %v1545_v14  ;;  %v1482_v17 = vadd.f32 0.5, %v1418_v47  ;;  %v1483_v2 = vadd.f32 0.5, %v1419_v0  ;;  %v5091_v3 = vadd.s32 %v2320_v45, %v6338_v31  ;;  %v1338_v32 = vpop.permute.xlu0 %1337 }
 0x195   : > { %6336 = vst [vmem:[#allocation47_spill] sm:$0xff] %v5085_v46  ;;  %v5094_v19 = vxor.u32 %v2708_v54, %v6338_v31  ;;  %v5097_v62 = vadd.s32 %v2321_v8, %v6339_v29  ;;  %v2322_v22 = vmul.u32 %v4199_v49, %v5067_v55  ;;  %v1420_v18 = vmul.f32 %v5019_v13, %v4136_v52  ;;  %v1334_v8 = vpop.permute.xlu1 %1333  ;;  %v6342_v31 = vld [vmem:[#allocation55_spill] sm:$0xff] }
 0x196   : > { %v1546_v48 = vfloor.f32 %v1482_v17  ;;  %v1547_v44 = vfloor.f32 %v1483_v2  ;;  %v1421_v14 = vmul.f32 %v5021_v39, %v4136_v52  ;;  %v5107_v47 = vxor.u32 %v2709_v6, %v6339_v29 }
 0x197   : > { %6340 = vst [vmem:[#allocation52_spill] sm:$0xff] %v5097_v62  ;;  %v1422_v0 = vmul.f32 %v1318_v38, %v4136_v52  ;;  %v1423_v54 = vmul.f32 %v1322_v51, %v4136_v52  ;;  %v1676_v13 = vadd.s32 %v3498_v33, %v4191_v9  ;;  %v3500_v2 = vcvt.f32.s32 %v3499_v16  ;;  %v6343_v38 = vld [vmem:[#allocation91_spill] sm:$0xff]  ;;  %v6344_v33 = vld [vmem:[#allocation62_spill] sm:$0xff] }
 0x198   : > { %6341 = vst [vmem:[#allocation83_spill] sm:$0xff] %v5107_v47  ;;  %1925 = vperm.xlu1 %3713, %v6342_v31   ;;  %1937 = vperm.xlu0 %3714, %v6195_v25   ;;  %v3501_v20 = vtrunc.f32 %v1546_v48  ;;  %v3503_v39 = vtrunc.f32 %v1547_v44  ;;  %v2710_v17 = vmul.u32 2654435761, %v5067_v55  ;;  %v2323_v6 = vmul.u32 %v4199_v49, %v1675_v42 }
 0x199   : > { %v1484_v29 = vadd.f32 0.5, %v1420_v18  ;;  %v1485_v45 = vadd.f32 0.5, %v1421_v14  ;;  %v5117_v5 = vadd.s32 %v2322_v22, %v6343_v38  ;;  %v2711_v51 = vmul.u32 2654435761, %v1675_v42 }
 0x19a   : > { %v3502_v47 = vcvt.f32.s32 %v3501_v20  ;;  %v3504_v62 = vcvt.f32.s32 %v3503_v39  ;;  %v1486_v25 = vadd.f32 0.5, %v1422_v0  ;;  %v1487_v28 = vadd.f32 0.5, %v1423_v54  ;;  %v1342_v20 = vpop.permute.xlu1 %1341 }
 0x19b   : > { %v1548_v31 = vfloor.f32 %v1484_v29  ;;  %v1549_v46 = vfloor.f32 %v1485_v45  ;;  %v2324_v55 = vmul.u32 %v4199_v49, %v1676_v13  ;;  %v1677_v16 = vadd.s32 %v3500_v2, %v4191_v9  ;;  %v1346_v45 = vpop.permute.xlu0 %1345 }
 0x19c   : > { %1933 = vperm.xlu1 %3713, %v6191_v57   ;;  %1945 = vperm.xlu0 %3714, %v6344_v33   ;;  %v1424_v48 = vmul.f32 %v1326_v15, %v4136_v52  ;;  %v1425_v22 = vmul.f32 %v1330_v60, %v4136_v52  ;;  %v1550_v18 = vfloor.f32 %v1486_v25  ;;  %v1551_v14 = vfloor.f32 %v1487_v28  ;;  %v6346_v57 = vld [vmem:[#allocation56_spill] sm:$0xff] }
 0x19d   : > { %v3505_v44 = vtrunc.f32 %v1548_v31  ;;  %v3507_v42 = vtrunc.f32 %v1549_v46  ;;  %v5126_v0 = vxor.u32 %v2710_v17, %v6343_v38  ;;  %v5129_v54 = vadd.s32 %v2323_v6, %v6346_v57  ;;  %v6348_v31 = vld [vmem:[#allocation59_spill] sm:$0xff]  ;;  %v6350_v38 = vld [vmem:[#allocation93_spill] sm:$0xff] }
 0x19e   : > { %v1678_v39 = vadd.s32 %v3502_v47, %v4191_v9  ;;  %v1488_v29 = vadd.f32 0.5, %v1424_v48  ;;  %v2712_v2 = vmul.u32 2654435761, %v1676_v13  ;;  %v1679_v15 = vadd.s32 %v3504_v62, %v4191_v9 }
 0x19f   : > { %6345 = vst [vmem:[#allocation49_spill] sm:$0xff] %v5126_v0  ;;  %6347 = vst [vmem:[#allocation54_spill] sm:$0xff] %v5129_v54  ;;  %v3506_v33 = vcvt.f32.s32 %v3505_v44  ;;  %v3508_v60 = vcvt.f32.s32 %v3507_v42  ;;  %v5135_v28 = vxor.u32 %v2711_v51, %v6346_v57  ;;  %v3509_v46 = vtrunc.f32 %v1550_v18  ;;  %v6352_v57 = vld [vmem:[#allocation61_spill] sm:$0xff]  ;;  %v6353_v54 = vld [vmem:[#allocation92_spill] sm:$0xff] }
 0x1a0   : > { %1941 = vperm.xlu1 %3713, %v6348_v31   ;;  %v3511_v25 = vtrunc.f32 %v1551_v14  ;;  %v1489_v17 = vadd.f32 0.5, %v1425_v22  ;;  %v5138_v0 = vadd.s32 %v2324_v55, %v6350_v38  ;;  %v2325_v6 = vmul.u32 %v4199_v49, %v1677_v16  ;;  %v1350_v55 = vpop.permute.xlu1 %1349  ;;  %v1354_v14 = vpop.permute.xlu0 %1353 }
 0x1a1   : > { %6349 = vst [vmem:[#allocation86_spill] sm:$0xff] %v5135_v28  ;;  %v2713_v47 = vmul.u32 2654435761, %v1677_v16  ;;  %v1680_v13 = vadd.s32 %v3506_v33, %v4191_v9  ;;  %v2326_v62 = vmul.u32 %v4199_v49, %v1678_v39  ;;  %v3510_v44 = vcvt.f32.s32 %v3509_v46 }
 0x1a2   : > { %v2714_v48 = vmul.u32 2654435761, %v1678_v39  ;;  %v1552_v42 = vfloor.f32 %v1488_v29  ;;  %v5144_v31 = vxor.u32 %v2712_v2, %v6350_v38  ;;  %v2327_v51 = vmul.u32 %v4199_v49, %v1679_v15 }
 0x1a3   : > { %v2715_v18 = vmul.u32 2654435761, %v1679_v15  ;;  %v1681_v22 = vadd.s32 %v3508_v60, %v4191_v9  ;;  %v3512_v16 = vcvt.f32.s32 %v3511_v25  ;;  %v1553_v28 = vfloor.f32 %v1489_v17 }
 0x1a4   : > { %6351 = vst [vmem:[#allocation51_spill] sm:$0xff] %v5144_v31  ;;  %1949 = vperm.xlu1 %3713, %v6352_v57   ;;  %v1426_v33 = vmul.f32 %v1334_v8, %v4136_v52  ;;  %v1427_v39 = vmul.f32 %v1338_v32, %v4136_v52  ;;  %v2328_v29 = vmul.u32 %v4199_v49, %v1680_v13  ;;  %v2716_v46 = vmul.u32 2654435761, %v1680_v13  ;;  %v6356_v31 = vld [vmem:[#allocation57_spill] sm:$0xff]  ;;  %v6359_v8 = vld [vmem:[#allocation58_spill] sm:$0xff] }
 0x1a5   : > { %v1682_v2 = vadd.s32 %v3510_v44, %v4191_v9  ;;  %v3513_v38 = vtrunc.f32 %v1552_v42  ;;  %v5154_v15 = vadd.s32 %v2325_v6, %v6353_v54  ;;  %v5157_v60 = vxor.u32 %v2713_v47, %v6353_v54  ;;  %v6362_v47 = vld [vmem:[#allocation60_spill] sm:$0xff] }
 0x1a6   : > { %v5160_v57 = vadd.s32 %v2326_v62, %v6356_v31  ;;  %v5163_v25 = vxor.u32 %v2714_v48, %v6356_v31  ;;  %v5166_v32 = vadd.s32 %v2327_v51, %v6359_v8  ;;  %v5169_v17 = vxor.u32 %v2715_v18, %v6359_v8  ;;  %v1358_v51 = vpop.permute.xlu1 %1357  ;;  %v1362_v18 = vpop.permute.xlu0 %1361 }
 0x1a7   : > { %6354 = vst [vmem:[#allocation85_spill] sm:$0xff] %v5154_v15  ;;  %6355 = vst [vmem:[#allocation88_spill] sm:$0xff] %v5157_v60  ;;  %v2329_v13 = vmul.u32 %v4199_v49, %v1681_v22  ;;  %v2717_v44 = vmul.u32 2654435761, %v1681_v22  ;;  %v3514_v6 = vcvt.f32.s32 %v3513_v38  ;;  %v3515_v42 = vtrunc.f32 %v1553_v28 }
 0x1a8   : > { %6357 = vst [vmem:[#allocation87_spill] sm:$0xff] %v5160_v57  ;;  %6358 = vst [vmem:[#allocation53_spill] sm:$0xff] %v5163_v25  ;;  %v1490_v15 = vadd.f32 0.5, %v1426_v33  ;;  %v1491_v54 = vadd.f32 0.5, %v1427_v39  ;;  %v5173_v60 = vadd.s32 %v2328_v29, %v6362_v47  ;;  %v5176_v62 = vxor.u32 %v2716_v46, %v6362_v47  ;;  %v6365_v33 = vld [vmem:[#allocation94_spill] sm:$0xff] }
 0x1a9   : > { %6360 = vst [vmem:[#allocation90_spill] sm:$0xff] %v5166_v32  ;;  %6361 = vst [vmem:[#allocation89_spill] sm:$0xff] %v5169_v17  ;;  %v2330_v48 = vmul.u32 %v4199_v49, %v1682_v2  ;;  %v1683_v31 = vadd.s32 %v3512_v16, %v4191_v9  ;;  %v1428_v22 = vmul.f32 %v1342_v20, %v4136_v52  ;;  %v3516_v47 = vcvt.f32.s32 %v3515_v42 }
 0x1aa   : > { %6363 = vst [vmem:[#allocation55_spill] sm:$0xff] %v5173_v60  ;;  %6364 = vst [vmem:[#allocation91_spill] sm:$0xff] %v5176_v62  ;;  %v1554_v8 = vfloor.f32 %v1490_v15  ;;  %v1555_v17 = vfloor.f32 %v1491_v54  ;;  %v1429_v28 = vmul.f32 %v1346_v45, %v4136_v52  ;;  %v5183_v39 = vadd.s32 %v2329_v13, %v6365_v33  ;;  %v6368_v60 = vld [vmem:[#allocation96_spill] sm:$0xff]  ;;  %v1366_v57 = vpop.permute.xlu1 %1365 }
 0x1ab   : > { %v5186_v29 = vxor.u32 %v2717_v44, %v6365_v33  ;;  %v1430_v46 = vmul.f32 %v1350_v55, %v4136_v52  ;;  %v1431_v38 = vmul.f32 %v1354_v14, %v4136_v52  ;;  %v1684_v16 = vadd.s32 %v3514_v6, %v4191_v9  ;;  %v1370_v6 = vpop.permute.xlu0 %1369 }
 0x1ac   : > { %6366 = vst [vmem:[#allocation62_spill] sm:$0xff] %v5183_v39  ;;  %v3517_v32 = vtrunc.f32 %v1554_v8  ;;  %v3519_v15 = vtrunc.f32 %v1555_v17  ;;  %v2718_v54 = vmul.u32 2654435761, %v1682_v2  ;;  %v2331_v20 = vmul.u32 %v4199_v49, %v1683_v31 }
 0x1ad   : > { %6367 = vst [vmem:[#allocation56_spill] sm:$0xff] %v5186_v29  ;;  %v1492_v62 = vadd.f32 0.5, %v1428_v22  ;;  %v1493_v45 = vadd.f32 0.5, %v1429_v28  ;;  %v5193_v13 = vadd.s32 %v2330_v48, %v6368_v60  ;;  %v2719_v39 = vmul.u32 2654435761, %v1683_v31 }
 0x1ae   : > { %v3518_v44 = vcvt.f32.s32 %v3517_v32  ;;  %v3520_v33 = vcvt.f32.s32 %v3519_v15  ;;  %v1494_v25 = vadd.f32 0.5, %v1430_v46  ;;  %v1495_v14 = vadd.f32 0.5, %v1431_v38 }
 0x1af   : > { %6369 = vst [vmem:[#allocation59_spill] sm:$0xff] %v5193_v13  ;;  %v1556_v29 = vfloor.f32 %v1492_v62  ;;  %v1557_v55 = vfloor.f32 %v1493_v45  ;;  %v2332_v42 = vmul.u32 %v4199_v49, %v1684_v16  ;;  %v1685_v2 = vadd.s32 %v3516_v47, %v4191_v9  ;;  %v6370_v62 = vld [vmem:[#allocation95_spill] sm:$0xff] }
 0x1b0   : > { %v1432_v17 = vmul.f32 %v1358_v51, %v4136_v52  ;;  %v1433_v8 = vmul.f32 %v1362_v18, %v4136_v52  ;;  %v1558_v28 = vfloor.f32 %v1494_v25  ;;  %v1559_v31 = vfloor.f32 %v1495_v14  ;;  %v6373_v14 = vld [vmem:[#allocation98_spill] sm:$0xff] }
 0x1b1   : > { %v3521_v22 = vtrunc.f32 %v1556_v29  ;;  %v3523_v48 = vtrunc.f32 %v1557_v55  ;;  %v5200_v32 = vxor.u32 %v2718_v54, %v6368_v60  ;;  %v5203_v46 = vadd.s32 %v2331_v20, %v6370_v62 }
 0x1b2   : > { %v1686_v38 = vadd.s32 %v3518_v44, %v4191_v9  ;;  %v1496_v15 = vadd.f32 0.5, %v1432_v17  ;;  %v2720_v45 = vmul.u32 2654435761, %v1684_v16  ;;  %v1687_v47 = vadd.s32 %v3520_v33, %v4191_v9  ;;  %v1698_v17 = vpop.permute.xlu1 %1697  ;;  %v1702_v16 = vpop.permute.xlu0 %1701 }
 0x1b3   : > { %6371 = vst [vmem:[#allocation93_spill] sm:$0xff] %v5203_v46  ;;  %v3522_v13 = vcvt.f32.s32 %v3521_v22  ;;  %v3524_v51 = vcvt.f32.s32 %v3523_v48  ;;  %v5208_v18 = vxor.u32 %v2719_v39, %v6370_v62  ;;  %v3525_v29 = vtrunc.f32 %v1558_v28 }
 0x1b4   : > { %v3527_v25 = vtrunc.f32 %v1559_v31  ;;  %v1497_v55 = vadd.f32 0.5, %v1433_v8  ;;  %v5211_v60 = vadd.s32 %v2332_v42, %v6373_v14  ;;  %v2333_v54 = vmul.u32 %v4199_v49, %v1685_v2 }
 0x1b5   : > { %6372 = vst [vmem:[#allocation61_spill] sm:$0xff] %v5208_v18  ;;  %v2721_v20 = vmul.u32 2654435761, %v1685_v2  ;;  %v1688_v44 = vadd.s32 %v3522_v13, %v4191_v9  ;;  %v2334_v33 = vmul.u32 %v4199_v49, %v1686_v38  ;;  %v3526_v48 = vcvt.f32.s32 %v3525_v29  ;;  %v6376_v29 = vld [vmem:[#allocation97_spill] sm:$0xff] }
 0x1b6   : > { %6374 = vst [vmem:[#allocation92_spill] sm:$0xff] %v5211_v60  ;;  %v2722_v22 = vmul.u32 2654435761, %v1686_v38  ;;  %v1560_v46 = vfloor.f32 %v1496_v15  ;;  %v5217_v39 = vxor.u32 %v2720_v45, %v6373_v14  ;;  %v2335_v8 = vmul.u32 %v4199_v49, %v1687_v47 }
 0x1b7   : > { %v2723_v28 = vmul.u32 2654435761, %v1687_v47  ;;  %v1689_v42 = vadd.s32 %v3524_v51, %v4191_v9  ;;  %v3528_v31 = vcvt.f32.s32 %v3527_v25  ;;  %v1561_v62 = vfloor.f32 %v1497_v55  ;;  %v6379_v47 = vld [vmem:[#allocation100_spill] sm:$0xff] }
 0x1b8   : > { %6375 = vst [vmem:[#allocation57_spill] sm:$0xff] %v5217_v39  ;;  %v1434_v2 = vmul.f32 %v1366_v57, %v4136_v52  ;;  %v1435_v13 = vmul.f32 %v1370_v6, %v4136_v52  ;;  %v2336_v18 = vmul.u32 %v4199_v49, %v1688_v44  ;;  %v2724_v60 = vmul.u32 2654435761, %v1688_v44  ;;  %v6381_v57 = vld [vmem:[#allocation99_spill] sm:$0xff]  ;;  %v1714_v39 = vpop.permute.xlu0 %1713 }
 0x1b9   : > { %v1690_v38 = vadd.s32 %v3526_v48, %v4191_v9  ;;  %v3529_v15 = vtrunc.f32 %v1560_v46  ;;  %v5226_v45 = vadd.s32 %v2333_v54, %v6376_v29  ;;  %v5229_v14 = vxor.u32 %v2721_v20, %v6376_v29  ;;  %v1706_v46 = vpop.permute.xlu1 %1705 }
 0x1ba   : > { %v5232_v51 = vadd.s32 %v2334_v33, %v6379_v47  ;;  %v5235_v25 = vxor.u32 %v2722_v22, %v6379_v47  ;;  %v5238_v6 = vadd.s32 %v2335_v8, %v6381_v57  ;;  %v2337_v55 = vmul.u32 %v4199_v49, %v1689_v42 }
 0x1bb   : > { %6377 = vst [vmem:[#allocation58_spill] sm:$0xff] %v5226_v45  ;;  %6378 = vst [vmem:[#allocation60_spill] sm:$0xff] %v5229_v14  ;;  %v2725_v44 = vmul.u32 2654435761, %v1689_v42  ;;  %v3530_v48 = vcvt.f32.s32 %v3529_v15  ;;  %v5242_v54 = vxor.u32 %v2723_v28, %v6381_v57  ;;  %v1691_v20 = vadd.s32 %v3528_v31, %v4191_v9  ;;  %v6384_v14 = vld [vmem:[#allocation6_spill] sm:$0xff]  ;;  %v6387_v57 = vld [vmem:[#allocation101_spill] sm:$0xff] }
 0x1bc   : > { %6380 = vst [vmem:[#allocation94_spill] sm:$0xff] %v5235_v25  ;;  %6382 = vst [vmem:[#allocation96_spill] sm:$0xff] %v5238_v6  ;;  %v1498_v29 = vadd.f32 0.5, %v1434_v2  ;;  %v1499_v33 = vadd.f32 0.5, %v1435_v13  ;;  %v5246_v45 = vadd.s32 %v2336_v18, %v6384_v14  ;;  %v5249_v22 = vxor.u32 %v2724_v60, %v6384_v14  ;;  %v6392_v25 = vld [vmem:[#allocation68_spill] sm:$0xff] }
 0x1bd   : > { %6383 = vst [vmem:[#allocation95_spill] sm:$0xff] %v5242_v54  ;;  %v2338_v8 = vmul.u32 %v4199_v49, %v1690_v38  ;;  %v3531_v47 = vtrunc.f32 %v1561_v62  ;;  %v1692_v42 = vadd.s32 %v3530_v48, %v4191_v9  ;;  %v1952_v6 = vmul.f32 %v1698_v17, %v4136_v52 }
 0x1be   : > { %6385 = vst [vmem:[#allocation98_spill] sm:$0xff] %v5246_v45  ;;  %6386 = vst [vmem:[#allocation97_spill] sm:$0xff] %v5249_v22  ;;  %v1562_v15 = vfloor.f32 %v1498_v29  ;;  %v1953_v28 = vmul.f32 %v1702_v16, %v4136_v52  ;;  %v5256_v31 = vadd.s32 %v2337_v55, %v6387_v57  ;;  %v5259_v2 = vxor.u32 %v2725_v44, %v6387_v57  ;;  %v1710_v16 = vpop.permute.xlu1 %1709  ;;  %v1722_v45 = vpop.permute.xlu0 %1721 }
 0x1bf   : > { %v1954_v18 = vmul.f32 %v1706_v46, %v4136_v52  ;;  %v1956_v60 = vmul.f32 %v1714_v39, %v4136_v52  ;;  %v2726_v13 = vmul.u32 2654435761, %v1690_v38  ;;  %v2339_v62 = vmul.u32 %v4199_v49, %v1691_v20 }
 0x1c0   : > { %6388 = vst [vmem:[#allocation100_spill] sm:$0xff] %v5256_v31  ;;  %6389 = vst [vmem:[#allocation99_spill] sm:$0xff] %v5259_v2  ;;  %v3533_v14 = vtrunc.f32 %v1562_v15  ;;  %v1563_v48 = vfloor.f32 %v1499_v33  ;;  %v2727_v29 = vmul.u32 2654435761, %v1691_v20  ;;  %v3532_v54 = vcvt.f32.s32 %v3531_v47 }
 0x1c1   : > { %v2016_v17 = vadd.f32 0.5, %v1952_v6  ;;  %v2017_v22 = vadd.f32 0.5, %v1953_v28  ;;  %v5265_v55 = vadd.s32 %v2338_v8, %v4577_v63  ;;  %v2340_v44 = vmul.u32 %v4199_v49, %v1692_v42 }
 0x1c2   : > { %v2728_v57 = vmul.u32 2654435761, %v1692_v42  ;;  %v3534_v46 = vcvt.f32.s32 %v3533_v14  ;;  %v2018_v38 = vadd.f32 0.5, %v1954_v18  ;;  %v2020_v31 = vadd.f32 0.5, %v1956_v60 }
 0x1c3   : > { %6390 = vst [vmem:[#allocation6_spill] sm:$0xff] %v5265_v55  ;;  %v2080_v2 = vfloor.f32 %v2016_v17  ;;  %v2081_v39 = vfloor.f32 %v2017_v22  ;;  %v5271_v20 = vtrunc.f32 %v1563_v48  ;;  %v1955_v6 = vmul.f32 %v1710_v16, %v4136_v52  ;;  %v1718_v17 = vpop.permute.xlu1 %1717  ;;  %v1730_v16 = vpop.permute.xlu0 %1729 }
 0x1c4   : > { %v5269_v15 = vadd.s32 %v3534_v46, %v4191_v9  ;;  %v1958_v33 = vmul.f32 %v1722_v45, %v4136_v52  ;;  %v2082_v28 = vfloor.f32 %v2018_v38  ;;  %v2084_v55 = vfloor.f32 %v2020_v31 }
 0x1c5   : > { %6391 = vst [vmem:[#allocation101_spill] sm:$0xff] %v5271_v20  ;;  %v3537_v47 = vtrunc.f32 %v2080_v2  ;;  %v3539_v8 = vtrunc.f32 %v2081_v39  ;;  %vm2993_vm1 = vcmp.eq.s32.totalorder %v6392_v25, 1  ;;  %v5277_v42 = vxor.u32 %v2726_v13, %v4577_v63 }
 0x1c6   : > { %v5280_v22 = vadd.s32 %v2339_v62, %v4574_v41  ;;  %v2019_v18 = vadd.f32 0.5, %v1955_v6  ;;  %v2022_v60 = vadd.f32 0.5, %v1958_v33  ;;  %v5283_v14 = vxor.u32 %v2727_v29, %v4574_v41 }
 0x1c7   : > { %v5286_v48 = vadd.s32 %v3532_v54, %v4191_v9  ;;  %v3538_v45 = vcvt.f32.s32 %v3537_v47  ;;  %v3540_v2 = vcvt.f32.s32 %v3539_v8  ;;  %v5289_v31 = vadd.s32 %v2340_v44, %v4585_v27  ;;  %v6395_v54 = vld [vmem:[#allocation65_spill] sm:$0xff] }
 0x1c8   : > { %6393 = vst [vmem:[#allocation68_spill] sm:$0xff] %v5283_v14  ;;  %v5292_v63 = vxor.u32 %v2728_v57, %v4585_v27  ;;  %v3541_v13 = vtrunc.f32 %v2082_v28  ;;  %v3545_v62 = vtrunc.f32 %v2084_v55  ;;  %v2083_v44 = vfloor.f32 %v2019_v18  ;;  %v6396_v27 = vld [vmem:[#allocation67_spill] sm:$0xff] }
 0x1c9   : > { %6394 = vst [vmem:[#allocation104_spill] sm:$0xff] %v5286_v48  ;;  %v2212_v46 = vadd.s32 %v3538_v45, %v6395_v54  ;;  %v2213_v39 = vadd.s32 %v3540_v2, %v6395_v54  ;;  %v2086_v33 = vfloor.f32 %v2022_v60  ;;  %v1957_v47 = vmul.f32 %v1718_v17, %v4136_v52  ;;  %v6399_v17 = vld [vmem:[#allocation10_spill] sm:$0xff]  ;;  %v1726_v48 = vpop.permute.xlu1 %1725 }
 0x1ca   : > { %v3542_v38 = vcvt.f32.s32 %v3541_v13  ;;  %v3546_v6 = vcvt.f32.s32 %v3545_v62  ;;  %v1960_v8 = vmul.f32 %v1730_v16, %v4136_v52  ;;  %v6397_v62 = vld [vmem:[#allocation12_spill] sm:$0xff]  ;;  %v3543_v60 = vtrunc.f32 %v2083_v44  ;;  %v6400_v44 = vld [vmem:[#allocation9_spill] sm:$0xff] }
 0x1cb   : > { %v2412_v57 = vmul.u32 %v6396_v27, %v2212_v46  ;;  %v2796_v55 = vmul.u32 805459861, %v2212_v46  ;;  %v3549_v29 = vtrunc.f32 %v2086_v33  ;;  %v6398_v46 = vld [vmem:[#allocation5_spill] sm:$0xff] }
 0x1cc   : > { %v2413_v28 = vmul.u32 %v6396_v27, %v2213_v39  ;;  %v2797_v41 = vmul.u32 805459861, %v2213_v39  ;;  %v2214_v45 = vadd.s32 %v3542_v38, %v6395_v54  ;;  %v2216_v2 = vadd.s32 %v3546_v6, %v6395_v54 }
 0x1cd   : > { %v2476_v13 = vadd.s32 %v2412_v57, %v4600_v1  ;;  %v2860_v18 = vxor.u32 %v2796_v55, %v6397_v62  ;;  %v6401_v62 = vld [vmem:[#allocation14_spill] sm:$0xff] }
 0x1ce   : > { %v2477_v20 = vadd.s32 %v2413_v28, %v6398_v46  ;;  %v2861_v9 = vxor.u32 %v2797_v41, %v6399_v17  ;;  %v2414_v16 = vmul.u32 %v6396_v27, %v2214_v45  ;;  %v2798_v49 = vmul.u32 805459861, %v2214_v45  ;;  %v6402_v46 = vld [vmem:[#allocation13_spill] sm:$0xff] }
 0x1cf   : > { %vm2540_vm2 = vcmp.lt.s32.totalorder %v2476_v13, 524287  ;;  %v2924_v39 = vand.u32 524287, %v2860_v18  ;;  %v2416_v38 = vmul.u32 %v6396_v27, %v2216_v2  ;;  %v2800_v6 = vmul.u32 805459861, %v2216_v2  ;;  %v6403_v45 = vld [vmem:[#allocation69_spill] sm:$0xff] }
 0x1d0   : > { %v2541_v1 = vsel %vm2540_vm2, %v2476_v13, 524287  ;;  %vm2542_vm3 = vcmp.lt.s32.totalorder %v2477_v20, 524287  ;;  %v2925_v57 = vand.u32 524287, %v2861_v9  ;;  %v2478_v33 = vadd.s32 %v2414_v16, %v6400_v44 }
 0x1d1   : > { %v2994_v55 = vsel %vm2993_vm1, %v2541_v1, %v2924_v39  ;;  %v2543_v28 = vsel %vm2542_vm3, %v2477_v20, 524287  ;;  %v2862_v41 = vxor.u32 %v2798_v49, %v6401_v62  ;;  %v2480_v17 = vadd.s32 %v2416_v38, %v6402_v46  ;;  %v1738_v1 = vpop.permute.xlu0 %1737 }
 0x1d2   : > { %v3062_v14 = vadd.s32 %v6403_v45, %v2994_v55  ;;  %v2995_v18 = vsel %vm2993_vm1, %v2543_v28, %v2925_v57  ;;  %vm2544_vm4 = vcmp.lt.s32.totalorder %v2478_v33, 524287  ;;  %v2864_v2 = vxor.u32 %v2800_v6, %v4653_v53 }
 0x1d3   : > { %v3063_v9 = vadd.s32 %v6403_v45, %v2995_v18  ;;  %v2545_v13 = vsel %vm2544_vm4, %v2478_v33, 524287  ;;  %v2926_v16 = vand.u32 524287, %v2862_v41  ;;  %vm2548_vm5 = vcmp.lt.s32.totalorder %v2480_v17, 524287  ;;  %v1734_v33 = vpop.permute.xlu1 %1733 }
 0x1d4   : > { %3126 = vst [vmem:[%s5324_s30] sm:$0xff] %v3062_v14  ;;  %v2549_v49 = vsel %vm2548_vm5, %v2480_v17, 524287  ;;  %v2928_v20 = vand.u32 524287, %v2864_v2  ;;  %v3544_v39 = vcvt.f32.s32 %v3543_v60  ;;  %v3550_v38 = vcvt.f32.s32 %v3549_v29 }
 0x1d5   : > { %3127 = vst [vmem:[%s5324_s30 + $0x8] sm:$0xff] %v3063_v9  ;;  %v2996_v53 = vsel %vm2993_vm1, %v2545_v13, %v2926_v16  ;;  %v2021_v6 = vadd.f32 0.5, %v1957_v47  ;;  %v2024_v57 = vadd.f32 0.5, %v1960_v8  ;;  %v1959_v44 = vmul.f32 %v1726_v48, %v4136_v52  ;;  %v6404_v16 = vld [vmem:[#allocation11_spill] sm:$0xff] }
 0x1d6   : > { %v3064_v55 = vadd.s32 %v6403_v45, %v2996_v53  ;;  %v2998_v14 = vsel %vm2993_vm1, %v2549_v49, %v2928_v20  ;;  %v2215_v60 = vadd.s32 %v3544_v39, %v6395_v54  ;;  %v2218_v29 = vadd.s32 %v3550_v38, %v6395_v54  ;;  %v6405_v20 = vld [vmem:[#allocation16_spill] sm:$0xff] }
 0x1d7   : > { %v3066_v28 = vadd.s32 %v6403_v45, %v2998_v14  ;;  %v2085_v62 = vfloor.f32 %v2021_v6  ;;  %v2088_v41 = vfloor.f32 %v2024_v57  ;;  %v2023_v46 = vadd.f32 0.5, %v1959_v44  ;;  %v1746_v6 = vpop.permute.xlu0 %1745 }
 0x1d8   : > { %3128 = vst [vmem:[%s5324_s30 + $0x10] sm:$0xff] %v3064_v55  ;;  %v2415_v47 = vmul.u32 %v6396_v27, %v2215_v60  ;;  %v2799_v8 = vmul.u32 805459861, %v2215_v60  ;;  %v1962_v48 = vmul.f32 %v1738_v1, %v4136_v52  ;;  %v1961_v17 = vmul.f32 %v1734_v33, %v4136_v52 }
 0x1d9   : > { %3130 = vst [vmem:[%s5324_s30 + $0x20] sm:$0xff] %v3066_v28  ;;  %v2418_v18 = vmul.u32 %v6396_v27, %v2218_v29  ;;  %v2802_v2 = vmul.u32 805459861, %v2218_v29  ;;  %v3547_v9 = vtrunc.f32 %v2085_v62  ;;  %v3553_v13 = vtrunc.f32 %v2088_v41 }
 0x1da   : > { %v2479_v49 = vadd.s32 %v2415_v47, %v6404_v16  ;;  %v2863_v39 = vxor.u32 %v2799_v8, %v6405_v20  ;;  %v2087_v38 = vfloor.f32 %v2023_v46  ;;  %v2026_v53 = vadd.f32 0.5, %v1962_v48 }
 0x1db   : > { %v2482_v57 = vadd.s32 %v2418_v18, %v4670_v34  ;;  %v2866_v44 = vxor.u32 %v2802_v2, %v4673_v12  ;;  %v3548_v1 = vcvt.f32.s32 %v3547_v9  ;;  %v3554_v55 = vcvt.f32.s32 %v3553_v13  ;;  %v1754_v20 = vpop.permute.xlu0 %1753 }
 0x1dc   : > { %vm2546_vm6 = vcmp.lt.s32.totalorder %v2479_v49, 524287  ;;  %v2927_v33 = vand.u32 524287, %v2863_v39  ;;  %v3551_v14 = vtrunc.f32 %v2087_v38  ;;  %v2090_v60 = vfloor.f32 %v2026_v53  ;;  %v6406_v39 = vld [vmem:[#allocation18_spill] sm:$0xff] }
 0x1dd   : > { %v2547_v29 = vsel %vm2546_vm6, %v2479_v49, 524287  ;;  %vm2552_vm7 = vcmp.lt.s32.totalorder %v2482_v57, 524287  ;;  %v2930_v28 = vand.u32 524287, %v2866_v44  ;;  %v2217_v62 = vadd.s32 %v3548_v1, %v6395_v54  ;;  %v1742_v49 = vpop.permute.xlu1 %1741 }
 0x1de   : > { %v2997_v41 = vsel %vm2993_vm1, %v2547_v29, %v2927_v33  ;;  %v2553_v46 = vsel %vm2552_vm7, %v2482_v57, 524287  ;;  %v2220_v34 = vadd.s32 %v3554_v55, %v6395_v54  ;;  %v3552_v47 = vcvt.f32.s32 %v3551_v14 }
 0x1df   : > { %v3065_v12 = vadd.s32 %v6403_v45, %v2997_v41  ;;  %v3000_v8 = vsel %vm2993_vm1, %v2553_v46, %v2930_v28  ;;  %v2417_v48 = vmul.u32 %v6396_v27, %v2217_v62  ;;  %v2801_v18 = vmul.u32 805459861, %v2217_v62 }
 0x1e0   : > { %v3068_v2 = vadd.s32 %v6403_v45, %v3000_v8  ;;  %v2420_v9 = vmul.u32 %v6396_v27, %v2220_v34  ;;  %v2804_v13 = vmul.u32 805459861, %v2220_v34  ;;  %v2219_v16 = vadd.s32 %v3552_v47, %v6395_v54  ;;  %v6407_v34 = vld [vmem:[#allocation15_spill] sm:$0xff] }
 0x1e1   : > { %3129 = vst [vmem:[%s5324_s30 + $0x18] sm:$0xff] %v3065_v12  ;;  %v2481_v38 = vadd.s32 %v2417_v48, %v6406_v39  ;;  %v2865_v53 = vxor.u32 %v2801_v18, %v4666_v26  ;;  %v3557_v57 = vtrunc.f32 %v2090_v60  ;;  %v2025_v44 = vadd.f32 0.5, %v1961_v17  ;;  %v1750_v18 = vpop.permute.xlu1 %1749 }
 0x1e2   : > { %3132 = vst [vmem:[%s5324_s30 + $0x30] sm:$0xff] %v3068_v2  ;;  %v2484_v1 = vadd.s32 %v2420_v9, %v4682_v30  ;;  %v2868_v55 = vxor.u32 %v2804_v13, %v4685_v37  ;;  %v2419_v33 = vmul.u32 %v6396_v27, %v2219_v16  ;;  %v2803_v14 = vmul.u32 805459861, %v2219_v16  ;;  %v6408_v30 = vld [vmem:[#allocation20_spill] sm:$0xff]  ;;  %v1762_v2 = vpop.permute.xlu0 %1761 }
 0x1e3   : > { %vm2550_vm8 = vcmp.lt.s32.totalorder %v2481_v38, 524287  ;;  %v2929_v29 = vand.u32 524287, %v2865_v53  ;;  %v3558_v28 = vcvt.f32.s32 %v3557_v57  ;;  %v2089_v62 = vfloor.f32 %v2025_v44 }
 0x1e4   : > { %v2551_v41 = vsel %vm2550_vm8, %v2481_v38, 524287  ;;  %vm2556_vm9 = vcmp.lt.s32.totalorder %v2484_v1, 524287  ;;  %v2932_v46 = vand.u32 524287, %v2868_v55  ;;  %v2483_v26 = vadd.s32 %v2419_v33, %v6407_v34 }
 0x1e5   : > { %v2999_v17 = vsel %vm2993_vm1, %v2551_v41, %v2929_v29  ;;  %v2557_v60 = vsel %vm2556_vm9, %v2484_v1, 524287  ;;  %v2867_v47 = vxor.u32 %v2803_v14, %v6408_v30  ;;  %v2222_v37 = vadd.s32 %v3558_v28, %v6395_v54 }
 0x1e6   : > { %v3067_v12 = vadd.s32 %v6403_v45, %v2999_v17  ;;  %v3002_v8 = vsel %vm2993_vm1, %v2557_v60, %v2932_v46  ;;  %vm2554_vm10 = vcmp.lt.s32.totalorder %v2483_v26, 524287  ;;  %v3555_v48 = vtrunc.f32 %v2089_v62  ;;  %v1770_v60 = vpop.permute.xlu0 %1769 }
 0x1e7   : > { %v3070_v9 = vadd.s32 %v6403_v45, %v3002_v8  ;;  %v2555_v13 = vsel %vm2554_vm10, %v2483_v26, 524287  ;;  %v2931_v16 = vand.u32 524287, %v2867_v47  ;;  %v2422_v39 = vmul.u32 %v6396_v27, %v2222_v37  ;;  %v6409_v8 = vld [vmem:[#allocation17_spill] sm:$0xff] }
 0x1e8   : > { %3131 = vst [vmem:[%s5324_s30 + $0x28] sm:$0xff] %v3067_v12  ;;  %v2806_v38 = vmul.u32 805459861, %v2222_v37  ;;  %v3556_v53 = vcvt.f32.s32 %v3555_v48  ;;  %v1964_v57 = vmul.f32 %v1746_v6, %v4136_v52  ;;  %v1963_v44 = vmul.f32 %v1742_v49, %v4136_v52 }
 0x1e9   : > { %3134 = vst [vmem:[%s5324_s30 + $0x40] sm:$0xff] %v3070_v9  ;;  %v3001_v1 = vsel %vm2993_vm1, %v2555_v13, %v2931_v16  ;;  %v2486_v55 = vadd.s32 %v2422_v39, %v4707_v7  ;;  %v1966_v33 = vmul.f32 %v1754_v20, %v4136_v52  ;;  %v1965_v14 = vmul.f32 %v1750_v18, %v4136_v52  ;;  %v1758_v20 = vpop.permute.xlu1 %1757  ;;  %v6410_v18 = vld [vmem:[#allocation22_spill] sm:$0xff] }
 0x1ea   : > { %v3069_v29 = vadd.s32 %v6403_v45, %v3001_v1  ;;  %v2870_v28 = vxor.u32 %v2806_v38, %v4710_v35  ;;  %v2221_v62 = vadd.s32 %v3556_v53, %v6395_v54  ;;  %v2028_v41 = vadd.f32 0.5, %v1964_v57 }
 0x1eb   : > { %vm2560_vm11 = vcmp.lt.s32.totalorder %v2486_v55, 524287  ;;  %v2027_v6 = vadd.f32 0.5, %v1963_v44  ;;  %v2030_v49 = vadd.f32 0.5, %v1966_v33  ;;  %v2029_v46 = vadd.f32 0.5, %v1965_v14 }
 0x1ec   : > { %3133 = vst [vmem:[%s5324_s30 + $0x38] sm:$0xff] %v3069_v29  ;;  %v2561_v34 = vsel %vm2560_vm11, %v2486_v55, 524287  ;;  %v2934_v26 = vand.u32 524287, %v2870_v28  ;;  %v2421_v7 = vmul.u32 %v6396_v27, %v2221_v62  ;;  %v2805_v17 = vmul.u32 805459861, %v2221_v62 }
 0x1ed   : > { %v2092_v30 = vfloor.f32 %v2028_v41  ;;  %v2091_v47 = vfloor.f32 %v2027_v6  ;;  %v2094_v37 = vfloor.f32 %v2030_v49  ;;  %v2093_v35 = vfloor.f32 %v2029_v46  ;;  %v1766_v6 = vpop.permute.xlu1 %1765  ;;  %v1778_v49 = vpop.permute.xlu0 %1777 }
 0x1ee   : > { %v3004_v12 = vsel %vm2993_vm1, %v2561_v34, %v2934_v26  ;;  %v2485_v48 = vadd.s32 %v2421_v7, %v6409_v8  ;;  %v2869_v9 = vxor.u32 %v2805_v17, %v6410_v18  ;;  %v1968_v13 = vmul.f32 %v1762_v2, %v4136_v52 }
 0x1ef   : > { %v3072_v16 = vadd.s32 %v6403_v45, %v3004_v12  ;;  %v3561_v39 = vtrunc.f32 %v2092_v30  ;;  %v3559_v38 = vtrunc.f32 %v2091_v47  ;;  %v3565_v53 = vtrunc.f32 %v2094_v37 }
 0x1f0   : > { %vm2558_vm12 = vcmp.lt.s32.totalorder %v2485_v48, 524287  ;;  %v2933_v57 = vand.u32 524287, %v2869_v9  ;;  %v3563_v44 = vtrunc.f32 %v2093_v35  ;;  %v2032_v1 = vadd.f32 0.5, %v1968_v13 }
 0x1f1   : > { %3136 = vst [vmem:[%s5324_s30 + $0x50] sm:$0xff] %v3072_v16  ;;  %v2559_v55 = vsel %vm2558_vm12, %v2485_v48, 524287  ;;  %v3562_v33 = vcvt.f32.s32 %v3561_v39  ;;  %v3560_v14 = vcvt.f32.s32 %v3559_v38  ;;  %v3566_v29 = vcvt.f32.s32 %v3565_v53  ;;  %v6411_v53 = vld [vmem:[#allocation19_spill] sm:$0xff] }
 0x1f2   : > { %v3003_v28 = vsel %vm2993_vm1, %v2559_v55, %v2933_v57  ;;  %v3564_v62 = vcvt.f32.s32 %v3563_v44  ;;  %v2096_v2 = vfloor.f32 %v2032_v1  ;;  %v1967_v41 = vmul.f32 %v1758_v20, %v4136_v52  ;;  %v6412_v44 = vld [vmem:[#allocation24_spill] sm:$0xff] }
 0x1f3   : > { %v3071_v46 = vadd.s32 %v6403_v45, %v3003_v28  ;;  %v2224_v34 = vadd.s32 %v3562_v33, %v6395_v54  ;;  %v2223_v26 = vadd.s32 %v3560_v14, %v6395_v54  ;;  %v2226_v7 = vadd.s32 %v3566_v29, %v6395_v54 }
 0x1f4   : > { %v2225_v17 = vadd.s32 %v3564_v62, %v6395_v54  ;;  %v3569_v30 = vtrunc.f32 %v2096_v2  ;;  %v2031_v47 = vadd.f32 0.5, %v1967_v41  ;;  %v1970_v37 = vmul.f32 %v1770_v60, %v4136_v52 }
 0x1f5   : > { %3135 = vst [vmem:[%s5324_s30 + $0x48] sm:$0xff] %v3071_v46  ;;  %v2424_v35 = vmul.u32 %v6396_v27, %v2224_v34  ;;  %v2808_v20 = vmul.u32 805459861, %v2224_v34  ;;  %v1969_v12 = vmul.f32 %v1766_v6, %v4136_v52  ;;  %v1972_v8 = vmul.f32 %v1778_v49, %v4136_v52 }
 0x1f6   : > { %v2423_v48 = vmul.u32 %v6396_v27, %v2223_v26  ;;  %v2807_v18 = vmul.u32 805459861, %v2223_v26  ;;  %v3570_v9 = vcvt.f32.s32 %v3569_v30  ;;  %v2095_v13 = vfloor.f32 %v2031_v47 }
 0x1f7   : > { %v2488_v16 = vadd.s32 %v2424_v35, %v4739_v40  ;;  %v2872_v39 = vxor.u32 %v2808_v20, %v4742_v11  ;;  %v2426_v38 = vmul.u32 %v6396_v27, %v2226_v7  ;;  %v2810_v60 = vmul.u32 805459861, %v2226_v7 }
 0x1f8   : > { %v2487_v57 = vadd.s32 %v2423_v48, %v6411_v53  ;;  %v2871_v1 = vxor.u32 %v2807_v18, %v6412_v44  ;;  %v2425_v55 = vmul.u32 %v6396_v27, %v2225_v17  ;;  %v2809_v33 = vmul.u32 805459861, %v2225_v17  ;;  %v1786_v53 = vpop.permute.xlu0 %1785 }
 0x1f9   : > { %vm2564_vm13 = vcmp.lt.s32.totalorder %v2488_v16, 524287  ;;  %v2936_v14 = vand.u32 524287, %v2872_v39  ;;  %v2490_v29 = vadd.s32 %v2426_v38, %v4761_v43  ;;  %v2874_v28 = vxor.u32 %v2810_v60, %v4764_v36  ;;  %v1774_v36 = vpop.permute.xlu1 %1773 }
 0x1fa   : > { %v2565_v62 = vsel %vm2564_vm13, %v2488_v16, 524287  ;;  %vm2562_vm14 = vcmp.lt.s32.totalorder %v2487_v57, 524287  ;;  %v2935_v40 = vand.u32 524287, %v2871_v1  ;;  %v2489_v11 = vadd.s32 %v2425_v55, %v4748_v59  ;;  %v6414_v1 = vld [vmem:[#allocation102_spill] sm:$0xff] }
 0x1fb   : > { %v3006_v2 = vsel %vm2993_vm1, %v2565_v62, %v2936_v14  ;;  %v2563_v41 = vsel %vm2562_vm14, %v2487_v57, 524287  ;;  %vm2568_vm15 = vcmp.lt.s32.totalorder %v2490_v29, 524287  ;;  %v2938_v6 = vand.u32 524287, %v2874_v28 }
 0x1fc   : > { %v3074_v49 = vadd.s32 %v6403_v45, %v3006_v2  ;;  %v3005_v43 = vsel %vm2993_vm1, %v2563_v41, %v2935_v40  ;;  %v2569_v46 = vsel %vm2568_vm15, %v2490_v29, 524287  ;;  %vm2566_vm0 = vcmp.lt.s32.totalorder %v2489_v11, 524287 }
 0x1fd   : > { %v3073_v34 = vadd.s32 %v6403_v45, %v3005_v43  ;;  %v3008_v59 = vsel %vm2993_vm1, %v2569_v46, %v2938_v6  ;;  %v2567_v26 = vsel %vm2566_vm0, %v2489_v11, 524287  ;;  %v2873_v7 = vxor.u32 %v2809_v33, %v4758_v56  ;;  %v1782_v40 = vpop.permute.xlu1 %1781 }
 0x1fe   : > { %3138 = vst [vmem:[%s5324_s30 + $0x60] sm:$0xff] %v3074_v49  ;;  %v3076_v17 = vadd.s32 %v6403_v45, %v3008_v59  ;;  %v2228_v30 = vadd.s32 %v3570_v9, %v6395_v54  ;;  %v3567_v47 = vtrunc.f32 %v2095_v13  ;;  %v2034_v35 = vadd.f32 0.5, %v1970_v37 }
 0x1ff   : > { %3137 = vst [vmem:[%s5324_s30 + $0x58] sm:$0xff] %v3073_v34  ;;  %v2937_v20 = vand.u32 524287, %v2873_v7  ;;  %v2033_v48 = vadd.f32 0.5, %v1969_v12  ;;  %v2036_v18 = vadd.f32 0.5, %v1972_v8  ;;  %v1971_v16 = vmul.f32 %v1774_v36, %v4136_v52  ;;  %v6413_v12 = vld [vmem:[#allocation25_spill] sm:$0xff] }
 0x200   : > { %3140 = vst [vmem:[%s5324_s30 + $0x70] sm:$0xff] %v3076_v17  ;;  %v2428_v39 = vmul.u32 %v6396_v27, %v2228_v30  ;;  %v2812_v38 = vmul.u32 805459861, %v2228_v30  ;;  %v3568_v60 = vcvt.f32.s32 %v3567_v47  ;;  %v2098_v56 = vfloor.f32 %v2034_v35  ;;  %v6415_v34 = vld [vmem:[#allocation21_spill] sm:$0xff]  ;;  %v1794_v30 = vpop.permute.xlu0 %1793 }
 0x201   : > { %v3007_v57 = vsel %vm2993_vm1, %v2567_v26, %v2937_v20  ;;  %v2097_v9 = vfloor.f32 %v2033_v48  ;;  %v2100_v13 = vfloor.f32 %v2036_v18  ;;  %v2035_v37 = vadd.f32 0.5, %v1971_v16  ;;  %v6416_v26 = vld [vmem:[#allocation23_spill] sm:$0xff] }
 0x202   : > { %v3075_v44 = vadd.s32 %v6403_v45, %v3007_v57  ;;  %v2492_v8 = vadd.s32 %v2428_v39, %v6413_v12  ;;  %v2876_v55 = vxor.u32 %v2812_v38, %v6414_v1  ;;  %v2227_v33 = vadd.s32 %v3568_v60, %v6395_v54 }
 0x203   : > { %v3573_v14 = vtrunc.f32 %v2098_v56  ;;  %v3571_v29 = vtrunc.f32 %v2097_v9  ;;  %v3577_v28 = vtrunc.f32 %v2100_v13  ;;  %v2099_v62 = vfloor.f32 %v2035_v37  ;;  %v1790_v9 = vpop.permute.xlu1 %1789 }
 0x204   : > { %3139 = vst [vmem:[%s5324_s30 + $0x68] sm:$0xff] %v3075_v44  ;;  %vm2572_vm2 = vcmp.lt.s32.totalorder %v2492_v8, 524287  ;;  %v2940_v11 = vand.u32 524287, %v2876_v55  ;;  %v2427_v2 = vmul.u32 %v6396_v27, %v2227_v33  ;;  %v2811_v41 = vmul.u32 805459861, %v2227_v33  ;;  %v6418_v55 = vld [vmem:[#allocation30_spill] sm:$0xff] }
 0x205   : > { %v2573_v6 = vsel %vm2572_vm2, %v2492_v8, 524287  ;;  %v3574_v49 = vcvt.f32.s32 %v3573_v14  ;;  %v3572_v43 = vcvt.f32.s32 %v3571_v29  ;;  %v3578_v46 = vcvt.f32.s32 %v3577_v28  ;;  %v6419_v29 = vld [vmem:[#allocation28_spill] sm:$0xff] }
 0x206   : > { %v3010_v36 = vsel %vm2993_vm1, %v2573_v6, %v2940_v11  ;;  %v2491_v59 = vadd.s32 %v2427_v2, %v6415_v34  ;;  %v2875_v7 = vxor.u32 %v2811_v41, %v6416_v26  ;;  %v3575_v17 = vtrunc.f32 %v2099_v62  ;;  %v6420_v62 = vld [vmem:[#allocation103_spill] sm:$0xff]  ;;  %v1802_v41 = vpop.permute.xlu0 %1801 }
 0x207   : > { %v3078_v47 = vadd.s32 %v6403_v45, %v3010_v36  ;;  %v2230_v35 = vadd.s32 %v3574_v49, %v6395_v54  ;;  %v2229_v20 = vadd.s32 %v3572_v43, %v6395_v54  ;;  %v2232_v48 = vadd.s32 %v3578_v46, %v6395_v54  ;;  %v6421_v49 = vld [vmem:[#allocation27_spill] sm:$0xff] }
 0x208   : > { %vm2570_vm3 = vcmp.lt.s32.totalorder %v2491_v59, 524287  ;;  %v2939_v18 = vand.u32 524287, %v2875_v7  ;;  %v3576_v16 = vcvt.f32.s32 %v3575_v17  ;;  %v1974_v39 = vmul.f32 %v1786_v53, %v4136_v52  ;;  %v6417_v53 = vld [vmem:[#allocation26_spill] sm:$0xff] }
 0x209   : > { %3142 = vst [vmem:[%s5324_s30 + $0x80] sm:$0xff] %v3078_v47  ;;  %v2571_v38 = vsel %vm2570_vm3, %v2491_v59, 524287  ;;  %v2430_v60 = vmul.u32 %v6396_v27, %v2230_v35  ;;  %v2814_v56 = vmul.u32 805459861, %v2230_v35  ;;  %v1973_v57 = vmul.f32 %v1782_v40, %v4136_v52  ;;  %v6422_v59 = vld [vmem:[#allocation32_spill] sm:$0xff]  ;;  %v6423_v47 = vld [vmem:[#allocation71_spill] sm:$0xff] }
 0x20a   : > { %v3009_v13 = vsel %vm2993_vm1, %v2571_v38, %v2939_v18  ;;  %v2429_v37 = vmul.u32 %v6396_v27, %v2229_v20  ;;  %v2813_v44 = vmul.u32 805459861, %v2229_v20  ;;  %v2231_v12 = vadd.s32 %v3576_v16, %v6395_v54  ;;  %v1798_v20 = vpop.permute.xlu1 %1797 }
 0x20b   : > { %v3077_v8 = vadd.s32 %v6403_v45, %v3009_v13  ;;  %v2494_v1 = vadd.s32 %v2430_v60, %v6417_v53  ;;  %v2878_v33 = vxor.u32 %v2814_v56, %v6418_v55  ;;  %v2432_v14 = vmul.u32 %v6396_v27, %v2232_v48  ;;  %v6424_v56 = vld [vmem:[#allocation70_spill] sm:$0xff] }
 0x20c   : > { %v2493_v28 = vadd.s32 %v2429_v37, %v6419_v29  ;;  %v2877_v40 = vxor.u32 %v2813_v44, %v6420_v62  ;;  %v2816_v11 = vmul.u32 805459861, %v2232_v48  ;;  %v2431_v2 = vmul.u32 %v6396_v27, %v2231_v12 }
 0x20d   : > { %3141 = vst [vmem:[%s5324_s30 + $0x78] sm:$0xff] %v3077_v8  ;;  %vm2576_vm4 = vcmp.lt.s32.totalorder %v2494_v1, 524287  ;;  %v2942_v6 = vand.u32 524287, %v2878_v33  ;;  %v2496_v43 = vadd.s32 %v2432_v14, %v6421_v49  ;;  %v2815_v46 = vmul.u32 805459861, %v2231_v12 }
 0x20e   : > { %v2577_v36 = vsel %vm2576_vm4, %v2494_v1, 524287  ;;  %vm2574_vm5 = vcmp.lt.s32.totalorder %v2493_v28, 524287  ;;  %v2941_v34 = vand.u32 524287, %v2877_v40  ;;  %v2880_v26 = vxor.u32 %v2816_v11, %v6422_v59  ;;  %v1810_v1 = vpop.permute.xlu0 %1809 }
 0x20f   : > { %v3012_v7 = vsel %vm2993_vm1, %v2577_v36, %v2942_v6  ;;  %v2575_v17 = vsel %vm2574_vm5, %v2493_v28, 524287  ;;  %vm2580_vm6 = vcmp.lt.s32.totalorder %v2496_v43, 524287  ;;  %v2495_v35 = vadd.s32 %v2431_v2, %v6423_v47  ;;  %v1806_v6 = vpop.permute.xlu1 %1805 }
 0x210   : > { %v3080_v48 = vadd.s32 %v6403_v45, %v3012_v7  ;;  %v3011_v18 = vsel %vm2993_vm1, %v2575_v17, %v2941_v34  ;;  %v2581_v16 = vsel %vm2580_vm6, %v2496_v43, 524287  ;;  %v2944_v38 = vand.u32 524287, %v2880_v26 }
 0x211   : > { %v3079_v60 = vadd.s32 %v6403_v45, %v3011_v18  ;;  %vm2578_vm7 = vcmp.lt.s32.totalorder %v2495_v35, 524287  ;;  %v2879_v13 = vxor.u32 %v2815_v46, %v6424_v56  ;;  %v2038_v37 = vadd.f32 0.5, %v1974_v39 }
 0x212   : > { %3144 = vst [vmem:[%s5324_s30 + $0x90] sm:$0xff] %v3080_v48  ;;  %v3014_v44 = vsel %vm2993_vm1, %v2581_v16, %v2944_v38  ;;  %v2579_v12 = vsel %vm2578_vm7, %v2495_v35, 524287  ;;  %v2037_v8 = vadd.f32 0.5, %v1973_v57  ;;  %v1976_v53 = vmul.f32 %v1794_v30, %v4136_v52 }
 0x213   : > { %3143 = vst [vmem:[%s5324_s30 + $0x88] sm:$0xff] %v3079_v60  ;;  %v3082_v55 = vadd.s32 %v6403_v45, %v3014_v44  ;;  %v2943_v33 = vand.u32 524287, %v2879_v13  ;;  %v2102_v14 = vfloor.f32 %v2038_v37  ;;  %v1975_v29 = vmul.f32 %v1790_v9, %v4136_v52 }
 0x214   : > { %v2101_v28 = vfloor.f32 %v2037_v8  ;;  %v2040_v62 = vadd.f32 0.5, %v1976_v53  ;;  %v1978_v39 = vmul.f32 %v1802_v41, %v4136_v52  ;;  %v1977_v40 = vmul.f32 %v1798_v20, %v4136_v52 }
 0x215   : > { %3146 = vst [vmem:[%s5324_s30 + $0xa0] sm:$0xff] %v3082_v55  ;;  %v3013_v57 = vsel %vm2993_vm1, %v2579_v12, %v2943_v33  ;;  %v3581_v30 = vtrunc.f32 %v2102_v14  ;;  %v2039_v11 = vadd.f32 0.5, %v1975_v29  ;;  %v1980_v2 = vmul.f32 %v1810_v1, %v4136_v52 }
 0x216   : > { %v3081_v49 = vadd.s32 %v6403_v45, %v3013_v57  ;;  %v3579_v43 = vtrunc.f32 %v2101_v28  ;;  %v2104_v9 = vfloor.f32 %v2040_v62  ;;  %v2042_v46 = vadd.f32 0.5, %v1978_v39  ;;  %v6425_v62 = vld [vmem:[#allocation29_spill] sm:$0xff] }
 0x217   : > { %v3582_v36 = vcvt.f32.s32 %v3581_v30  ;;  %v2103_v34 = vfloor.f32 %v2039_v11  ;;  %v2041_v41 = vadd.f32 0.5, %v1977_v40  ;;  %v2044_v59 = vadd.f32 0.5, %v1980_v2  ;;  %v6426_v40 = vld [vmem:[#allocation34_spill] sm:$0xff] }
 0x218   : > { %3145 = vst [vmem:[%s5324_s30 + $0x98] sm:$0xff] %v3081_v49  ;;  %v3580_v26 = vcvt.f32.s32 %v3579_v43  ;;  %v3585_v7 = vtrunc.f32 %v2104_v9  ;;  %v2106_v17 = vfloor.f32 %v2042_v46  ;;  %v1979_v47 = vmul.f32 %v1806_v6, %v4136_v52 }
 0x219   : > { %v2234_v35 = vadd.s32 %v3582_v36, %v6395_v54  ;;  %v3583_v20 = vtrunc.f32 %v2103_v34  ;;  %v2105_v48 = vfloor.f32 %v2041_v41  ;;  %v2108_v18 = vfloor.f32 %v2044_v59  ;;  %v6428_v34 = vld [vmem:[#allocation72_spill] sm:$0xff]  ;;  %v6429_v59 = vld [vmem:[#allocation73_spill] sm:$0xff] }
 0x21a   : > { %v2233_v16 = vadd.s32 %v3580_v26, %v6395_v54  ;;  %v3586_v38 = vcvt.f32.s32 %v3585_v7  ;;  %v3589_v60 = vtrunc.f32 %v2106_v17  ;;  %v2043_v56 = vadd.f32 0.5, %v1979_v47  ;;  %v6430_v47 = vld [vmem:[#allocation31_spill] sm:$0xff] }
 0x21b   : > { %v2434_v13 = vmul.u32 %v6396_v27, %v2234_v35  ;;  %v2818_v37 = vmul.u32 805459861, %v2234_v35  ;;  %v3584_v44 = vcvt.f32.s32 %v3583_v20  ;;  %v3587_v12 = vtrunc.f32 %v2105_v48  ;;  %v1818_v20 = vpop.permute.xlu0 %1817 }
 0x21c   : > { %v2433_v8 = vmul.u32 %v6396_v27, %v2233_v16  ;;  %v2817_v53 = vmul.u32 805459861, %v2233_v16  ;;  %v2236_v1 = vadd.s32 %v3586_v38, %v6395_v54  ;;  %v3590_v55 = vcvt.f32.s32 %v3589_v60 }
 0x21d   : > { %v2498_v33 = vadd.s32 %v2434_v13, %v4869_v50  ;;  %v2882_v14 = vxor.u32 %v2818_v37, %v4872_v58  ;;  %v2235_v29 = vadd.s32 %v3584_v44, %v6395_v54  ;;  %v3588_v28 = vcvt.f32.s32 %v3587_v12  ;;  %v6427_v58 = vld [vmem:[#allocation36_spill] sm:$0xff] }
 0x21e   : > { %v2497_v39 = vadd.s32 %v2433_v8, %v6425_v62  ;;  %v2881_v57 = vxor.u32 %v2817_v53, %v6426_v40  ;;  %v2436_v30 = vmul.u32 %v6396_v27, %v2236_v1  ;;  %v2820_v11 = vmul.u32 805459861, %v2236_v1  ;;  %v1814_v62 = vpop.permute.xlu1 %1813 }
 0x21f   : > { %vm2584_vm8 = vcmp.lt.s32.totalorder %v2498_v33, 524287  ;;  %v2946_v2 = vand.u32 524287, %v2882_v14  ;;  %v2435_v6 = vmul.u32 %v6396_v27, %v2235_v29  ;;  %v2819_v49 = vmul.u32 805459861, %v2235_v29 }
 0x220   : > { %v2585_v43 = vsel %vm2584_vm8, %v2498_v33, 524287  ;;  %vm2582_vm9 = vcmp.lt.s32.totalorder %v2497_v39, 524287  ;;  %v2945_v50 = vand.u32 524287, %v2881_v57  ;;  %v2500_v9 = vadd.s32 %v2436_v30, %v6427_v58 }
 0x221   : > { %v3016_v46 = vsel %vm2993_vm1, %v2585_v43, %v2946_v2  ;;  %v2583_v36 = vsel %vm2582_vm9, %v2497_v39, 524287  ;;  %v2884_v41 = vxor.u32 %v2820_v11, %v6428_v34  ;;  %v2499_v26 = vadd.s32 %v2435_v6, %v6429_v59  ;;  %v1826_v6 = vpop.permute.xlu0 %1825 }
 0x222   : > { %v3084_v7 = vadd.s32 %v6403_v45, %v3016_v46  ;;  %v3015_v17 = vsel %vm2993_vm1, %v2583_v36, %v2945_v50  ;;  %vm2588_vm10 = vcmp.lt.s32.totalorder %v2500_v9, 524287  ;;  %v2883_v35 = vxor.u32 %v2819_v49, %v6430_v47  ;;  %v6432_v49 = vld [vmem:[#allocation75_spill] sm:$0xff]  ;;  %v6433_v50 = vld [vmem:[#allocation74_spill] sm:$0xff] }
 0x223   : > { %v3083_v48 = vadd.s32 %v6403_v45, %v3015_v17  ;;  %v2589_v16 = vsel %vm2588_vm10, %v2500_v9, 524287  ;;  %v2948_v38 = vand.u32 524287, %v2884_v41  ;;  %vm2586_vm11 = vcmp.lt.s32.totalorder %v2499_v26, 524287 }
 0x224   : > { %3148 = vst [vmem:[%s5324_s30 + $0xb0] sm:$0xff] %v3084_v7  ;;  %v2587_v60 = vsel %vm2586_vm11, %v2499_v26, 524287  ;;  %v2947_v13 = vand.u32 524287, %v2883_v35  ;;  %v2238_v37 = vadd.s32 %v3590_v55, %v6395_v54  ;;  %v2237_v44 = vadd.s32 %v3588_v28, %v6395_v54 }
 0x225   : > { %3147 = vst [vmem:[%s5324_s30 + $0xa8] sm:$0xff] %v3083_v48  ;;  %v3018_v12 = vsel %vm2993_vm1, %v2589_v16, %v2948_v38  ;;  %v3593_v8 = vtrunc.f32 %v2108_v18  ;;  %v2107_v53 = vfloor.f32 %v2043_v56  ;;  %v1982_v1 = vmul.f32 %v1818_v20, %v4136_v52  ;;  %v6431_v56 = vld [vmem:[#allocation77_spill] sm:$0xff] }
 0x226   : > { %v3086_v33 = vadd.s32 %v6403_v45, %v3018_v12  ;;  %v3017_v14 = vsel %vm2993_vm1, %v2587_v60, %v2947_v13  ;;  %v2438_v29 = vmul.u32 %v6396_v27, %v2238_v37  ;;  %v2822_v55 = vmul.u32 805459861, %v2238_v37  ;;  %v1822_v60 = vpop.permute.xlu1 %1821 }
 0x227   : > { %v3085_v28 = vadd.s32 %v6403_v45, %v3017_v14  ;;  %v2437_v39 = vmul.u32 %v6396_v27, %v2237_v44  ;;  %v2821_v40 = vmul.u32 805459861, %v2237_v44  ;;  %v3594_v57 = vcvt.f32.s32 %v3593_v8  ;;  %v1834_v8 = vpop.permute.xlu0 %1833 }
 0x228   : > { %3150 = vst [vmem:[%s5324_s30 + $0xc0] sm:$0xff] %v3086_v33  ;;  %v2502_v18 = vadd.s32 %v2438_v29, %v4914_v61  ;;  %v2886_v30 = vxor.u32 %v2822_v55, %v6431_v56  ;;  %v3591_v11 = vtrunc.f32 %v2107_v53  ;;  %v2046_v2 = vadd.f32 0.5, %v1982_v1 }
 0x229   : > { %3149 = vst [vmem:[%s5324_s30 + $0xb8] sm:$0xff] %v3085_v28  ;;  %v2501_v43 = vadd.s32 %v2437_v39, %v6432_v49  ;;  %v2885_v58 = vxor.u32 %v2821_v40, %v6433_v50  ;;  %v2240_v9 = vadd.s32 %v3594_v57, %v6395_v54  ;;  %v1981_v46 = vmul.f32 %v1814_v62, %v4136_v52  ;;  %v6435_v62 = vld [vmem:[#allocation38_spill] sm:$0xff] }
 0x22a   : > { %vm2592_vm12 = vcmp.lt.s32.totalorder %v2502_v18, 524287  ;;  %v2950_v36 = vand.u32 524287, %v2886_v30  ;;  %v3592_v34 = vcvt.f32.s32 %v3591_v11  ;;  %v2110_v41 = vfloor.f32 %v2046_v2 }
 0x22b   : > { %v2593_v59 = vsel %vm2592_vm12, %v2502_v18, 524287  ;;  %vm2590_vm13 = vcmp.lt.s32.totalorder %v2501_v43, 524287  ;;  %v2949_v61 = vand.u32 524287, %v2885_v58  ;;  %v2440_v26 = vmul.u32 %v6396_v27, %v2240_v9 }
 0x22c   : > { %v3020_v7 = vsel %vm2993_vm1, %v2593_v59, %v2950_v36  ;;  %v2591_v17 = vsel %vm2590_vm13, %v2501_v43, 524287  ;;  %v2824_v47 = vmul.u32 805459861, %v2240_v9  ;;  %v2239_v35 = vadd.s32 %v3592_v34, %v6395_v54  ;;  %v1830_v43 = vpop.permute.xlu1 %1829  ;;  %v1842_v36 = vpop.permute.xlu0 %1841  ;;  %v6436_v59 = vld [vmem:[#allocation40_spill] sm:$0xff] }
 0x22d   : > { %v3088_v20 = vadd.s32 %v6403_v45, %v3020_v7  ;;  %v3019_v48 = vsel %vm2993_vm1, %v2591_v17, %v2949_v61  ;;  %v2504_v16 = vadd.s32 %v2440_v26, %v4943_v10  ;;  %v3597_v38 = vtrunc.f32 %v2110_v41  ;;  %v6434_v10 = vld [vmem:[#allocation33_spill] sm:$0xff] }
 0x22e   : > { %v3087_v13 = vadd.s32 %v6403_v45, %v3019_v48  ;;  %v2888_v37 = vxor.u32 %v2824_v47, %v4954_v4  ;;  %v2439_v44 = vmul.u32 %v6396_v27, %v2239_v35  ;;  %v2823_v12 = vmul.u32 805459861, %v2239_v35 }
 0x22f   : > { %3152 = vst [vmem:[%s5324_s30 + $0xd0] sm:$0xff] %v3088_v20  ;;  %vm2596_vm14 = vcmp.lt.s32.totalorder %v2504_v16, 524287  ;;  %v3598_v53 = vcvt.f32.s32 %v3597_v38  ;;  %v2045_v1 = vadd.f32 0.5, %v1981_v46  ;;  %v1984_v33 = vmul.f32 %v1826_v6, %v4136_v52 }
 0x230   : > { %3151 = vst [vmem:[%s5324_s30 + $0xc8] sm:$0xff] %v3087_v13  ;;  %v2597_v14 = vsel %vm2596_vm14, %v2504_v16, 524287  ;;  %v2952_v29 = vand.u32 524287, %v2888_v37  ;;  %v2503_v55 = vadd.s32 %v2439_v44, %v6434_v10  ;;  %v2887_v28 = vxor.u32 %v2823_v12, %v6435_v62 }
 0x231   : > { %v2242_v39 = vadd.s32 %v3598_v53, %v6395_v54  ;;  %v2109_v4 = vfloor.f32 %v2045_v1  ;;  %v2048_v40 = vadd.f32 0.5, %v1984_v33  ;;  %v1983_v57 = vmul.f32 %v1822_v60, %v4136_v52  ;;  %v1838_v53 = vpop.permute.xlu1 %1837 }
 0x232   : > { %v3022_v18 = vsel %vm2993_vm1, %v2597_v14, %v2952_v29  ;;  %vm2594_vm15 = vcmp.lt.s32.totalorder %v2503_v55, 524287  ;;  %v2951_v56 = vand.u32 524287, %v2887_v28  ;;  %v1986_v30 = vmul.f32 %v1834_v8, %v4136_v52 }
 0x233   : > { %v3090_v11 = vadd.s32 %v6403_v45, %v3022_v18  ;;  %v2595_v2 = vsel %vm2594_vm15, %v2503_v55, 524287  ;;  %v2442_v6 = vmul.u32 %v6396_v27, %v2242_v39  ;;  %v2826_v49 = vmul.u32 805459861, %v2242_v39  ;;  %v6437_v39 = vld [vmem:[#allocation76_spill] sm:$0xff] }
 0x234   : > { %v3021_v50 = vsel %vm2993_vm1, %v2595_v2, %v2951_v56  ;;  %v3595_v58 = vtrunc.f32 %v2109_v4  ;;  %v2112_v9 = vfloor.f32 %v2048_v40  ;;  %v2047_v46 = vadd.f32 0.5, %v1983_v57  ;;  %v6438_v40 = vld [vmem:[#allocation35_spill] sm:$0xff] }
 0x235   : > { %3154 = vst [vmem:[%s5324_s30 + $0xe0] sm:$0xff] %v3090_v11  ;;  %v3089_v34 = vadd.s32 %v6403_v45, %v3021_v50  ;;  %v2506_v41 = vadd.s32 %v2442_v6, %v4972_v21  ;;  %v2890_v61 = vxor.u32 %v2826_v49, %v6436_v59  ;;  %v2050_v26 = vadd.f32 0.5, %v1986_v30  ;;  %v1850_v30 = vpop.permute.xlu0 %1849  ;;  %v6439_v50 = vld [vmem:[#allocation39_spill] sm:$0xff] }
 0x236   : > { %v3596_v7 = vcvt.f32.s32 %v3595_v58  ;;  %v3601_v17 = vtrunc.f32 %v2112_v9  ;;  %v2111_v47 = vfloor.f32 %v2047_v46  ;;  %v1985_v35 = vmul.f32 %v1830_v43, %v4136_v52  ;;  %v6440_v9 = vld [vmem:[#allocation44_spill] sm:$0xff] }
 0x237   : > { %3153 = vst [vmem:[%s5324_s30 + $0xd8] sm:$0xff] %v3089_v34  ;;  %vm2600_vm0 = vcmp.lt.s32.totalorder %v2506_v41, 524287  ;;  %v2954_v20 = vand.u32 524287, %v2890_v61  ;;  %v2114_v48 = vfloor.f32 %v2050_v26  ;;  %v1988_v16 = vmul.f32 %v1842_v36, %v4136_v52  ;;  %v1846_v61 = vpop.permute.xlu1 %1845 }
 0x238   : > { %v2601_v38 = vsel %vm2600_vm0, %v2506_v41, 524287  ;;  %v2241_v60 = vadd.s32 %v3596_v7, %v6395_v54  ;;  %v3602_v13 = vcvt.f32.s32 %v3601_v17  ;;  %v3599_v21 = vtrunc.f32 %v2111_v47 }
 0x239   : > { %v3024_v37 = vsel %vm2993_vm1, %v2601_v38, %v2954_v20  ;;  %v3605_v44 = vtrunc.f32 %v2114_v48  ;;  %v2049_v12 = vadd.f32 0.5, %v1985_v35  ;;  %v2052_v8 = vadd.f32 0.5, %v1988_v16  ;;  %v6441_v20 = vld [vmem:[#allocation37_spill] sm:$0xff]  ;;  %v6442_v16 = vld [vmem:[#allocation42_spill] sm:$0xff] }
 0x23a   : > { %v3092_v1 = vadd.s32 %v6403_v45, %v3024_v37  ;;  %v2441_v33 = vmul.u32 %v6396_v27, %v2241_v60  ;;  %v2825_v14 = vmul.u32 805459861, %v2241_v60  ;;  %v2244_v29 = vadd.s32 %v3602_v13, %v6395_v54  ;;  %v6443_v13 = vld [vmem:[#allocation80_spill] sm:$0xff] }
 0x23b   : > { %v3600_v10 = vcvt.f32.s32 %v3599_v21  ;;  %v3606_v55 = vcvt.f32.s32 %v3605_v44  ;;  %v2113_v62 = vfloor.f32 %v2049_v12  ;;  %v2116_v28 = vfloor.f32 %v2052_v8  ;;  %v1858_v12 = vpop.permute.xlu0 %1857 }
 0x23c   : > { %3156 = vst [vmem:[%s5324_s30 + $0xf0] sm:$0xff] %v3092_v1  ;;  %v2505_v4 = vadd.s32 %v2441_v33, %v6437_v39  ;;  %v2889_v57 = vxor.u32 %v2825_v14, %v6438_v40  ;;  %v2444_v18 = vmul.u32 %v6396_v27, %v2244_v29  ;;  %v2828_v56 = vmul.u32 805459861, %v2244_v29  ;;  %v6444_v29 = vld [vmem:[#allocation79_spill] sm:$0xff]  ;;  %v1854_v40 = vpop.permute.xlu1 %1853 }
 0x23d   : > { %v2243_v11 = vadd.s32 %v3600_v10, %v6395_v54  ;;  %v2246_v2 = vadd.s32 %v3606_v55, %v6395_v54  ;;  %v3603_v6 = vtrunc.f32 %v2113_v62  ;;  %v3609_v49 = vtrunc.f32 %v2116_v28 }
 0x23e   : > { %vm2598_vm2 = vcmp.lt.s32.totalorder %v2505_v4, 524287  ;;  %v2953_v43 = vand.u32 524287, %v2889_v57  ;;  %v2508_v58 = vadd.s32 %v2444_v18, %v6439_v50  ;;  %v2892_v46 = vxor.u32 %v2828_v56, %v6440_v9  ;;  %v6445_v56 = vld [vmem:[#allocation41_spill] sm:$0xff] }
 0x23f   : > { %v2599_v36 = vsel %vm2598_vm2, %v2505_v4, 524287  ;;  %v2443_v34 = vmul.u32 %v6396_v27, %v2243_v11  ;;  %v2827_v41 = vmul.u32 805459861, %v2243_v11  ;;  %v3604_v59 = vcvt.f32.s32 %v3603_v6  ;;  %v6446_v6 = vld [vmem:[#allocation78_spill] sm:$0xff] }
 0x240   : > { %v3023_v26 = vsel %vm2993_vm1, %v2599_v36, %v2953_v43  ;;  %vm2604_vm3 = vcmp.lt.s32.totalorder %v2508_v58, 524287  ;;  %v2956_v7 = vand.u32 524287, %v2892_v46  ;;  %v2446_v17 = vmul.u32 %v6396_v27, %v2246_v2 }
 0x241   : > { %v3091_v47 = vadd.s32 %v6403_v45, %v3023_v26  ;;  %v2605_v35 = vsel %vm2604_vm3, %v2508_v58, 524287  ;;  %v2507_v48 = vadd.s32 %v2443_v34, %v6441_v20  ;;  %v2891_v38 = vxor.u32 %v2827_v41, %v6442_v16  ;;  %v1866_v34 = vpop.permute.xlu0 %1865  ;;  %v6447_v26 = vld [vmem:[#allocation48_spill] sm:$0xff] }
 0x242   : > { %v3026_v60 = vsel %vm2993_vm1, %v2605_v35, %v2956_v7  ;;  %v2510_v21 = vadd.s32 %v2446_v17, %v6443_v13  ;;  %v2830_v37 = vmul.u32 805459861, %v2246_v2  ;;  %v2245_v44 = vadd.s32 %v3604_v59, %v6395_v54  ;;  %v6448_v17 = vld [vmem:[#allocation81_spill] sm:$0xff] }
 0x243   : > { %3155 = vst [vmem:[%s5324_s30 + $0xe8] sm:$0xff] %v3091_v47  ;;  %v3094_v8 = vadd.s32 %v6403_v45, %v3026_v60  ;;  %vm2602_vm4 = vcmp.lt.s32.totalorder %v2507_v48, 524287  ;;  %v2955_v1 = vand.u32 524287, %v2891_v38  ;;  %v3610_v33 = vcvt.f32.s32 %v3609_v49  ;;  %v1862_v38 = vpop.permute.xlu1 %1861 }
 0x244   : > { %v2603_v14 = vsel %vm2602_vm4, %v2507_v48, 524287  ;;  %vm2608_vm5 = vcmp.lt.s32.totalorder %v2510_v21, 524287  ;;  %v2894_v10 = vxor.u32 %v2830_v37, %v6444_v29  ;;  %v2445_v55 = vmul.u32 %v6396_v27, %v2245_v44 }
 0x245   : > { %3158 = vst [vmem:[%s5324_s30 + $0x100] sm:$0xff] %v3094_v8  ;;  %v3025_v62 = vsel %vm2993_vm1, %v2603_v14, %v2955_v1  ;;  %v2609_v28 = vsel %vm2608_vm5, %v2510_v21, 524287  ;;  %v2829_v39 = vmul.u32 805459861, %v2245_v44  ;;  %v2248_v4 = vadd.s32 %v3610_v33, %v6395_v54 }
 0x246   : > { %v3093_v57 = vadd.s32 %v6403_v45, %v3025_v62  ;;  %v2958_v18 = vand.u32 524287, %v2894_v10  ;;  %v2509_v11 = vadd.s32 %v2445_v55, %v6445_v56  ;;  %v1987_v2 = vmul.f32 %v1838_v53, %v4136_v52  ;;  %v1874_v55 = vpop.permute.xlu0 %1873 }
 0x247   : > { %v2893_v49 = vxor.u32 %v2829_v39, %v6446_v6  ;;  %v2448_v43 = vmul.u32 %v6396_v27, %v2248_v4  ;;  %v2832_v50 = vmul.u32 805459861, %v2248_v4  ;;  %v1990_v58 = vmul.f32 %v1850_v30, %v4136_v52 }
 0x248   : > { %3157 = vst [vmem:[%s5324_s30 + $0xf8] sm:$0xff] %v3093_v57  ;;  %v3028_v9 = vsel %vm2993_vm1, %v2609_v28, %v2958_v18  ;;  %vm2606_vm6 = vcmp.lt.s32.totalorder %v2509_v11, 524287  ;;  %v2051_v46 = vadd.f32 0.5, %v1987_v2  ;;  %v1989_v36 = vmul.f32 %v1846_v61, %v4136_v52 }
 0x249   : > { %v3096_v41 = vadd.s32 %v6403_v45, %v3028_v9  ;;  %v2607_v53 = vsel %vm2606_vm6, %v2509_v11, 524287  ;;  %v2957_v59 = vand.u32 524287, %v2893_v49  ;;  %v2512_v7 = vadd.s32 %v2448_v43, %v6447_v26  ;;  %v6450_v26 = vld [vmem:[#allocation43_spill] sm:$0xff] }
 0x24a   : > { %v2896_v47 = vxor.u32 %v2832_v50, %v6448_v17  ;;  %v2115_v35 = vfloor.f32 %v2051_v46  ;;  %v2054_v20 = vadd.f32 0.5, %v1990_v58  ;;  %v2053_v30 = vadd.f32 0.5, %v1989_v36 }
 0x24b   : > { %3160 = vst [vmem:[%s5324_s30 + $0x110] sm:$0xff] %v3096_v41  ;;  %v3027_v48 = vsel %vm2993_vm1, %v2607_v53, %v2957_v59  ;;  %vm2612_vm7 = vcmp.lt.s32.totalorder %v2512_v7, 524287  ;;  %v1992_v61 = vmul.f32 %v1858_v12, %v4136_v52  ;;  %v1991_v16 = vmul.f32 %v1854_v40, %v4136_v52  ;;  %v6449_v53 = vld [vmem:[#allocation82_spill] sm:$0xff] }
 0x24c   : > { %v3095_v60 = vadd.s32 %v6403_v45, %v3027_v48  ;;  %v2613_v13 = vsel %vm2612_vm7, %v2512_v7, 524287  ;;  %v2960_v21 = vand.u32 524287, %v2896_v47  ;;  %v3607_v37 = vtrunc.f32 %v2115_v35 }
 0x24d   : > { %v2118_v44 = vfloor.f32 %v2054_v20  ;;  %v2117_v8 = vfloor.f32 %v2053_v30  ;;  %v2056_v1 = vadd.f32 0.5, %v1992_v61  ;;  %v2055_v33 = vadd.f32 0.5, %v1991_v16 }
 0x24e   : > { %3159 = vst [vmem:[%s5324_s30 + $0x108] sm:$0xff] %v3095_v60  ;;  %v3030_v14 = vsel %vm2993_vm1, %v2613_v13, %v2960_v21  ;;  %v3608_v29 = vcvt.f32.s32 %v3607_v37  ;;  %v1994_v12 = vmul.f32 %v1866_v34, %v4136_v52  ;;  %v1993_v10 = vmul.f32 %v1862_v38, %v4136_v52 }
 0x24f   : > { %v3098_v62 = vadd.s32 %v6403_v45, %v3030_v14  ;;  %v3613_v28 = vtrunc.f32 %v2118_v44  ;;  %v3611_v39 = vtrunc.f32 %v2117_v8  ;;  %v2120_v4 = vfloor.f32 %v2056_v1  ;;  %v6451_v8 = vld [vmem:[#allocation45_spill] sm:$0xff] }
 0x250   : > { %v2247_v40 = vadd.s32 %v3608_v29, %v6395_v54  ;;  %v2119_v57 = vfloor.f32 %v2055_v33  ;;  %v2058_v18 = vadd.f32 0.5, %v1994_v12  ;;  %v2057_v56 = vadd.f32 0.5, %v1993_v10  ;;  %v6452_v33 = vld [vmem:[#allocation50_spill] sm:$0xff] }
 0x251   : > { %3162 = vst [vmem:[%s5324_s30 + $0x120] sm:$0xff] %v3098_v62  ;;  %v3614_v11 = vcvt.f32.s32 %v3613_v28  ;;  %v3612_v2 = vcvt.f32.s32 %v3611_v39  ;;  %v3617_v6 = vtrunc.f32 %v2120_v4  ;;  %v1996_v49 = vmul.f32 %v1874_v55, %v4136_v52 }
 0x252   : > { %v2447_v43 = vmul.u32 %v6396_v27, %v2247_v40  ;;  %v2831_v50 = vmul.u32 805459861, %v2247_v40  ;;  %v3615_v58 = vtrunc.f32 %v2119_v57  ;;  %v2122_v9 = vfloor.f32 %v2058_v18  ;;  %v1870_v40 = vpop.permute.xlu1 %1869 }
 0x253   : > { %v2250_v46 = vadd.s32 %v3614_v11, %v6395_v54  ;;  %v2249_v36 = vadd.s32 %v3612_v2, %v6395_v54  ;;  %v3618_v34 = vcvt.f32.s32 %v3617_v6  ;;  %v2121_v41 = vfloor.f32 %v2057_v56 }
 0x254   : > { %v2511_v59 = vadd.s32 %v2447_v43, %v6449_v53  ;;  %v2895_v7 = vxor.u32 %v2831_v50, %v6450_v26  ;;  %v3616_v17 = vcvt.f32.s32 %v3615_v58  ;;  %v3621_v47 = vtrunc.f32 %v2122_v9  ;;  %v1882_v43 = vpop.permute.xlu0 %1881  ;;  %v6454_v53 = vld [vmem:[#allocation47_spill] sm:$0xff] }
 0x255   : > { %v2450_v35 = vmul.u32 %v6396_v27, %v2250_v46  ;;  %v2834_v20 = vmul.u32 805459861, %v2250_v46  ;;  %v2252_v30 = vadd.s32 %v3618_v34, %v6395_v54  ;;  %v3619_v48 = vtrunc.f32 %v2121_v41  ;;  %v6453_v34 = vld [vmem:[#allocation84_spill] sm:$0xff] }
 0x256   : > { %vm2610_vm8 = vcmp.lt.s32.totalorder %v2511_v59, 524287  ;;  %v2959_v61 = vand.u32 524287, %v2895_v7  ;;  %v2449_v16 = vmul.u32 %v6396_v27, %v2249_v36  ;;  %v2833_v38 = vmul.u32 805459861, %v2249_v36 }
 0x257   : > { %v2611_v60 = vsel %vm2610_vm8, %v2511_v59, 524287  ;;  %v2514_v13 = vadd.s32 %v2450_v35, %v5076_v23  ;;  %v2898_v21 = vxor.u32 %v2834_v20, %v5079_v24  ;;  %v2452_v37 = vmul.u32 %v6396_v27, %v2252_v30 }
 0x258   : > { %v3029_v44 = vsel %vm2993_vm1, %v2611_v60, %v2959_v61  ;;  %v2513_v1 = vadd.s32 %v2449_v16, %v6451_v8  ;;  %v2897_v14 = vxor.u32 %v2833_v38, %v6452_v33  ;;  %v2836_v29 = vmul.u32 805459861, %v2252_v30  ;;  %v6456_v33 = vld [vmem:[#allocation52_spill] sm:$0xff] }
 0x259   : > { %v3097_v12 = vadd.s32 %v6403_v45, %v3029_v44  ;;  %vm2616_vm9 = vcmp.lt.s32.totalorder %v2514_v13, 524287  ;;  %v2962_v10 = vand.u32 524287, %v2898_v21  ;;  %v2516_v55 = vadd.s32 %v2452_v37, %v5091_v3  ;;  %v6455_v37 = vld [vmem:[#allocation49_spill] sm:$0xff] }
 0x25a   : > { %v2617_v62 = vsel %vm2616_vm9, %v2514_v13, 524287  ;;  %vm2614_vm10 = vcmp.lt.s32.totalorder %v2513_v1, 524287  ;;  %v2961_v23 = vand.u32 524287, %v2897_v14  ;;  %v2900_v24 = vxor.u32 %v2836_v29, %v5094_v19  ;;  %v6457_v29 = vld [vmem:[#allocation83_spill] sm:$0xff] }
 0x25b   : > { %3161 = vst [vmem:[%s5324_s30 + $0x118] sm:$0xff] %v3097_v12  ;;  %v3032_v28 = vsel %vm2993_vm1, %v2617_v62, %v2962_v10  ;;  %v2615_v39 = vsel %vm2614_vm10, %v2513_v1, 524287  ;;  %vm2620_vm11 = vcmp.lt.s32.totalorder %v2516_v55, 524287  ;;  %v2251_v4 = vadd.s32 %v3616_v17, %v6395_v54 }
 0x25c   : > { %v3100_v57 = vadd.s32 %v6403_v45, %v3032_v28  ;;  %v3031_v3 = vsel %vm2993_vm1, %v2615_v39, %v2961_v23  ;;  %v2621_v18 = vsel %vm2620_vm11, %v2516_v55, 524287  ;;  %v2964_v56 = vand.u32 524287, %v2900_v24  ;;  %v1890_v39 = vpop.permute.xlu0 %1889 }
 0x25d   : > { %v3099_v19 = vadd.s32 %v6403_v45, %v3031_v3  ;;  %v2451_v11 = vmul.u32 %v6396_v27, %v2251_v4  ;;  %v2835_v2 = vmul.u32 805459861, %v2251_v4  ;;  %v3622_v6 = vcvt.f32.s32 %v3621_v47 }
 0x25e   : > { %3164 = vst [vmem:[%s5324_s30 + $0x130] sm:$0xff] %v3100_v57  ;;  %v3034_v50 = vsel %vm2993_vm1, %v2621_v18, %v2964_v56  ;;  %v3620_v58 = vcvt.f32.s32 %v3619_v48  ;;  %v2060_v9 = vadd.f32 0.5, %v1996_v49  ;;  %v1995_v46 = vmul.f32 %v1870_v40, %v4136_v52  ;;  %v1878_v48 = vpop.permute.xlu1 %1877 }
 0x25f   : > { %3163 = vst [vmem:[%s5324_s30 + $0x128] sm:$0xff] %v3099_v19  ;;  %v3102_v36 = vadd.s32 %v6403_v45, %v3034_v50  ;;  %v2515_v41 = vadd.s32 %v2451_v11, %v6453_v34  ;;  %v2899_v59 = vxor.u32 %v2835_v2, %v6454_v53  ;;  %v2254_v26 = vadd.s32 %v3622_v6, %v6395_v54 }
 0x260   : > { %v2253_v7 = vadd.s32 %v3620_v58, %v6395_v54  ;;  %v2124_v17 = vfloor.f32 %v2060_v9  ;;  %v2059_v47 = vadd.f32 0.5, %v1995_v46  ;;  %v1998_v35 = vmul.f32 %v1882_v43, %v4136_v52  ;;  %v6458_v46 = vld [vmem:[#allocation51_spill] sm:$0xff] }
 0x261   : > { %3166 = vst [vmem:[%s5324_s30 + $0x140] sm:$0xff] %v3102_v36  ;;  %vm2618_vm12 = vcmp.lt.s32.totalorder %v2515_v41, 524287  ;;  %v2963_v49 = vand.u32 524287, %v2899_v59  ;;  %v2454_v20 = vmul.u32 %v6396_v27, %v2254_v26  ;;  %v2838_v30 = vmul.u32 805459861, %v2254_v26 }
 0x262   : > { %v2619_v61 = vsel %vm2618_vm12, %v2515_v41, 524287  ;;  %v2453_v16 = vmul.u32 %v6396_v27, %v2253_v7  ;;  %v2837_v38 = vmul.u32 805459861, %v2253_v7  ;;  %v3625_v60 = vtrunc.f32 %v2124_v17  ;;  %v1886_v18 = vpop.permute.xlu1 %1885 }
 0x263   : > { %v3033_v13 = vsel %vm2993_vm1, %v2619_v61, %v2963_v49  ;;  %v2518_v21 = vadd.s32 %v2454_v20, %v5117_v5  ;;  %v2902_v44 = vxor.u32 %v2838_v30, %v6455_v37  ;;  %v2123_v8 = vfloor.f32 %v2059_v47  ;;  %v1898_v49 = vpop.permute.xlu0 %1897  ;;  %v6459_v30 = vld [vmem:[#allocation54_spill] sm:$0xff] }
 0x264   : > { %v3101_v1 = vadd.s32 %v6403_v45, %v3033_v13  ;;  %v2517_v14 = vadd.s32 %v2453_v16, %v6456_v33  ;;  %v2901_v12 = vxor.u32 %v2837_v38, %v6457_v29  ;;  %v3626_v10 = vcvt.f32.s32 %v3625_v60 }
 0x265   : > { %vm2624_vm13 = vcmp.lt.s32.totalorder %v2518_v21, 524287  ;;  %v2966_v55 = vand.u32 524287, %v2902_v44  ;;  %v3623_v62 = vtrunc.f32 %v2123_v8  ;;  %v2062_v23 = vadd.f32 0.5, %v1998_v35 }
 0x266   : > { %3165 = vst [vmem:[%s5324_s30 + $0x138] sm:$0xff] %v3101_v1  ;;  %v2625_v24 = vsel %vm2624_vm13, %v2518_v21, 524287  ;;  %vm2622_vm14 = vcmp.lt.s32.totalorder %v2517_v14, 524287  ;;  %v2965_v28 = vand.u32 524287, %v2901_v12  ;;  %v2256_v5 = vadd.s32 %v3626_v10, %v6395_v54  ;;  %v1894_v38 = vpop.permute.xlu1 %1893 }
 0x267   : > { %v3036_v4 = vsel %vm2993_vm1, %v2625_v24, %v2966_v55  ;;  %v2623_v40 = vsel %vm2622_vm14, %v2517_v14, 524287  ;;  %v3624_v57 = vcvt.f32.s32 %v3623_v62  ;;  %v2126_v3 = vfloor.f32 %v2062_v23  ;;  %v6461_v55 = vld [vmem:[#allocation87_spill] sm:$0xff] }
 0x268   : > { %v3104_v56 = vadd.s32 %v6403_v45, %v3036_v4  ;;  %v3035_v19 = vsel %vm2993_vm1, %v2623_v40, %v2965_v28  ;;  %v2456_v11 = vmul.u32 %v6396_v27, %v2256_v5  ;;  %v2840_v2 = vmul.u32 805459861, %v2256_v5  ;;  %v6462_v5 = vld [vmem:[#allocation53_spill] sm:$0xff] }
 0x269   : > { %v3103_v6 = vadd.s32 %v6403_v45, %v3035_v19  ;;  %v2255_v43 = vadd.s32 %v3624_v57, %v6395_v54  ;;  %v3629_v50 = vtrunc.f32 %v2126_v3  ;;  %v1997_v58 = vmul.f32 %v1878_v48, %v4136_v52  ;;  %v6460_v48 = vld [vmem:[#allocation86_spill] sm:$0xff]  ;;  %v1906_v57 = vpop.permute.xlu0 %1905 }
 0x26a   : > { %3168 = vst [vmem:[%s5324_s30 + $0x150] sm:$0xff] %v3104_v56  ;;  %v2520_v9 = vadd.s32 %v2456_v11, %v5138_v0  ;;  %v2904_v36 = vxor.u32 %v2840_v2, %v6458_v46  ;;  %v2000_v34 = vmul.f32 %v1890_v39, %v4136_v52  ;;  %v1999_v41 = vmul.f32 %v1886_v18, %v4136_v52  ;;  %v1902_v19 = vpop.permute.xlu1 %1901 }
 0x26b   : > { %3167 = vst [vmem:[%s5324_s30 + $0x148] sm:$0xff] %v3103_v6  ;;  %v2455_v53 = vmul.u32 %v6396_v27, %v2255_v43  ;;  %v2839_v59 = vmul.u32 805459861, %v2255_v43  ;;  %v3630_v26 = vcvt.f32.s32 %v3629_v50  ;;  %v2061_v7 = vadd.f32 0.5, %v1997_v58 }
 0x26c   : > { %vm2628_vm15 = vcmp.lt.s32.totalorder %v2520_v9, 524287  ;;  %v2968_v17 = vand.u32 524287, %v2904_v36  ;;  %v2064_v47 = vadd.f32 0.5, %v2000_v34  ;;  %v2063_v35 = vadd.f32 0.5, %v1999_v41 }
 0x26d   : > { %v2629_v20 = vsel %vm2628_vm15, %v2520_v9, 524287  ;;  %v2519_v0 = vadd.s32 %v2455_v53, %v6459_v30  ;;  %v2903_v61 = vxor.u32 %v2839_v59, %v6460_v48  ;;  %v2258_v16 = vadd.s32 %v3630_v26, %v6395_v54  ;;  %v1914_v48 = vpop.permute.xlu0 %1913 }
 0x26e   : > { %v3038_v60 = vsel %vm2993_vm1, %v2629_v20, %v2968_v17  ;;  %v2125_v13 = vfloor.f32 %v2061_v7  ;;  %v2128_v21 = vfloor.f32 %v2064_v47  ;;  %v2127_v37 = vfloor.f32 %v2063_v35  ;;  %v6463_v47 = vld [vmem:[#allocation85_spill] sm:$0xff] }
 0x26f   : > { %v3106_v44 = vadd.s32 %v6403_v45, %v3038_v60  ;;  %vm2626_vm0 = vcmp.lt.s32.totalorder %v2519_v0, 524287  ;;  %v2967_v8 = vand.u32 524287, %v2903_v61  ;;  %v2458_v1 = vmul.u32 %v6396_v27, %v2258_v16  ;;  %v6465_v61 = vld [vmem:[#allocation55_spill] sm:$0xff] }
 0x270   : > { %v2627_v33 = vsel %vm2626_vm0, %v2519_v0, 524287  ;;  %v2842_v14 = vmul.u32 805459861, %v2258_v16  ;;  %v3627_v29 = vtrunc.f32 %v2125_v13  ;;  %v3633_v12 = vtrunc.f32 %v2128_v21 }
 0x271   : > { %3170 = vst [vmem:[%s5324_s30 + $0x160] sm:$0xff] %v3106_v44  ;;  %v3037_v10 = vsel %vm2993_vm1, %v2627_v33, %v2967_v8  ;;  %v2522_v62 = vadd.s32 %v2458_v1, %v6461_v55  ;;  %v3631_v23 = vtrunc.f32 %v2127_v37  ;;  %v2002_v24 = vmul.f32 %v1898_v49, %v4136_v52  ;;  %v6464_v49 = vld [vmem:[#allocation88_spill] sm:$0xff]  ;;  %v6467_v44 = vld [vmem:[#allocation90_spill] sm:$0xff]  ;;  %v6468_v1 = vld [vmem:[#allocation89_spill] sm:$0xff] }
 0x272   : > { %v3105_v28 = vadd.s32 %v6403_v45, %v3037_v10  ;;  %v2906_v39 = vxor.u32 %v2842_v14, %v6462_v5  ;;  %v3628_v4 = vcvt.f32.s32 %v3627_v29  ;;  %v3634_v40 = vcvt.f32.s32 %v3633_v12 }
 0x273   : > { %vm2632_vm2 = vcmp.lt.s32.totalorder %v2522_v62, 524287  ;;  %v3632_v3 = vcvt.f32.s32 %v3631_v23  ;;  %v2066_v18 = vadd.f32 0.5, %v2002_v24  ;;  %v2001_v56 = vmul.f32 %v1894_v38, %v4136_v52  ;;  %v6466_v38 = vld [vmem:[#allocation91_spill] sm:$0xff] }
 0x274   : > { %3169 = vst [vmem:[%s5324_s30 + $0x158] sm:$0xff] %v3105_v28  ;;  %v2633_v11 = vsel %vm2632_vm2, %v2522_v62, 524287  ;;  %v2970_v2 = vand.u32 524287, %v2906_v39  ;;  %v2257_v6 = vadd.s32 %v3628_v4, %v6395_v54  ;;  %v2260_v43 = vadd.s32 %v3634_v40, %v6395_v54  ;;  %v1910_v39 = vpop.permute.xlu1 %1909 }
 0x275   : > { %v2259_v50 = vadd.s32 %v3632_v3, %v6395_v54  ;;  %v2130_v58 = vfloor.f32 %v2066_v18  ;;  %v2065_v9 = vadd.f32 0.5, %v2001_v56  ;;  %v2004_v46 = vmul.f32 %v1906_v57, %v4136_v52  ;;  %v1922_v18 = vpop.permute.xlu0 %1921 }
 0x276   : > { %v3040_v36 = vsel %vm2993_vm1, %v2633_v11, %v2970_v2  ;;  %v2457_v34 = vmul.u32 %v6396_v27, %v2257_v6  ;;  %v2841_v41 = vmul.u32 805459861, %v2257_v6  ;;  %v2003_v53 = vmul.f32 %v1902_v19, %v4136_v52  ;;  %v6469_v19 = vld [vmem:[#allocation59_spill] sm:$0xff] }
 0x277   : > { %v3108_v59 = vadd.s32 %v6403_v45, %v3040_v36  ;;  %v2460_v26 = vmul.u32 %v6396_v27, %v2260_v43  ;;  %v2844_v7 = vmul.u32 805459861, %v2260_v43  ;;  %v3637_v17 = vtrunc.f32 %v2130_v58 }
 0x278   : > { %v2521_v35 = vadd.s32 %v2457_v34, %v6463_v47  ;;  %v2905_v20 = vxor.u32 %v2841_v41, %v6464_v49  ;;  %v2459_v30 = vmul.u32 %v6396_v27, %v2259_v50  ;;  %v2843_v0 = vmul.u32 805459861, %v2259_v50 }
 0x279   : > { %3172 = vst [vmem:[%s5324_s30 + $0x170] sm:$0xff] %v3108_v59  ;;  %v2524_v16 = vadd.s32 %v2460_v26, %v6465_v61  ;;  %v2908_v60 = vxor.u32 %v2844_v7, %v6466_v38  ;;  %v3638_v13 = vcvt.f32.s32 %v3637_v17  ;;  %v2129_v21 = vfloor.f32 %v2065_v9 }
 0x27a   : > { %vm2630_vm3 = vcmp.lt.s32.totalorder %v2521_v35, 524287  ;;  %v2969_v37 = vand.u32 524287, %v2905_v20  ;;  %v2523_v8 = vadd.s32 %v2459_v30, %v6467_v44  ;;  %v2907_v33 = vxor.u32 %v2843_v0, %v6468_v1  ;;  %v1918_v0 = vpop.permute.xlu1 %1917 }
 0x27b   : > { %v2631_v14 = vsel %vm2630_vm3, %v2521_v35, 524287  ;;  %vm2636_vm4 = vcmp.lt.s32.totalorder %v2524_v16, 524287  ;;  %v2972_v29 = vand.u32 524287, %v2908_v60  ;;  %v2262_v12 = vadd.s32 %v3638_v13, %v6395_v54  ;;  %v6470_v60 = vld [vmem:[#allocation62_spill] sm:$0xff] }
 0x27c   : > { %v3039_v10 = vsel %vm2993_vm1, %v2631_v14, %v2969_v37  ;;  %v2637_v55 = vsel %vm2636_vm4, %v2524_v16, 524287  ;;  %vm2634_vm5 = vcmp.lt.s32.totalorder %v2523_v8, 524287  ;;  %v2971_v62 = vand.u32 524287, %v2907_v33 }
 0x27d   : > { %v3107_v23 = vadd.s32 %v6403_v45, %v3039_v10  ;;  %v3042_v24 = vsel %vm2993_vm1, %v2637_v55, %v2972_v29  ;;  %v2635_v28 = vsel %vm2634_vm5, %v2523_v8, 524287  ;;  %v2462_v5 = vmul.u32 %v6396_v27, %v2262_v12 }
 0x27e   : > { %v3110_v4 = vadd.s32 %v6403_v45, %v3042_v24  ;;  %v3041_v40 = vsel %vm2993_vm1, %v2635_v28, %v2971_v62  ;;  %v2846_v57 = vmul.u32 805459861, %v2262_v12  ;;  %v3635_v3 = vtrunc.f32 %v2129_v21  ;;  %v6471_v21 = vld [vmem:[#allocation56_spill] sm:$0xff]  ;;  %v1930_v62 = vpop.permute.xlu0 %1929 }
 0x27f   : > { %3171 = vst [vmem:[%s5324_s30 + $0x168] sm:$0xff] %v3107_v23  ;;  %v3109_v56 = vadd.s32 %v6403_v45, %v3041_v40  ;;  %v2526_v11 = vadd.s32 %v2462_v5, %v6469_v19  ;;  %v2068_v2 = vadd.f32 0.5, %v2004_v46  ;;  %v2067_v6 = vadd.f32 0.5, %v2003_v53 }
 0x280   : > { %3174 = vst [vmem:[%s5324_s30 + $0x180] sm:$0xff] %v3110_v4  ;;  %v2910_v43 = vxor.u32 %v2846_v57, %v5200_v32  ;;  %v3636_v50 = vcvt.f32.s32 %v3635_v3  ;;  %v2006_v58 = vmul.f32 %v1914_v48, %v4136_v52  ;;  %v2005_v9 = vmul.f32 %v1910_v39, %v4136_v52  ;;  %v1926_v3 = vpop.permute.xlu1 %1925 }
 0x281   : > { %3173 = vst [vmem:[%s5324_s30 + $0x178] sm:$0xff] %v3109_v56  ;;  %vm2640_vm6 = vcmp.lt.s32.totalorder %v2526_v11, 524287  ;;  %v2132_v36 = vfloor.f32 %v2068_v2  ;;  %v2131_v34 = vfloor.f32 %v2067_v6  ;;  %v2008_v41 = vmul.f32 %v1922_v18, %v4136_v52  ;;  %v6472_v56 = vld [vmem:[#allocation92_spill] sm:$0xff] }
 0x282   : > { %v2641_v59 = vsel %vm2640_vm6, %v2526_v11, 524287  ;;  %v2974_v26 = vand.u32 524287, %v2910_v43  ;;  %v2261_v7 = vadd.s32 %v3636_v50, %v6395_v54  ;;  %v2070_v46 = vadd.f32 0.5, %v2006_v58  ;;  %v6473_v11 = vld [vmem:[#allocation57_spill] sm:$0xff] }
 0x283   : > { %v3641_v53 = vtrunc.f32 %v2132_v36  ;;  %v3639_v17 = vtrunc.f32 %v2131_v34  ;;  %v2069_v32 = vadd.f32 0.5, %v2005_v9  ;;  %v2072_v47 = vadd.f32 0.5, %v2008_v41  ;;  %v6474_v43 = vld [vmem:[#allocation93_spill] sm:$0xff] }
 0x284   : > { %v3044_v35 = vsel %vm2993_vm1, %v2641_v59, %v2974_v26  ;;  %v2461_v49 = vmul.u32 %v6396_v27, %v2261_v7  ;;  %v2845_v20 = vmul.u32 805459861, %v2261_v7  ;;  %v2134_v30 = vfloor.f32 %v2070_v46  ;;  %v6475_v58 = vld [vmem:[#allocation61_spill] sm:$0xff] }
 0x285   : > { %v3112_v48 = vadd.s32 %v6403_v45, %v3044_v35  ;;  %v3642_v61 = vcvt.f32.s32 %v3641_v53  ;;  %v3640_v16 = vcvt.f32.s32 %v3639_v17  ;;  %v2133_v38 = vfloor.f32 %v2069_v32  ;;  %v1938_v17 = vpop.permute.xlu0 %1937  ;;  %v6476_v35 = vld [vmem:[#allocation94_spill] sm:$0xff] }
 0x286   : > { %v2525_v13 = vadd.s32 %v2461_v49, %v6470_v60  ;;  %v2909_v37 = vxor.u32 %v2845_v20, %v6471_v21  ;;  %v3645_v44 = vtrunc.f32 %v2134_v30  ;;  %v2136_v8 = vfloor.f32 %v2072_v47  ;;  %v6477_v20 = vld [vmem:[#allocation58_spill] sm:$0xff] }
 0x287   : > { %3176 = vst [vmem:[%s5324_s30 + $0x190] sm:$0xff] %v3112_v48  ;;  %v2264_v1 = vadd.s32 %v3642_v61, %v6395_v54  ;;  %v2263_v33 = vadd.s32 %v3640_v16, %v6395_v54  ;;  %v3643_v14 = vtrunc.f32 %v2133_v38  ;;  %v2007_v29 = vmul.f32 %v1918_v0, %v4136_v52  ;;  %v6478_v61 = vld [vmem:[#allocation60_spill] sm:$0xff]  ;;  %v1934_v38 = vpop.permute.xlu1 %1933 }
 0x288   : > { %vm2638_vm7 = vcmp.lt.s32.totalorder %v2525_v13, 524287  ;;  %v2973_v12 = vand.u32 524287, %v2909_v37  ;;  %v3646_v10 = vcvt.f32.s32 %v3645_v44  ;;  %v3649_v55 = vtrunc.f32 %v2136_v8 }
 0x289   : > { %v2639_v23 = vsel %vm2638_vm7, %v2525_v13, 524287  ;;  %v2464_v24 = vmul.u32 %v6396_v27, %v2264_v1  ;;  %v2848_v28 = vmul.u32 805459861, %v2264_v1  ;;  %v3644_v5 = vcvt.f32.s32 %v3643_v14 }
 0x28a   : > { %v3043_v39 = vsel %vm2993_vm1, %v2639_v23, %v2973_v12  ;;  %v2463_v4 = vmul.u32 %v6396_v27, %v2263_v33  ;;  %v2847_v40 = vmul.u32 805459861, %v2263_v33  ;;  %v2266_v57 = vadd.s32 %v3646_v10, %v6395_v54 }
 0x28b   : > { %v3111_v18 = vadd.s32 %v6403_v45, %v3043_v39  ;;  %v2528_v19 = vadd.s32 %v2464_v24, %v6472_v56  ;;  %v2912_v2 = vxor.u32 %v2848_v28, %v6473_v11  ;;  %v2265_v6 = vadd.s32 %v3644_v5, %v6395_v54 }
 0x28c   : > { %v2527_v50 = vadd.s32 %v2463_v4, %v6474_v43  ;;  %v2911_v9 = vxor.u32 %v2847_v40, %v6475_v58  ;;  %v2466_v36 = vmul.u32 %v6396_v27, %v2266_v57  ;;  %v2850_v34 = vmul.u32 805459861, %v2266_v57 }
 0x28d   : > { %3175 = vst [vmem:[%s5324_s30 + $0x188] sm:$0xff] %v3111_v18  ;;  %vm2644_vm8 = vcmp.lt.s32.totalorder %v2528_v19, 524287  ;;  %v2976_v41 = vand.u32 524287, %v2912_v2  ;;  %v2465_v59 = vmul.u32 %v6396_v27, %v2265_v6  ;;  %v2849_v26 = vmul.u32 805459861, %v2265_v6  ;;  %v1942_v18 = vpop.permute.xlu1 %1941  ;;  %v6479_v6 = vld [vmem:[#allocation98_spill] sm:$0xff] }
 0x28e   : > { %v2645_v7 = vsel %vm2644_vm8, %v2528_v19, 524287  ;;  %vm2642_vm9 = vcmp.lt.s32.totalorder %v2527_v50, 524287  ;;  %v2975_v46 = vand.u32 524287, %v2911_v9  ;;  %v2530_v53 = vadd.s32 %v2466_v36, %v5232_v51 }
 0x28f   : > { %v3046_v32 = vsel %vm2993_vm1, %v2645_v7, %v2976_v41  ;;  %v2643_v47 = vsel %vm2642_vm9, %v2527_v50, 524287  ;;  %v2914_v49 = vxor.u32 %v2850_v34, %v6476_v35  ;;  %v2529_v30 = vadd.s32 %v2465_v59, %v6477_v20  ;;  %v6480_v50 = vld [vmem:[#allocation97_spill] sm:$0xff] }
 0x290   : > { %v3114_v0 = vadd.s32 %v6403_v45, %v3046_v32  ;;  %v3045_v48 = vsel %vm2993_vm1, %v2643_v47, %v2975_v46  ;;  %vm2648_vm10 = vcmp.lt.s32.totalorder %v2530_v53, 524287  ;;  %v2913_v16 = vxor.u32 %v2849_v26, %v6478_v61 }
 0x291   : > { %v3113_v51 = vadd.s32 %v6403_v45, %v3045_v48  ;;  %v2649_v60 = vsel %vm2648_vm10, %v2530_v53, 524287  ;;  %v2978_v13 = vand.u32 524287, %v2914_v49  ;;  %vm2646_vm11 = vcmp.lt.s32.totalorder %v2529_v30, 524287  ;;  %v1950_v48 = vpop.permute.xlu1 %1949 }
 0x292   : > { %3178 = vst [vmem:[%s5324_s30 + $0x1a0] sm:$0xff] %v3114_v0  ;;  %v2647_v21 = vsel %vm2646_vm11, %v2529_v30, 524287  ;;  %v2977_v37 = vand.u32 524287, %v2913_v16  ;;  %v3650_v44 = vcvt.f32.s32 %v3649_v55  ;;  %v2071_v8 = vadd.f32 0.5, %v2007_v29  ;;  %v1946_v29 = vpop.permute.xlu0 %1945 }
 0x293   : > { %3177 = vst [vmem:[%s5324_s30 + $0x198] sm:$0xff] %v3113_v51  ;;  %v3048_v1 = vsel %vm2993_vm1, %v2649_v60, %v2978_v13  ;;  %v2010_v33 = vmul.f32 %v1930_v62, %v4136_v52  ;;  %v2009_v14 = vmul.f32 %v1926_v3, %v4136_v52  ;;  %v2012_v12 = vmul.f32 %v1938_v17, %v4136_v52  ;;  %v6481_v60 = vld [vmem:[#allocation96_spill] sm:$0xff] }
 0x294   : > { %v3116_v10 = vadd.s32 %v6403_v45, %v3048_v1  ;;  %v3047_v23 = vsel %vm2993_vm1, %v2647_v21, %v2977_v37  ;;  %v2268_v55 = vadd.s32 %v3650_v44, %v6395_v54  ;;  %v2135_v24 = vfloor.f32 %v2071_v8  ;;  %v6482_v21 = vld [vmem:[#allocation95_spill] sm:$0xff] }
 0x295   : > { %v3115_v28 = vadd.s32 %v6403_v45, %v3047_v23  ;;  %v2074_v5 = vadd.f32 0.5, %v2010_v33  ;;  %v2073_v39 = vadd.f32 0.5, %v2009_v14  ;;  %v2076_v4 = vadd.f32 0.5, %v2012_v12 }
 0x296   : > { %3180 = vst [vmem:[%s5324_s30 + $0x1b0] sm:$0xff] %v3116_v10  ;;  %v2468_v62 = vmul.u32 %v6396_v27, %v2268_v55  ;;  %v2852_v40 = vmul.u32 805459861, %v2268_v55  ;;  %v3647_v57 = vtrunc.f32 %v2135_v24  ;;  %v2011_v3 = vmul.f32 %v1934_v38, %v4136_v52 }
 0x297   : > { %3179 = vst [vmem:[%s5324_s30 + $0x1a8] sm:$0xff] %v3115_v28  ;;  %v2138_v56 = vfloor.f32 %v2074_v5  ;;  %v2137_v19 = vfloor.f32 %v2073_v39  ;;  %v2140_v11 = vfloor.f32 %v2076_v4  ;;  %v2014_v2 = vmul.f32 %v1946_v29, %v4136_v52  ;;  %v6483_v29 = vld [vmem:[#allocation6_spill] sm:$0xff] }
 0x298   : > { %v2532_v43 = vadd.s32 %v2468_v62, %v6479_v6  ;;  %v2916_v58 = vxor.u32 %v2852_v40, %v6480_v50  ;;  %v3648_v9 = vcvt.f32.s32 %v3647_v57  ;;  %v2075_v36 = vadd.f32 0.5, %v2011_v3  ;;  %v6484_v62 = vld [vmem:[#allocation100_spill] sm:$0xff]  ;;  %v6485_v57 = vld [vmem:[#allocation99_spill] sm:$0xff] }
 0x299   : > { %v3653_v34 = vtrunc.f32 %v2138_v56  ;;  %v3651_v41 = vtrunc.f32 %v2137_v19  ;;  %v3657_v59 = vtrunc.f32 %v2140_v11  ;;  %v2078_v26 = vadd.f32 0.5, %v2014_v2 }
 0x29a   : > { %vm2652_vm12 = vcmp.lt.s32.totalorder %v2532_v43, 524287  ;;  %v2980_v7 = vand.u32 524287, %v2916_v58  ;;  %v2267_v46 = vadd.s32 %v3648_v9, %v6395_v54  ;;  %v2139_v53 = vfloor.f32 %v2075_v36 }
 0x29b   : > { %v2653_v17 = vsel %vm2652_vm12, %v2532_v43, 524287  ;;  %v3654_v32 = vcvt.f32.s32 %v3653_v34  ;;  %v3652_v47 = vcvt.f32.s32 %v3651_v41  ;;  %v3658_v35 = vcvt.f32.s32 %v3657_v59 }
 0x29c   : > { %v3050_v49 = vsel %vm2993_vm1, %v2653_v17, %v2980_v7  ;;  %v2467_v20 = vmul.u32 %v6396_v27, %v2267_v46  ;;  %v2851_v30 = vmul.u32 805459861, %v2267_v46  ;;  %v3655_v0 = vtrunc.f32 %v2139_v53 }
 0x29d   : > { %v3118_v61 = vadd.s32 %v6403_v45, %v3050_v49  ;;  %v2270_v16 = vadd.s32 %v3654_v32, %v6395_v54  ;;  %v2269_v38 = vadd.s32 %v3652_v47, %v6395_v54  ;;  %v2272_v51 = vadd.s32 %v3658_v35, %v6395_v54  ;;  %v6486_v47 = vld [vmem:[#allocation68_spill] sm:$0xff] }
 0x29e   : > { %v2531_v13 = vadd.s32 %v2467_v20, %v6481_v60  ;;  %v2915_v37 = vxor.u32 %v2851_v30, %v6482_v21  ;;  %v3656_v44 = vcvt.f32.s32 %v3655_v0  ;;  %v2142_v8 = vfloor.f32 %v2078_v26  ;;  %v6487_v20 = vld [vmem:[#allocation104_spill] sm:$0xff]  ;;  %v6488_v30 = vld [vmem:[#allocation66_spill] sm:$0xff] }
 0x29f   : > { %3182 = vst [vmem:[%s5324_s30 + $0x1c0] sm:$0xff] %v3118_v61  ;;  %v2470_v1 = vmul.u32 %v6396_v27, %v2270_v16  ;;  %v2854_v33 = vmul.u32 805459861, %v2270_v16  ;;  %v2013_v14 = vmul.f32 %v1942_v18, %v4136_v52  ;;  %v2015_v12 = vmul.f32 %v1950_v48, %v4136_v52  ;;  %v6489_v48 = vld [vmem:[#allocation64_spill] sm:$0xff]  ;;  %v6490_v61 = vld [vmem:[#allocation101_spill] sm:$0xff] }
 0x2a0   : > { %vm2650_vm13 = vcmp.lt.s32.totalorder %v2531_v13, 524287  ;;  %v2979_v10 = vand.u32 524287, %v2915_v37  ;;  %v2469_v23 = vmul.u32 %v6396_v27, %v2269_v38  ;;  %v2853_v55 = vmul.u32 805459861, %v2269_v38 }
 0x2a1   : > { %v2651_v24 = vsel %vm2650_vm13, %v2531_v13, 524287  ;;  %v2534_v28 = vadd.s32 %v2470_v1, %v6483_v29  ;;  %v2918_v5 = vxor.u32 %v2854_v33, %v5277_v42  ;;  %v2472_v39 = vmul.u32 %v6396_v27, %v2272_v51 }
 0x2a2   : > { %v3049_v4 = vsel %vm2993_vm1, %v2651_v24, %v2979_v10  ;;  %v2533_v40 = vadd.s32 %v2469_v23, %v6484_v62  ;;  %v2917_v52 = vxor.u32 %v2853_v55, %v6485_v57  ;;  %v2856_v3 = vmul.u32 805459861, %v2272_v51 }
 0x2a3   : > { %v3117_v18 = vadd.s32 %v6403_v45, %v3049_v4  ;;  %vm2656_vm14 = vcmp.lt.s32.totalorder %v2534_v28, 524287  ;;  %v2982_v56 = vand.u32 524287, %v2918_v5  ;;  %v2536_v19 = vadd.s32 %v2472_v39, %v5289_v31  ;;  %v6495_v39 = vld [vmem:[#allocation7_spill] sm:$0xff] }
 0x2a4   : > { %v2657_v11 = vsel %vm2656_vm14, %v2534_v28, 524287  ;;  %vm2654_vm15 = vcmp.lt.s32.totalorder %v2533_v40, 524287  ;;  %v2981_v2 = vand.u32 524287, %v2917_v52  ;;  %v2920_v42 = vxor.u32 %v2856_v3, %v5292_v63  ;;  %v6497_v3 = vld [vmem:[#allocation46_spill] sm:$0xff] }
 0x2a5   : > { %3181 = vst [vmem:[%s5324_s30 + $0x1b8] sm:$0xff] %v3117_v18  ;;  %v3052_v6 = vsel %vm2993_vm1, %v2657_v11, %v2982_v56  ;;  %v2655_v43 = vsel %vm2654_vm15, %v2533_v40, 524287  ;;  %vm2660_vm0 = vcmp.lt.s32.totalorder %v2536_v19, 524287  ;;  %v2271_v50 = vadd.s32 %v3656_v44, %v6395_v54 }
 0x2a6   : > { %v3120_v58 = vadd.s32 %v6403_v45, %v3052_v6  ;;  %v3051_v31 = vsel %vm2993_vm1, %v2655_v43, %v2981_v2  ;;  %v2661_v9 = vsel %vm2660_vm0, %v2536_v19, 524287  ;;  %v2984_v36 = vand.u32 524287, %v2920_v42 }
 0x2a7   : > { %v3119_v34 = vadd.s32 %v6403_v45, %v3051_v31  ;;  %v2471_v63 = vmul.u32 %v6396_v27, %v2271_v50  ;;  %v2855_v41 = vmul.u32 805459861, %v2271_v50  ;;  %v3661_v59 = vtrunc.f32 %v2142_v8 }
 0x2a8   : > { %v2730_v26 = vmul.u32 2654435761, %v5269_v15  ;;  %3184 = vst [vmem:[%s5324_s30 + $0x1d0] sm:$0xff] %v3120_v58  ;;  %v3054_v7 = vsel %vm2993_vm1, %v2661_v9, %v2984_v36  ;;  %v2077_v46 = vadd.f32 0.5, %v2013_v14  ;;  %v2079_v53 = vadd.f32 0.5, %v2015_v12 }
 0x2a9   : > { %3183 = vst [vmem:[%s5324_s30 + $0x1c8] sm:$0xff] %v3119_v34  ;;  %v3122_v17 = vadd.s32 %v6403_v45, %v3054_v7  ;;  %v2535_v32 = vadd.s32 %v2471_v63, %v5280_v22  ;;  %v2919_v35 = vxor.u32 %v2855_v41, %v6486_v47  ;;  %v3662_v49 = vcvt.f32.s32 %v3661_v59  ;;  %v6492_v22 = vld [vmem:[#allocation8_spill] sm:$0xff] }
 0x2aa   : > { %v2341_v0 = vmul.u32 %v6488_v30, %v6487_v20  ;;  %v6491_v16 = vcvt.f32.s32 %v6490_v61  ;;  %v2141_v51 = vfloor.f32 %v2077_v46  ;;  %v2143_v60 = vfloor.f32 %v2079_v53 }
 0x2ab   : > { %v2729_v13 = vmul.u32 2654435761, %v6487_v20  ;;  %3186 = vst [vmem:[%s5324_s30 + $0x1e0] sm:$0xff] %v3122_v17  ;;  %vm2658_vm2 = vcmp.lt.s32.totalorder %v2535_v32, 524287  ;;  %v2983_v21 = vand.u32 524287, %v2919_v35  ;;  %v2274_v37 = vadd.s32 %v3662_v49, %v6395_v54 }
 0x2ac   : > { %v1695_v38 = vadd.s32 %v6491_v16, %v6489_v48  ;;  %v6493_v44 = vmul.u32 %v6488_v30, %v5269_v15  ;;  %v2659_v1 = vsel %vm2658_vm2, %v2535_v32, 524287  ;;  %v3659_v33 = vtrunc.f32 %v2141_v51  ;;  %v6494_v15 = vld [vmem:[#allocation63_spill] sm:$0xff] }
 0x2ad   : > { %v3663_v14 = vtrunc.f32 %v2143_v60  ;;  %v2794_v12 = vxor.u32 %v2730_v26, %v6492_v22  ;;  %v3053_v10 = vsel %vm2993_vm1, %v2659_v1, %v2983_v21  ;;  %v2474_v23 = vmul.u32 %v6396_v27, %v2274_v37 }
 0x2ae   : > { %v2406_v8 = vadd.s32 %v6493_v44, %v6492_v22  ;;  %v2858_v55 = vmul.u32 805459861, %v2274_v37  ;;  %v2343_v24 = vmul.u32 %v6488_v30, %v1695_v38  ;;  %v3121_v29 = vadd.s32 %v6403_v45, %v3053_v10 }
 0x2af   : > { %v3660_v28 = vcvt.f32.s32 %v3659_v33  ;;  %v3664_v5 = vcvt.f32.s32 %v3663_v14  ;;  %v6496_v4 = vcvt.f32.s32 %v6495_v39  ;;  %v2731_v40 = vmul.u32 2654435761, %v1695_v38 }
 0x2b0   : > { %v2538_v57 = vadd.s32 %v2474_v23, %v2406_v8  ;;  %v2922_v52 = vxor.u32 %v2858_v55, %v2794_v12  ;;  %v6498_v18 = vcvt.f32.s32 %v6497_v3  ;;  %3185 = vst [vmem:[%s5324_s30 + $0x1d8] sm:$0xff] %v3121_v29 }
 0x2b1   : > { %v1113_v62 = vadd.s32 %v6496_v4, %v6494_v15  ;;  %v2273_v19 = vadd.s32 %v3660_v28, %v6395_v54  ;;  %v2275_v11 = vadd.s32 %v3664_v5, %v6395_v54 }
 0x2b2   : > { %v1115_v56 = vadd.s32 %v6498_v18, %v6494_v15  ;;  %vm2664_vm3 = vcmp.lt.s32.totalorder %v2538_v57, 524287  ;;  %v2986_v6 = vand.u32 524287, %v2922_v52 }
 0x2b3   : > { %v2405_v2 = vadd.s32 %v2341_v0, %v1113_v62  ;;  %v2793_v42 = vxor.u32 %v2729_v13, %v1113_v62  ;;  %v2665_v50 = vsel %vm2664_vm3, %v2538_v57, 524287  ;;  %v2473_v58 = vmul.u32 %v6396_v27, %v2273_v19 }
 0x2b4   : > { %v2407_v43 = vadd.s32 %v2343_v24, %v1115_v56  ;;  %v2857_v31 = vmul.u32 805459861, %v2273_v19  ;;  %v2795_v9 = vxor.u32 %v2731_v40, %v1115_v56  ;;  %v3056_v36 = vsel %vm2993_vm1, %v2665_v50, %v2986_v6 }
 0x2b5   : > { %v2475_v34 = vmul.u32 %v6396_v27, %v2275_v11  ;;  %v2859_v63 = vmul.u32 805459861, %v2275_v11  ;;  %v3124_v54 = vadd.s32 %v6403_v45, %v3056_v36  ;;  %v2537_v41 = vadd.s32 %v2473_v58, %v2405_v2 }
 0x2b6   : > { %v2921_v59 = vxor.u32 %v2857_v31, %v2793_v42 }
 0x2b7   : > { %v2539_v26 = vadd.s32 %v2475_v34, %v2407_v43  ;;  %v2923_v7 = vxor.u32 %v2859_v63, %v2795_v9  ;;  %3188 = vst [vmem:[%s5324_s30 + $0x1f0] sm:$0xff] %v3124_v54  ;;  %vm2662_vm4 = vcmp.lt.s32.totalorder %v2537_v41, 524287 }
 0x2b8   : > { %v2985_v46 = vand.u32 524287, %v2921_v59  ;;  %v2663_v53 = vsel %vm2662_vm4, %v2537_v41, 524287 }
 0x2b9   : > { %vm2666_vm5 = vcmp.lt.s32.totalorder %v2539_v26, 524287  ;;  %v2987_v17 = vand.u32 524287, %v2923_v7 }
 0x2ba   : > { %v3055_v27 = vsel %vm2993_vm1, %v2663_v53, %v2985_v46  ;;  %v2667_v32 = vsel %vm2666_vm5, %v2539_v26, 524287 }
 0x2bb   : > { %v3123_v47 = vadd.s32 %v6403_v45, %v3055_v27  ;;  %v3057_v35 = vsel %vm2993_vm1, %v2667_v32, %v2987_v17 }
 0x2bc   : > { %v3125_v49 = vadd.s32 %v6403_v45, %v3057_v35 }
 0x2bd   : > { %3187 = vst [vmem:[%s5324_s30 + $0x1e8] sm:$0xff] %v3123_v47 }
 0x2be   : > { %3189 = vst [vmem:[%s5324_s30 + $0x1f8] sm:$0xff] %v3125_v49 }
 0x2bf   : > { %3728 = shalt.err (!%p3725_p3)
}
 0x2c0   : > { %s3729_s21 = scalar_lea.hbm %s5887_s7, 8192  ;;  %s3733_s24 = scalar_lea.hbm %s5938_s2, 16384 }
 0x2c1   : > { %p3730_p4 = scmp.ne.s32.totalorder %s5887_s7, %s3729_s21  ;;  %p3734_p9 = scmp.lt.s32.totalorder %s5887_s7, %s5938_s2 }
 0x2c2   : > { %p3735_p10 = scmp.lt.s32.totalorder %s3733_s24, %s3729_s21 }
 0x2c3   : > { %p3731_p7 = pnand %p3730_p4, %p3836_p5 }
 0x2c4   : > { %p3736_p11 = por %p3735_p10, %p3734_p9 }
 0x2c5   : > { %p3732_p8 = pneg %p3731_p7 }
 0x2c7   : > { %p3737_p12 = pnand %p3736_p11, %p3732_p8 }
 0x2c9   : > { %3740 = shalt.err (!%p3737_p12)
}
 0x2ca   : > { %s3781_s27 = smov 128   ;;  %s3782_s28 = smov 8  }
 0x2cb   : > { %3665 = dma.vmem_to_hbm [thread:$0]  (%p3836_p5), %s5889_s4, 8192, %s5887_s7, %s5896_s8, %s3781_s27, %s3781_s27, %s3782_s28  }
 0x2cc PF: > { %p3671_p13 = scmp.ge.s32.totalorder %s3775_s12, 2  ;;  %s3219_s29 = sand.u32 1, %s3763_s9  }
 0x2cd   : > { %s3220_s30 = scalar_lea.sflag [#allocation3], %s3219_s29 }
 0x2ce   : > { %p3668_p0 = pnand %p3671_p13, %p3840_p6 }
 0x2d0   : > { %p3669_p1 = pneg %p3668_p0 }
 0x2d2   : > { %3758 = dma.done.wait (%p3669_p1), %s3220_s30, 8192  }
 0x2d3   : > { %3760 = vsyncadd (%p3669_p1), %s3220_s30, 4294959104  ;;  %p12_p2 = scmp.ge.s32.totalorder %s3823_s15, 4   ;;  %s6499_s9 = smov %s3767_s10 }
 0x2d4   : > { %s6500_s10 = smov %s3771_s11  ;;  %s6501_s11 = smov %s3834_s18 }
 0x2d5   : > { %s6502_s12 = smov %s3823_s15  ;;  %14 = sbr.rel (!%p12_p2) target bundleno = 3 (0x3), region = 63 }
 0x2da   :  { %3225 = vsyncpa [#allocation3], 1 }
 0x2db   :  { %3227 = vsyncpa [#allocation3 + $0x1], 1 }

</bundles_post_ra>
